<compile_context>
chip_gen: v7x
topology: tpu7x:2x2x1
jax: 0.10.0
libtpu: 0.0.40
codegen_flags: <defaults>
</compile_context>

<pallas_src>
import functools

import jax
import jax.numpy as jnp
from jax.experimental import pallas as pl
from jax.experimental.pallas import tpu as pltpu

EPS = 1e-5


def _round_up(n, m):
    return ((n + m - 1) // m) * m


def _pick_tile(dim):
    """Largest lane-dense channel tile <=256 dividing dim (dim is a x128 pad)."""
    for cand in (256, 128):
        if dim % cand == 0:
            return cand
    return dim


def _pick_batch_tile(B):
    """Images per grid step: full batch if small, else a multiple of 8 so the
    out-spec sublane dim is either a multiple of 8 or the full array extent."""
    if B <= 8:
        return B
    for cand in (32, 16, 8):
        if B % cand == 0:
            return cand
    return B


# ----------------------------------------------------------------------------
# Kernel 1: conv3x3 (single fused K=9*Cin matmul) + folded BN + ReLU + GAP
#           + fused eval-path neck BN (folded running-stat scale/shift)
# ----------------------------------------------------------------------------
def _conv_bn_relu_gap_kernel(x_ref, w_ref, ss_ref, gfeat_ref, feat_ref,
                             lhs_ref, *, inv_hw):
    # x_ref:     (Bt, H+2, W+2, Cin) bf16  zero-padded images for one batch tile
    # w_ref:     (K_pad, Tc)         bf16  conv weight (taps packed into K, padded)
    # ss_ref:    (4, Tc)             f32   [base_scale, base_shift, neck_scale, neck_shift]
    # gfeat_ref: (Bt, Tc)            f32   global_feat (GAP of base output)
    # feat_ref:  (Bt, Tc)            f32   eval-path neck-BN feature
    # lhs_ref:   (Bt*H*W, K_pad)     bf16  scratch: packed im2col LHS (VMEM-resident)
    Bt, Hp, Wp, Cin = x_ref.shape
    H, W = Hp - 2, Wp - 2
    rows = Bt * H * W
    K = 9 * Cin
    K_pad = lhs_ref.shape[-1]

    # Build the packed LHS ONCE per batch tile; it is reused across all Cout
    # tiles (the channel-tile axis is the inner, 'arbitrary' grid axis and the
    # x block index does not change along it, so x itself is DMA'd once too).
    @pl.when(pl.program_id(1) == 0)
    def _():
        x = x_ref[...]                                            # bf16, already cast in wrapper
        blocks = []
        for b in range(Bt):
            parts = [x[b, dh:dh + H, dw:dw + W, :].reshape(H * W, Cin)
                     for dh in range(3) for dw in range(3)]
            blocks.append(jnp.concatenate(parts, axis=-1))        # (H*W, 9*Cin)
        lhs = jnp.concatenate(blocks, axis=0)                     # (Bt*H*W, 9*Cin)
        if K_pad > K:
            lhs = jnp.concatenate(
                [lhs, jnp.zeros((rows, K_pad - K), lhs.dtype)], axis=-1)
        lhs_ref[...] = lhs

    # One MXU push with K = 9*Cin (lane-dense); accumulation happens in the MXU.
    acc = jnp.dot(lhs_ref[...], w_ref[...],
                  preferred_element_type=jnp.float32)             # (rows, Tc) f32

    ss = ss_ref[...]
    y = jnp.maximum(acc * ss[0:1, :] + ss[1:2, :], 0.0)           # folded base BN + ReLU
    g = jnp.sum(y.reshape(Bt, H * W, -1), axis=1) * inv_hw        # GAP (sum * 1/HW)
    gfeat_ref[...] = g
    feat_ref[...] = g * ss[2:3, :] + ss[3:4, :]                   # fused eval neck BN


def conv_bn_relu_gap_neck(x_nchw, prep):
    """Stand-in backbone stage + GAP + flatten; also emits eval-path neck BN.

    Returns (global_feat_padded, feat_after_padded), both (B, Cout_pad) f32.
    """
    B, Cin, H, W = x_nchw.shape
    Cout_pad = prep["cout_pad"]
    K_pad = prep["k_pad"]

    # NHWC + bf16 cast + 1-pixel zero halo in a single wrapper pass.
    xp = jnp.pad(jnp.transpose(x_nchw, (0, 2, 3, 1)).astype(jnp.bfloat16),
                 ((0, 0), (1, 1), (1, 1), (0, 0)))

    Bt = _pick_batch_tile(B)
    n_bt = B // Bt
    tile_c = _pick_tile(Cout_pad)
    n_ct = Cout_pad // tile_c

    kernel = functools.partial(_conv_bn_relu_gap_kernel,
                               inv_hw=float(1.0 / (H * W)))

    gfeat, feat = pl.pallas_call(
        kernel,
        out_shape=(jax.ShapeDtypeStruct((B, Cout_pad), jnp.float32),
                   jax.ShapeDtypeStruct((B, Cout_pad), jnp.float32)),
        grid=(n_bt, n_ct),
        in_specs=[
            # x: block index constant across the inner channel axis -> one DMA
            #    per batch tile (image is the resident operand within a tile).
            pl.BlockSpec((Bt, H + 2, W + 2, Cin), lambda b, j: (b, 0, 0, 0)),
            pl.BlockSpec((K_pad, tile_c), lambda b, j: (0, j)),
            pl.BlockSpec((4, tile_c), lambda b, j: (0, j)),
        ],
        out_specs=(pl.BlockSpec((Bt, tile_c), lambda b, j: (b, j)),
                   pl.BlockSpec((Bt, tile_c), lambda b, j: (b, j))),
        scratch_shapes=[pltpu.VMEM((Bt * H * W, K_pad), jnp.bfloat16)],
        compiler_params=pltpu.CompilerParams(
            # batch axis parallel (megacore on v7x); channel axis carries the
            # LHS scratch across tiles -> arbitrary.
            dimension_semantics=("parallel", "arbitrary")),
    )(xp, prep["w"], prep["scale_shift"])
    return gfeat, feat


# ----------------------------------------------------------------------------
# Kernel 2: training path — BatchNorm1d (batch stats) + bias-free classifier.
# Single grid step: feature/class dims are lane-padded and small enough to sit
# wholly in VMEM, so the batch-stat BN is computed exactly once.
# ----------------------------------------------------------------------------
def _bnneck_cls_kernel(g_ref, gb_ref, w_ref, cls_ref):
    # g_ref:   (B, C_pad) f32   global_feat (zero in padded columns)
    # gb_ref:  (2, C_pad) f32   [gamma, beta] of the bottleneck BN1d
    # w_ref:   (C_pad, N_pad) bf16 classifier weight (pre-transposed, padded)
    # cls_ref: (B, N_pad) f32   logits (padded columns are zero)
    g = g_ref[...]
    gb = gb_ref[...]
    mean = jnp.mean(g, axis=0, keepdims=True)
    centered = g - mean
    var = jnp.mean(centered * centered, axis=0, keepdims=True)    # biased, torch BN
    feat = centered * jax.lax.rsqrt(var + EPS) * gb[0:1, :] + gb[1:2, :]
    cls_ref[...] = jnp.dot(feat.astype(jnp.bfloat16), w_ref[...],
                           preferred_element_type=jnp.float32)


def bnneck_classifier_train(global_feat_pad, neck_gb, wcls_pad):
    B = global_feat_pad.shape[0]
    Np = wcls_pad.shape[1]
    return pl.pallas_call(
        _bnneck_cls_kernel,
        out_shape=jax.ShapeDtypeStruct((B, Np), jnp.float32),
        in_specs=[pl.BlockSpec(memory_space=pltpu.MemorySpace.VMEM)] * 3,
        out_specs=pl.BlockSpec(memory_space=pltpu.MemorySpace.VMEM),
    )(global_feat_pad, neck_gb, wcls_pad)


# ----------------------------------------------------------------------------
# One-time parameter preparation (layout / cast / fold / pad) — NOT per forward
# ----------------------------------------------------------------------------
def prepare_params(params, num_classes):
    conv_w = params["conv_w"]                         # (3, 3, Cin, Cout) HWIO
    Cin, Cout = conv_w.shape[2], conv_w.shape[3]
    K = 9 * Cin
    K_pad = _round_up(K, 128)                         # lane-dense contraction dim
    Cout_pad = _round_up(Cout, 128)                   # lane-dense outputs

    # Conv weight with the 9 taps packed into K, padded, bf16.
    w = conv_w.reshape(K, Cout).astype(jnp.float32)
    w = jnp.pad(w, ((0, K_pad - K), (0, Cout_pad - Cout))).astype(jnp.bfloat16)

    base_scale = params["base_bn_gamma"] * jax.lax.rsqrt(params["base_bn_var"] + EPS)
    base_shift = params["base_bn_beta"] - params["base_bn_mean"] * base_scale
    neck_scale = params["neck_gamma"] * jax.lax.rsqrt(params["neck_var"] + EPS)
    neck_shift = params["neck_beta"] - params["neck_mean"] * neck_scale

    def _padc(v):
        return jnp.pad(v.astype(jnp.float32), (0, Cout_pad - Cout))

    # Pack all folded scale/shift vectors into a single (4, C_pad) input.
    scale_shift = jnp.stack([_padc(base_scale), _padc(base_shift),
                             _padc(neck_scale), _padc(neck_shift)], axis=0)

    # Pack neck BN affine params into a single (2, C_pad) input.
    neck_gb = jnp.stack([_padc(params["neck_gamma"]),
                         _padc(params["neck_beta"])], axis=0)

    ncls_pad = _round_up(num_classes, 128)
    wcls = params["cls_weight"].T.astype(jnp.float32)             # (C, num_classes)
    wcls = jnp.pad(wcls, ((0, Cout_pad - Cout),
                          (0, ncls_pad - num_classes))).astype(jnp.bfloat16)

    return {
        "w": w,
        "scale_shift": scale_shift,
        "neck_gb": neck_gb,
        "wcls": wcls,
        "cout": Cout,
        "cout_pad": Cout_pad,
        "k_pad": K_pad,
    }


# ----------------------------------------------------------------------------
# Forward matching BagOfTricksBuilder.forward (neck='bnneck')
# ----------------------------------------------------------------------------
def bag_of_tricks_forward(prep, x_nchw, *, num_classes,
                          training=False, neck_feat="after"):
    Cout = prep["cout"]

    # base(x) -> gap -> flatten  (+ fused eval-path bnneck), padded lane-dense.
    gfeat_pad, feat_pad = conv_bn_relu_gap_neck(x_nchw, prep)
    global_feat = gfeat_pad[:, :Cout]

    if training:
        cls_pad = bnneck_classifier_train(gfeat_pad, prep["neck_gb"], prep["wcls"])
        return cls_pad[:, :num_classes], global_feat
    elif neck_feat == "after":
        return feat_pad[:, :Cout]
    else:
        return global_feat


# ----------------------------------------------------------------------------
# Deterministic parameter init (shapes from the module's __init__)
# ----------------------------------------------------------------------------
def init_params(key, cin, feat_dim, num_classes):
    k_conv, k_g, k_b, k_m, k_v, k_cls = jax.random.split(key, 6)
    return {
        # stand-in backbone stage (HWIO conv weight, no bias — ResNet style)
        "conv_w": jax.random.normal(k_conv, (3, 3, cin, feat_dim), jnp.float32) * 0.1,
        "base_bn_gamma": jax.random.uniform(k_g, (feat_dim,), jnp.float32, 0.5, 1.5),
        "base_bn_beta": jax.random.normal(k_b, (feat_dim,), jnp.float32) * 0.1,
        "base_bn_mean": jax.random.normal(k_m, (feat_dim,), jnp.float32) * 0.1,
        "base_bn_var": jax.random.uniform(k_v, (feat_dim,), jnp.float32, 0.5, 1.5),
        # bottleneck BN1d: weights_init_kaiming -> weight=1, bias=0 (bias frozen)
        "neck_gamma": jnp.ones((feat_dim,), jnp.float32),
        "neck_beta": jnp.zeros((feat_dim,), jnp.float32),
        "neck_mean": jnp.zeros((feat_dim,), jnp.float32),
        "neck_var": jnp.ones((feat_dim,), jnp.float32),
        # classifier: weights_init_classifier -> normal(std=0.001), no bias
        "cls_weight": jax.random.normal(k_cls, (num_classes, feat_dim), jnp.float32) * 0.001,
    }


if __name__ == "__main__":
    key = jax.random.PRNGKey(0)
    k_params, k_x = jax.random.split(key)

    B, Cin, H, W = 2, 4, 16, 16
    feat_dim, num_classes = 32, 8   # cfg.SOLVER.FEATURE_DIMENSION, cfg.DATASETS.NUMBER_OF_CLASSES

    params = init_params(k_params, Cin, feat_dim, num_classes)
    prep = prepare_params(params, num_classes)
    x = jax.random.normal(k_x, (B, Cin, H, W), jnp.float32)     # NCHW like PyTorch

    # training path: returns (cls_score, global_feat)
    cls_score, global_feat = bag_of_tricks_forward(
        prep, x, num_classes=num_classes, training=True)
    # eval path with neck_feat='after': returns bnneck feature
    feat_after = bag_of_tricks_forward(
        prep, x, num_classes=num_classes, training=False, neck_feat="after")
    # eval path with neck_feat='before': returns global_feat
    feat_before = bag_of_tricks_forward(
        prep, x, num_classes=num_classes, training=False, neck_feat="before")

    jax.block_until_ready((cls_score, global_feat, feat_after, feat_before))

    assert cls_score.shape == (B, num_classes)
    assert global_feat.shape == (B, feat_dim)
    assert feat_after.shape == (B, feat_dim)
    assert feat_before.shape == (B, feat_dim)
    assert bool(jnp.all(jnp.isfinite(cls_score)))
    assert bool(jnp.all(jnp.isfinite(feat_after)))
    assert bool(jnp.all(jnp.isfinite(feat_before)))
    print("KERNEL_OK")
</pallas_src>

<mosaic_0001>
module attributes {stable_mosaic.version = 11 : i64} {
  func.func @_conv_bn_relu_gap_kernel(%arg0: i32, %arg1: i32, %arg2: memref<2x18x18x4xbf16, #tpu.memory_space<vmem>>, %arg3: memref<128x128xbf16, #tpu.memory_space<vmem>>, %arg4: memref<4x128xf32, #tpu.memory_space<vmem>>, %arg5: memref<2x128xf32, #tpu.memory_space<vmem>>, %arg6: memref<2x128xf32, #tpu.memory_space<vmem>>, %arg7: memref<512x128xbf16, #tpu.memory_space<vmem>>) attributes {dimension_semantics = [#tpu.dimension_semantics<parallel>, #tpu.dimension_semantics<arbitrary>], iteration_bounds = array<i64: 1, 1>, scalar_prefetch = 0 : i64, scratch_operands = 1 : i64, tpu.core_type = #tpu.core_type<tc>, window_params = [{transform_indices = @transform_0, window_bounds = array<i64: 2, 18, 18, 4>}, {transform_indices = @transform_1, window_bounds = array<i64: 128, 128>}, {transform_indices = @transform_2, window_bounds = array<i64: 4, 128>}, {transform_indices = @transform_3, window_bounds = array<i64: 2, 128>}, {transform_indices = @transform_4, window_bounds = array<i64: 2, 128>}]} {
    %c0_i32 = arith.constant 0 : i32
    %0 = arith.cmpi eq, %arg1, %c0_i32 : i32
    %1 = arith.extui %0 : i1 to i32
    %c0_i32_0 = arith.constant 0 : i32
    %2 = arith.cmpi ne, %1, %c0_i32_0 : i32
    scf.if %2 {
      %c0_13 = arith.constant 0 : index
      %c0_14 = arith.constant 0 : index
      %c0_15 = arith.constant 0 : index
      %c0_16 = arith.constant 0 : index
      %27 = vector.load %arg2[%c0_13, %c0_14, %c0_15, %c0_16] : memref<2x18x18x4xbf16, #tpu.memory_space<vmem>>, vector<2x18x18x4xbf16>
      %28 = vector.extract_strided_slice %27 {offsets = [0, 0, 0, 0], sizes = [1, 16, 16, 4], strides = [1, 1, 1, 1]} : vector<2x18x18x4xbf16> to vector<1x16x16x4xbf16>
      %29 = vector.shape_cast %28 : vector<1x16x16x4xbf16> to vector<16x16x4xbf16>
      %30 = vector.shape_cast %29 : vector<16x16x4xbf16> to vector<256x4xbf16>
      %31 = vector.extract_strided_slice %27 {offsets = [0, 0, 1, 0], sizes = [1, 16, 16, 4], strides = [1, 1, 1, 1]} : vector<2x18x18x4xbf16> to vector<1x16x16x4xbf16>
      %32 = vector.shape_cast %31 : vector<1x16x16x4xbf16> to vector<16x16x4xbf16>
      %33 = vector.shape_cast %32 : vector<16x16x4xbf16> to vector<256x4xbf16>
      %34 = vector.extract_strided_slice %27 {offsets = [0, 0, 2, 0], sizes = [1, 16, 16, 4], strides = [1, 1, 1, 1]} : vector<2x18x18x4xbf16> to vector<1x16x16x4xbf16>
      %35 = vector.shape_cast %34 : vector<1x16x16x4xbf16> to vector<16x16x4xbf16>
      %36 = vector.shape_cast %35 : vector<16x16x4xbf16> to vector<256x4xbf16>
      %37 = vector.extract_strided_slice %27 {offsets = [0, 1, 0, 0], sizes = [1, 16, 16, 4], strides = [1, 1, 1, 1]} : vector<2x18x18x4xbf16> to vector<1x16x16x4xbf16>
      %38 = vector.shape_cast %37 : vector<1x16x16x4xbf16> to vector<16x16x4xbf16>
      %39 = vector.shape_cast %38 : vector<16x16x4xbf16> to vector<256x4xbf16>
      %40 = vector.extract_strided_slice %27 {offsets = [0, 1, 1, 0], sizes = [1, 16, 16, 4], strides = [1, 1, 1, 1]} : vector<2x18x18x4xbf16> to vector<1x16x16x4xbf16>
      %41 = vector.shape_cast %40 : vector<1x16x16x4xbf16> to vector<16x16x4xbf16>
      %42 = vector.shape_cast %41 : vector<16x16x4xbf16> to vector<256x4xbf16>
      %43 = vector.extract_strided_slice %27 {offsets = [0, 1, 2, 0], sizes = [1, 16, 16, 4], strides = [1, 1, 1, 1]} : vector<2x18x18x4xbf16> to vector<1x16x16x4xbf16>
      %44 = vector.shape_cast %43 : vector<1x16x16x4xbf16> to vector<16x16x4xbf16>
      %45 = vector.shape_cast %44 : vector<16x16x4xbf16> to vector<256x4xbf16>
      %46 = vector.extract_strided_slice %27 {offsets = [0, 2, 0, 0], sizes = [1, 16, 16, 4], strides = [1, 1, 1, 1]} : vector<2x18x18x4xbf16> to vector<1x16x16x4xbf16>
      %47 = vector.shape_cast %46 : vector<1x16x16x4xbf16> to vector<16x16x4xbf16>
      %48 = vector.shape_cast %47 : vector<16x16x4xbf16> to vector<256x4xbf16>
      %49 = vector.extract_strided_slice %27 {offsets = [0, 2, 1, 0], sizes = [1, 16, 16, 4], strides = [1, 1, 1, 1]} : vector<2x18x18x4xbf16> to vector<1x16x16x4xbf16>
      %50 = vector.shape_cast %49 : vector<1x16x16x4xbf16> to vector<16x16x4xbf16>
      %51 = vector.shape_cast %50 : vector<16x16x4xbf16> to vector<256x4xbf16>
      %52 = vector.extract_strided_slice %27 {offsets = [0, 2, 2, 0], sizes = [1, 16, 16, 4], strides = [1, 1, 1, 1]} : vector<2x18x18x4xbf16> to vector<1x16x16x4xbf16>
      %53 = vector.shape_cast %52 : vector<1x16x16x4xbf16> to vector<16x16x4xbf16>
      %54 = vector.shape_cast %53 : vector<16x16x4xbf16> to vector<256x4xbf16>
      %55 = tpu.concatenate %30, %33, %36, %39, %42, %45, %48, %51, %54 in 1 : vector<256x4xbf16>, vector<256x4xbf16>, vector<256x4xbf16>, vector<256x4xbf16>, vector<256x4xbf16>, vector<256x4xbf16>, vector<256x4xbf16>, vector<256x4xbf16>, vector<256x4xbf16> -> vector<256x36xbf16>
      %56 = vector.extract_strided_slice %27 {offsets = [1, 0, 0, 0], sizes = [1, 16, 16, 4], strides = [1, 1, 1, 1]} : vector<2x18x18x4xbf16> to vector<1x16x16x4xbf16>
      %57 = vector.shape_cast %56 : vector<1x16x16x4xbf16> to vector<16x16x4xbf16>
      %58 = vector.shape_cast %57 : vector<16x16x4xbf16> to vector<256x4xbf16>
      %59 = vector.extract_strided_slice %27 {offsets = [1, 0, 1, 0], sizes = [1, 16, 16, 4], strides = [1, 1, 1, 1]} : vector<2x18x18x4xbf16> to vector<1x16x16x4xbf16>
      %60 = vector.shape_cast %59 : vector<1x16x16x4xbf16> to vector<16x16x4xbf16>
      %61 = vector.shape_cast %60 : vector<16x16x4xbf16> to vector<256x4xbf16>
      %62 = vector.extract_strided_slice %27 {offsets = [1, 0, 2, 0], sizes = [1, 16, 16, 4], strides = [1, 1, 1, 1]} : vector<2x18x18x4xbf16> to vector<1x16x16x4xbf16>
      %63 = vector.shape_cast %62 : vector<1x16x16x4xbf16> to vector<16x16x4xbf16>
      %64 = vector.shape_cast %63 : vector<16x16x4xbf16> to vector<256x4xbf16>
      %65 = vector.extract_strided_slice %27 {offsets = [1, 1, 0, 0], sizes = [1, 16, 16, 4], strides = [1, 1, 1, 1]} : vector<2x18x18x4xbf16> to vector<1x16x16x4xbf16>
      %66 = vector.shape_cast %65 : vector<1x16x16x4xbf16> to vector<16x16x4xbf16>
      %67 = vector.shape_cast %66 : vector<16x16x4xbf16> to vector<256x4xbf16>
      %68 = vector.extract_strided_slice %27 {offsets = [1, 1, 1, 0], sizes = [1, 16, 16, 4], strides = [1, 1, 1, 1]} : vector<2x18x18x4xbf16> to vector<1x16x16x4xbf16>
      %69 = vector.shape_cast %68 : vector<1x16x16x4xbf16> to vector<16x16x4xbf16>
      %70 = vector.shape_cast %69 : vector<16x16x4xbf16> to vector<256x4xbf16>
      %71 = vector.extract_strided_slice %27 {offsets = [1, 1, 2, 0], sizes = [1, 16, 16, 4], strides = [1, 1, 1, 1]} : vector<2x18x18x4xbf16> to vector<1x16x16x4xbf16>
      %72 = vector.shape_cast %71 : vector<1x16x16x4xbf16> to vector<16x16x4xbf16>
      %73 = vector.shape_cast %72 : vector<16x16x4xbf16> to vector<256x4xbf16>
      %74 = vector.extract_strided_slice %27 {offsets = [1, 2, 0, 0], sizes = [1, 16, 16, 4], strides = [1, 1, 1, 1]} : vector<2x18x18x4xbf16> to vector<1x16x16x4xbf16>
      %75 = vector.shape_cast %74 : vector<1x16x16x4xbf16> to vector<16x16x4xbf16>
      %76 = vector.shape_cast %75 : vector<16x16x4xbf16> to vector<256x4xbf16>
      %77 = vector.extract_strided_slice %27 {offsets = [1, 2, 1, 0], sizes = [1, 16, 16, 4], strides = [1, 1, 1, 1]} : vector<2x18x18x4xbf16> to vector<1x16x16x4xbf16>
      %78 = vector.shape_cast %77 : vector<1x16x16x4xbf16> to vector<16x16x4xbf16>
      %79 = vector.shape_cast %78 : vector<16x16x4xbf16> to vector<256x4xbf16>
      %80 = vector.extract_strided_slice %27 {offsets = [1, 2, 2, 0], sizes = [1, 16, 16, 4], strides = [1, 1, 1, 1]} : vector<2x18x18x4xbf16> to vector<1x16x16x4xbf16>
      %81 = vector.shape_cast %80 : vector<1x16x16x4xbf16> to vector<16x16x4xbf16>
      %82 = vector.shape_cast %81 : vector<16x16x4xbf16> to vector<256x4xbf16>
      %83 = tpu.concatenate %58, %61, %64, %67, %70, %73, %76, %79, %82 in 1 : vector<256x4xbf16>, vector<256x4xbf16>, vector<256x4xbf16>, vector<256x4xbf16>, vector<256x4xbf16>, vector<256x4xbf16>, vector<256x4xbf16>, vector<256x4xbf16>, vector<256x4xbf16> -> vector<256x36xbf16>
      %84 = tpu.concatenate %55, %83 in 0 : vector<256x36xbf16>, vector<256x36xbf16> -> vector<512x36xbf16>
      %cst_17 = arith.constant 0.000000e+00 : bf16
      %85 = vector.broadcast %cst_17 : bf16 to vector<512x92xbf16>
      %86 = tpu.concatenate %84, %85 in 1 : vector<512x36xbf16>, vector<512x92xbf16> -> vector<512x128xbf16>
      %c0_18 = arith.constant 0 : index
      %c0_19 = arith.constant 0 : index
      %87 = vector.load %arg7[%c0_18, %c0_19] : memref<512x128xbf16, #tpu.memory_space<vmem>>, vector<512x128xbf16>
      tpu.vector_store %arg7[%c0_18, %c0_19], %86 {strides = array<i32>} : memref<512x128xbf16, #tpu.memory_space<vmem>>, vector<512x128xbf16>,
    } else {
    }
    %c0 = arith.constant 0 : index
    %c0_1 = arith.constant 0 : index
    %3 = vector.load %arg7[%c0, %c0_1] : memref<512x128xbf16, #tpu.memory_space<vmem>>, vector<512x128xbf16>
    %c0_2 = arith.constant 0 : index
    %c0_3 = arith.constant 0 : index
    %4 = vector.load %arg3[%c0_2, %c0_3] : memref<128x128xbf16, #tpu.memory_space<vmem>>, vector<128x128xbf16>
    %cst = arith.constant dense<0.000000e+00> : vector<512x128xf32>
    %5 = tpu.matmul %3, %4, %cst {dimension_numbers = #tpu.dot_dimension_numbers<[1], [0], [0], [1], [0, 0, 1, 1], [], []>} : vector<512x128xbf16>, vector<128x128xbf16>, vector<512x128xf32> -> vector<512x128xf32>
    %c0_4 = arith.constant 0 : index
    %c0_5 = arith.constant 0 : index
    %6 = vector.load %arg4[%c0_4, %c0_5] : memref<4x128xf32, #tpu.memory_space<vmem>>, vector<4x128xf32>
    %7 = vector.extract_strided_slice %6 {offsets = [0, 0], sizes = [1, 128], strides = [1, 1]} : vector<4x128xf32> to vector<1x128xf32>
    %8 = vector.broadcast %7 : vector<1x128xf32> to vector<512x128xf32>
    %9 = arith.mulf %5, %8 : vector<512x128xf32>
    %10 = vector.extract_strided_slice %6 {offsets = [1, 0], sizes = [1, 128], strides = [1, 1]} : vector<4x128xf32> to vector<1x128xf32>
    %11 = vector.broadcast %10 : vector<1x128xf32> to vector<512x128xf32>
    %12 = arith.addf %9, %11 : vector<512x128xf32>
    %cst_6 = arith.constant 0.000000e+00 : f32
    %13 = vector.broadcast %cst_6 : f32 to vector<512x128xf32>
    %14 = arith.maximumf %12, %13 : vector<512x128xf32>
    %15 = vector.shape_cast %14 : vector<512x128xf32> to vector<2x256x128xf32>
    %cst_7 = arith.constant dense<0.000000e+00> : vector<2x128xf32>
    %16 = vector.multi_reduction <add>, %15, %cst_7 [1] : vector<2x256x128xf32> to vector<2x128xf32>
    %cst_8 = arith.constant 3.906250e-03 : f32
    %17 = vector.broadcast %cst_8 : f32 to vector<2x128xf32>
    %18 = arith.mulf %16, %17 : vector<2x128xf32>
    %c0_9 = arith.constant 0 : index
    %c0_10 = arith.constant 0 : index
    %19 = vector.load %arg5[%c0_9, %c0_10] : memref<2x128xf32, #tpu.memory_space<vmem>>, vector<2x128xf32>
    tpu.vector_store %arg5[%c0_9, %c0_10], %18 {strides = array<i32>} : memref<2x128xf32, #tpu.memory_space<vmem>>, vector<2x128xf32>,
    %20 = vector.extract_strided_slice %6 {offsets = [2, 0], sizes = [1, 128], strides = [1, 1]} : vector<4x128xf32> to vector<1x128xf32>
    %21 = vector.broadcast %20 : vector<1x128xf32> to vector<2x128xf32>
    %22 = arith.mulf %18, %21 : vector<2x128xf32>
    %23 = vector.extract_strided_slice %6 {offsets = [3, 0], sizes = [1, 128], strides = [1, 1]} : vector<4x128xf32> to vector<1x128xf32>
    %24 = vector.broadcast %23 : vector<1x128xf32> to vector<2x128xf32>
    %25 = arith.addf %22, %24 : vector<2x128xf32>
    %c0_11 = arith.constant 0 : index
    %c0_12 = arith.constant 0 : index
    %26 = vector.load %arg6[%c0_11, %c0_12] : memref<2x128xf32, #tpu.memory_space<vmem>>, vector<2x128xf32>
    tpu.vector_store %arg6[%c0_11, %c0_12], %25 {strides = array<i32>} : memref<2x128xf32, #tpu.memory_space<vmem>>, vector<2x128xf32>,
    return
  }
  func.func @transform_0(%arg0: i32, %arg1: i32) -> (i32, i32, i32, i32) {
    %c0_i32 = arith.constant 0 : i32
    %c0_i32_0 = arith.constant 0 : i32
    %c0_i32_1 = arith.constant 0 : i32
    %c0_i32_2 = arith.constant 0 : i32
    return %arg0, %c0_i32, %c0_i32_0, %c0_i32_1 : i32, i32, i32, i32
  }
  func.func @transform_1(%arg0: i32, %arg1: i32) -> (i32, i32) {
    %c0_i32 = arith.constant 0 : i32
    %c0_i32_0 = arith.constant 0 : i32
    return %c0_i32, %arg1 : i32, i32
  }
  func.func @transform_2(%arg0: i32, %arg1: i32) -> (i32, i32) {
    %c0_i32 = arith.constant 0 : i32
    %c0_i32_0 = arith.constant 0 : i32
    return %c0_i32, %arg1 : i32, i32
  }
  func.func @transform_3(%arg0: i32, %arg1: i32) -> (i32, i32) {
    %c0_i32 = arith.constant 0 : i32
    return %arg0, %arg1 : i32, i32
  }
  func.func @transform_4(%arg0: i32, %arg1: i32) -> (i32, i32) {
    %c0_i32 = arith.constant 0 : i32
    return %arg0, %arg1 : i32, i32
  }
}

</mosaic_0001>

<bundles_post_ra>
// kernel: tpu_custom_call.1
= control target key start
LH: loop header
LB: loop body
LE: loop exit
PB: predicated region body
PF: predicated region fallthrough
CT: control target
= control target key end

     0   :  { %10 = vsyncpa [#allocation4], 0  ;;  %vm131_vm0 = vsmask.f32 3328  ;;  %vm132_vm1 = vsmask.f32 7440  ;;  %s6684_s0 = inlined_call_operand.vmem [shape: bf16[2,18,18,4], index: 0, kind: input, shape index: {}]   ;;  %s6685_s1 = inlined_call_operand.vmem [shape: bf16[128,128], index: 1, kind: input, shape index: {}]   ;;  %s6686_s2 = inlined_call_operand.vmem [shape: f32[4,128], index: 2, kind: input, shape index: {}]   ;;  %s6687_s3 = inlined_call_operand.hbm [shape: f32[2,128], index: 3, kind: output, shape index: {0}]   ;;  %s6688_s4 = inlined_call_operand.hbm [shape: f32[2,128], index: 4, kind: output, shape index: {1}]  }
   0x1   :  { %v4027_v0 = vld [vmem:[%s6684_s0 + $0x18] sm:$0xf]  ;;  %v4032_v1 = vld [vmem:[%s6684_s0 + $0x1c] sm:$0xf]  ;;  %v4037_v2 = vld [vmem:[%s6684_s0 + $0x20] sm:$0x1] }
   0x2   :  { %v183_v3 = vshrl.u32 %v4027_v0, 16  ;;  %v186_v4 = vshll.u32 %v4027_v0, 16  ;;  %v192_v5 = vshll.u32 %v4032_v1, 16  ;;  %v196_v6 = vshrl.u32 %v4032_v1, 16  ;;  %v4047_v8 = vld [vmem:[%s6684_s0] sm:$0xf]  ;;  %vm4070_vm2 = vmor %vm131_vm0, %vm132_vm1 }
   0x3   :  { %v202_v7 = vshll.u32 %v4037_v2, 16  ;;  %v4052_v11 = vld [vmem:[%s6684_s0 + $0x4] sm:$0xf]  ;;  %v4057_v12 = vld [vmem:[%s6684_s0 + $0x8] sm:$0x1]  ;;  %v135_v16 = vshrl.u32 %v4047_v8, 16 }
   0x4   :  { %v185_v9 = vrot.slane %v183_v3, 4  ;;  %v188_v10 = vrot.slane %v186_v4, 5  ;;  %v194_v13 = vrot.slane %v192_v5, 5  ;;  %v198_v14 = vrot.slane %v196_v6, 4  ;;  %v4063_v17 = vld [vmem:[%s6684_s0 + $0x24] sm:$0xf] }
   0x5   :  { %v204_v15 = vrot.slane %v202_v7, 5  ;;  %v138_v19 = vshll.u32 %v4047_v8, 16  ;;  %v144_v20 = vshll.u32 %v4052_v11, 16  ;;  %v148_v21 = vshrl.u32 %v4052_v11, 16  ;;  %v4078_v26 = vld [vmem:[%s6684_s0 + $0x28] sm:$0xf] }
   0x6   :  { %v189_v18 = vor.u32 %v188_v10, %v185_v9  ;;  %v199_v23 = vor.u32 %v198_v14, %v194_v13  ;;  %v137_v24 = vrot.slane %v135_v16, 4  ;;  %v154_v25 = vshll.u32 %v4057_v12, 16  ;;  %v4084_v32 = vld [vmem:[%s6684_s0 + $0x2c] sm:$0x1]  ;;  %v4102_v46 = vld [vmem:[%s6684_s0 + $0x10] sm:$0xf] }
   0x7   :  { %v207_v27 = vshrl.u32 %v4063_v17, 16  ;;  %v140_v29 = vrot.slane %v138_v19, 5  ;;  %v146_v30 = vrot.slane %v144_v20, 5  ;;  %v150_v31 = vrot.slane %v148_v21, 4  ;;  %v4093_v41 = vld [vmem:[%s6684_s0 + $0xc] sm:$0xf] }
   0x8   :  { %v190_v28 = vrot.slane %v189_v18, 4  ;;  %v200_v33 = vrot.slane %v199_v23, 4  ;;  %v156_v34 = vrot.slane %v154_v25, 5  ;;  %v210_v36 = vshll.u32 %v4063_v17, 16  ;;  %v4109_v54 = vld [vmem:[%s6684_s0 + $0x14] sm:$0x1] }
   0x9   :  { %v209_v35 = vrot.slane %v207_v27, 4  ;;  %v141_v38 = vor.u32 %v140_v29, %v137_v24  ;;  %v151_v39 = vor.u32 %v150_v31, %v146_v30  ;;  %v216_v40 = vshll.u32 %v4078_v26, 16  ;;  %s3989_s13 = smov 4   ;;  %v4123_v60 = vld [vmem:[%s6684_s0 + $0x3c] sm:$0xf] }
   0xa   :  { %v195_v37 = vsel %vm4070_vm2, %v190_v28, %v194_v13  ;;  %v205_v42 = vsel %vm4070_vm2, %v200_v33, %v204_v15  ;;  %v212_v43 = vrot.slane %v210_v36, 5  ;;  %v220_v44 = vshrl.u32 %v4078_v26, 16  ;;  %v4128_v4 = vld [vmem:[%s6684_s0 + $0x40] sm:$0xf]  ;;  %v4138_v14 = vld [vmem:[%s6684_s0 + $0x44] sm:$0x1] }
   0xb   :  { %v226_v45 = vshll.u32 %v4084_v32, 16  ;;  %v4104_v47 = vcombine.low %v195_v37, %v205_v42  ;;  %v142_v48 = vrot.slane %v141_v38, 4  ;;  %v152_v49 = vrot.slane %v151_v39, 4  ;;  %v4146_v23 = vld [vmem:[%s6684_s0 + $0x30] sm:$0xf] }
   0xc   :  { %v218_v50 = vrot.slane %v216_v40, 5  ;;  %v213_v51 = vor.u32 %v212_v43, %v209_v35  ;;  %v222_v52 = vrot.slane %v220_v44, 4  ;;  %v159_v55 = vshrl.u32 %v4093_v41, 16  ;;  %v4154_v29 = vld [vmem:[%s6684_s0 + $0x34] sm:$0xf] }
   0xd   :  { %6764 = vst [vmem:[#allocation9_spill] sm:$0xff] %v4104_v47  ;;  %v228_v53 = vrot.slane %v226_v45, 5  ;;  %849 = vrot.lane.b32.xlu1 %v4104_v47, %s3989_s13  ;;  %v147_v56 = vsel %vm4070_vm2, %v142_v48, %v146_v30  ;;  %v157_v57 = vsel %vm4070_vm2, %v152_v49, %v156_v34  ;;  %v162_v58 = vshll.u32 %v4093_v41, 16  ;;  %v4167_v42 = vld [vmem:[%s6684_s0 + $0x38] sm:$0x1] }
   0xe   :  { %v168_v59 = vshll.u32 %v4102_v46, 16  ;;  %v3595_v61 = vcombine.low %v147_v56, %v157_v57  ;;  %v214_v62 = vrot.slane %v213_v51, 4  ;;  %v223_v63 = vor.u32 %v222_v52, %v218_v50  ;;  %v4174_v51 = vld [vmem:[%s6684_s0 + $0x54] sm:$0xf]  ;;  %v4182_v57 = vld [vmem:[%s6684_s0 + $0x58] sm:$0xf] }
   0xf   :  { %v161_v3 = vrot.slane %v159_v55, 4  ;;  %v164_v5 = vrot.slane %v162_v58, 5  ;;  %v172_v7 = vshrl.u32 %v4102_v46, 16  ;;  %v178_v9 = vshll.u32 %v4109_v54, 16 }
  0x10   :  { %v170_v6 = vrot.slane %v168_v59, 5  ;;  %845 = vrot.lane.b32.xlu0 %v3595_v61, %s3989_s13  ;;  %v219_v10 = vsel %vm4070_vm2, %v214_v62, %v218_v50  ;;  %v224_v13 = vrot.slane %v223_v63, 4  ;;  %v255_v15 = vshrl.u32 %v4123_v60, 16 }
  0x11   :  { %v258_v16 = vshll.u32 %v4123_v60, 16  ;;  %v165_v18 = vor.u32 %v164_v5, %v161_v3  ;;  %v174_v19 = vrot.slane %v172_v7, 4  ;;  %v180_v20 = vrot.slane %v178_v9, 5  ;;  %v4192_v5 = vld [vmem:[%s6684_s0 + $0x5c] sm:$0x1] }
  0x12   :  { %v264_v21 = vshll.u32 %v4128_v4, 16  ;;  %v229_v24 = vsel %vm4070_vm2, %v224_v13, %v228_v53  ;;  %v257_v25 = vrot.slane %v255_v15, 4  ;;  %v268_v28 = vshrl.u32 %v4128_v4, 16 }
  0x13   :  { %v260_v27 = vrot.slane %v258_v16, 5  ;;  %v4156_v30 = vcombine.low %v219_v10, %v229_v24  ;;  %v166_v31 = vrot.slane %v165_v18, 4  ;;  %v175_v33 = vor.u32 %v174_v19, %v170_v6  ;;  %v4205_v16 = vld [vmem:[%s6684_s0 + $0x48] sm:$0xf]  ;;  %v4212_v24 = vld [vmem:[%s6684_s0 + $0x4c] sm:$0xf] }
  0x14   :  { %v266_v34 = vrot.slane %v264_v21, 5  ;;  %v270_v36 = vrot.slane %v268_v28, 4  ;;  %v274_v37 = vshll.u32 %v4138_v14, 16  ;;  %v231_v38 = vshrl.u32 %v4146_v23, 16 }
  0x15   :  { %6765 = vst [vmem:[#allocation10_spill] sm:$0xff] %v4156_v30  ;;  %v261_v35 = vor.u32 %v260_v27, %v257_v25  ;;  %851 = vrot.lane.b32.xlu1 %v4156_v30, %s3989_s13  ;;  %v171_v39 = vsel %vm4070_vm2, %v166_v31, %v170_v6  ;;  %v176_v40 = vrot.slane %v175_v33, 4  ;;  %v234_v43 = vshll.u32 %v4146_v23, 16 }
  0x16   :  { %v240_v44 = vshll.u32 %v4154_v29, 16  ;;  %v271_v48 = vor.u32 %v270_v36, %v266_v34  ;;  %v276_v49 = vrot.slane %v274_v37, 5  ;;  %v233_v50 = vrot.slane %v231_v38, 4 }
  0x17   :  { %v262_v45 = vrot.slane %v261_v35, 4  ;;  %v181_v52 = vsel %vm4070_vm2, %v176_v40, %v180_v20  ;;  %v236_v53 = vrot.slane %v234_v43, 5  ;;  %v244_v56 = vshrl.u32 %v4154_v29, 16  ;;  %v4224_v40 = vld [vmem:[%s6684_s0 + $0x50] sm:$0x1] }
  0x18   :  { %v242_v55 = vrot.slane %v240_v44, 5  ;;  %v4184_v58 = vcombine.low %v171_v39, %v181_v52  ;;  %v272_v61 = vrot.slane %v271_v48, 4  ;;  %v250_v62 = vshll.u32 %v4167_v42, 16  ;;  %v4230_v44 = vld [vmem:[%s6684_s0 + $0x6c] sm:$0xf] }
  0x19   :  { %v267_v59 = vsel %vm4070_vm2, %v262_v45, %v266_v34  ;;  %v237_v63 = vor.u32 %v236_v53, %v233_v50  ;;  %v246_v3 = vrot.slane %v244_v56, 4  ;;  %v303_v6 = vshrl.u32 %v4174_v51, 16  ;;  %v4238_v52 = vld [vmem:[%s6684_s0 + $0x70] sm:$0xf] }
  0x1a   :  { %6766 = vst [vmem:[#allocation11_spill] sm:$0xff] %v4184_v58  ;;  %v306_v7 = vshll.u32 %v4174_v51, 16  ;;  %847 = vrot.lane.b32.xlu0 %v4184_v58, %s3989_s13  ;;  %v277_v9 = vsel %vm4070_vm2, %v272_v61, %v276_v49  ;;  %v252_v10 = vrot.slane %v250_v62, 5  ;;  %v312_v13 = vshll.u32 %v4182_v57, 16 }
  0x1b   :  { %v316_v15 = vshrl.u32 %v4182_v57, 16  ;;  %v4207_v18 = vcombine.low %v267_v59, %v277_v9  ;;  %v238_v19 = vrot.slane %v237_v63, 4  ;;  %v247_v20 = vor.u32 %v246_v3, %v242_v55  ;;  %v4253_v9 = vld [vmem:[%s6684_s0 + $0x74] sm:$0x1] }
  0x1c   :  { %v305_v21 = vrot.slane %v303_v6, 4  ;;  %v308_v25 = vrot.slane %v306_v7, 5  ;;  %v314_v27 = vrot.slane %v312_v13, 5  ;;  %v322_v31 = vshll.u32 %v4192_v5, 16 }
  0x1d   :  { %6767 = vst [vmem:[#allocation12_spill] sm:$0xff] %v4207_v18  ;;  %v318_v28 = vrot.slane %v316_v15, 4  ;;  %855 = vrot.lane.b32.xlu1 %v4207_v18, %s3989_s13  ;;  %v243_v33 = vsel %vm4070_vm2, %v238_v19, %v242_v55  ;;  %v248_v34 = vrot.slane %v247_v20, 4  ;;  %v279_v35 = vshrl.u32 %v4205_v16, 16  ;;  %v4260_v15 = vld [vmem:[%s6684_s0 + $0x60] sm:$0xf] }
  0x1e   :  { %v282_v36 = vshll.u32 %v4205_v16, 16  ;;  %v309_v37 = vor.u32 %v308_v25, %v305_v21  ;;  %v324_v39 = vrot.slane %v322_v31, 5  ;;  %v288_v43 = vshll.u32 %v4212_v24, 16 }
  0x1f   :  { %v319_v38 = vor.u32 %v318_v28, %v314_v27  ;;  %v253_v45 = vsel %vm4070_vm2, %v248_v34, %v252_v10  ;;  %v281_v48 = vrot.slane %v279_v35, 4  ;;  %v292_v50 = vshrl.u32 %v4212_v24, 16 }
  0x20   :  { %v284_v49 = vrot.slane %v282_v36, 5  ;;  %v4240_v53 = vcombine.low %v243_v33, %v253_v45  ;;  %v310_v55 = vrot.slane %v309_v37, 4  ;;  %v290_v59 = vrot.slane %v288_v43, 5 }
  0x21   :  { %v320_v56 = vrot.slane %v319_v38, 4  ;;  %v294_v62 = vrot.slane %v292_v50, 4  ;;  %v298_v63 = vshll.u32 %v4224_v40, 16  ;;  %v351_v3 = vshrl.u32 %v4230_v44, 16  ;;  %v4278_v38 = vld [vmem:[%s6684_s0 + $0x68] sm:$0x1] }
  0x22   :  { %6768 = vst [vmem:[#allocation13_spill] sm:$0xff] %v4240_v53  ;;  %v285_v61 = vor.u32 %v284_v49, %v281_v48  ;;  %853 = vrot.lane.b32.xlu0 %v4240_v53, %s3989_s13  ;;  %v315_v6 = vsel %vm4070_vm2, %v310_v55, %v314_v27  ;;  %v354_v10 = vshll.u32 %v4230_v44, 16  ;;  %v360_v13 = vshll.u32 %v4238_v52, 16  ;;  %v4267_v27 = vld [vmem:[%s6684_s0 + $0x64] sm:$0xf] }
  0x23   :  { %v325_v7 = vsel %vm4070_vm2, %v320_v56, %v324_v39  ;;  %v295_v21 = vor.u32 %v294_v62, %v290_v59  ;;  %v300_v25 = vrot.slane %v298_v63, 5  ;;  %v353_v28 = vrot.slane %v351_v3, 4  ;;  %v4286_v50 = vld [vmem:[%s6684_s0 + $0x84] sm:$0xf]  ;;  %v4294_v62 = vld [vmem:[%s6684_s0 + $0x88] sm:$0xf] }
  0x24   :  { %v4262_v19 = vcombine.low %v315_v6, %v325_v7  ;;  %v286_v20 = vrot.slane %v285_v61, 4  ;;  %v356_v31 = vrot.slane %v354_v10, 5  ;;  %v362_v33 = vrot.slane %v360_v13, 5  ;;  %v4301_v10 = vld [vmem:[%s6684_s0 + $0x8c] sm:$0x1] }
  0x25   :  { %v364_v34 = vshrl.u32 %v4238_v52, 16  ;;  %v296_v36 = vrot.slane %v295_v21, 4  ;;  %v370_v37 = vshll.u32 %v4253_v9, 16  ;;  %v327_v39 = vshrl.u32 %v4260_v15, 16 }
  0x26   :  { %6769 = vst [vmem:[#allocation14_spill] sm:$0xff] %v4262_v19  ;;  %859 = vrot.lane.b32.xlu1 %v4262_v19, %s3989_s13  ;;  %v291_v35 = vsel %vm4070_vm2, %v286_v20, %v290_v59  ;;  %v357_v43 = vor.u32 %v356_v31, %v353_v28  ;;  %v330_v48 = vshll.u32 %v4260_v15, 16  ;;  %v336_v49 = vshll.u32 %v4267_v27, 16  ;;  %v4308_v28 = vld [vmem:[%s6684_s0 + $0x78] sm:$0xf] }
  0x27   :  { %v366_v45 = vrot.slane %v364_v34, 4  ;;  %v301_v55 = vsel %vm4070_vm2, %v296_v36, %v300_v25  ;;  %v372_v56 = vrot.slane %v370_v37, 5  ;;  %v329_v59 = vrot.slane %v327_v39, 4  ;;  %v4318_v37 = vld [vmem:[%s6684_s0 + $0x7c] sm:$0xf] }
  0x28   :  { %v340_v61 = vshrl.u32 %v4267_v27, 16  ;;  %v4296_v63 = vcombine.low %v291_v35, %v301_v55  ;;  %v358_v3 = vrot.slane %v357_v43, 4  ;;  %v332_v7 = vrot.slane %v330_v48, 5 }
  0x29   :  { %v367_v6 = vor.u32 %v366_v45, %v362_v33  ;;  %v338_v13 = vrot.slane %v336_v49, 5  ;;  %v346_v21 = vshll.u32 %v4278_v38, 16  ;;  %v399_v25 = vshrl.u32 %v4286_v50, 16 }
  0x2a   :  { %6770 = vst [vmem:[#allocation15_spill] sm:$0xff] %v4296_v63  ;;  %v342_v20 = vrot.slane %v340_v61, 4  ;;  %857 = vrot.lane.b32.xlu0 %v4296_v63, %s3989_s13  ;;  %v363_v31 = vsel %vm4070_vm2, %v358_v3, %v362_v33  ;;  %v333_v35 = vor.u32 %v332_v7, %v329_v59  ;;  %v402_v36 = vshll.u32 %v4286_v50, 16  ;;  %v4327_v59 = vld [vmem:[%s6684_s0 + $0x80] sm:$0x1] }
  0x2b   :  { %v368_v34 = vrot.slane %v367_v6, 4  ;;  %v348_v43 = vrot.slane %v346_v21, 5  ;;  %v401_v45 = vrot.slane %v399_v25, 4  ;;  %v408_v48 = vshll.u32 %v4294_v62, 16  ;;  %v4335_v21 = vld [vmem:[%s6684_s0 + $0x9c] sm:$0xf] }
  0x2c   :  { %v343_v39 = vor.u32 %v342_v20, %v338_v13  ;;  %v334_v55 = vrot.slane %v333_v35, 4  ;;  %v404_v61 = vrot.slane %v402_v36, 5  ;;  %v412_v33 = vshrl.u32 %v4294_v62, 16 }
  0x2d   :  { %v373_v49 = vsel %vm4070_vm2, %v368_v34, %v372_v56  ;;  %v410_v7 = vrot.slane %v408_v48, 5  ;;  %v418_v20 = vshll.u32 %v4301_v10, 16  ;;  %v375_v35 = vshrl.u32 %v4308_v28, 16 }
  0x2e   :  { %v4329_v3 = vcombine.low %v363_v31, %v373_v49  ;;  %v344_v6 = vrot.slane %v343_v39, 4  ;;  %v339_v56 = vsel %vm4070_vm2, %v334_v55, %v338_v13  ;;  %v405_v25 = vor.u32 %v404_v61, %v401_v45  ;;  %v4351_v45 = vld [vmem:[%s6684_s0 + $0xa0] sm:$0xf] }
  0x2f   :  { %v414_v34 = vrot.slane %v412_v33, 4  ;;  %v420_v36 = vrot.slane %v418_v20, 5  ;;  %v378_v39 = vshll.u32 %v4308_v28, 16  ;;  %v384_v48 = vshll.u32 %v4318_v37, 16  ;;  %6773 = vst [vmem:[#allocation18_spill] sm:$0xff] %v4351_v45 }
  0x30   :  { %6771 = vst [vmem:[#allocation16_spill] sm:$0xff] %v4329_v3  ;;  %863 = vrot.lane.b32.xlu1 %v4329_v3, %s3989_s13  ;;  %v349_v31 = vsel %vm4070_vm2, %v344_v6, %v348_v43  ;;  %v406_v19 = vrot.slane %v405_v25, 4  ;;  %v377_v13 = vrot.slane %v375_v35, 4  ;;  %v388_v33 = vshrl.u32 %v4318_v37, 16  ;;  %v4358_v6 = vld [vmem:[%s6684_s0 + $0xa4] sm:$0x1] }
  0x31   :  { %v4346_v49 = vcombine.low %v339_v56, %v349_v31  ;;  %v415_v18 = vor.u32 %v414_v34, %v410_v7  ;;  %v380_v55 = vrot.slane %v378_v39, 5  ;;  %v386_v61 = vrot.slane %v384_v48, 5  ;;  %6774 = vst [vmem:[#allocation19_spill] sm:$0xff] %v4358_v6  ;;  %v4369_v35 = vld [vmem:[%s6684_s0 + $0x90] sm:$0xf] }
  0x32   :  { %v394_v43 = vshll.u32 %v4327_v59, 16  ;;  %v411_v20 = vsel %vm4070_vm2, %v406_v19, %v410_v7  ;;  %v447_v25 = vshrl.u32 %v4335_v21, 16  ;;  %v450_v34 = vshll.u32 %v4335_v21, 16  ;;  %6775 = vst [vmem:[#allocation20_spill] sm:$0xff] %v4369_v35  ;;  %v4378_v7 = vld [vmem:[%s6684_s0 + $0x94] sm:$0xf] }
  0x33   :  { %6772 = vst [vmem:[#allocation17_spill] sm:$0xff] %v4346_v49  ;;  %861 = vrot.lane.b32.xlu0 %v4346_v49, %s3989_s13  ;;  %v416_v56 = vrot.slane %v415_v18, 4  ;;  %v381_v31 = vor.u32 %v380_v55, %v377_v13  ;;  %v390_v39 = vrot.slane %v388_v33, 4  ;;  %v456_v3 = vshll.u32 %v4351_v45, 16  ;;  %v4385_v33 = vld [vmem:[%s6684_s0 + $0x98] sm:$0x1] }
  0x34   :  { %v396_v48 = vrot.slane %v394_v43, 5  ;;  %v449_v63 = vrot.slane %v447_v25, 4  ;;  %v452_v19 = vrot.slane %v450_v34, 5  ;;  %v460_v18 = vshrl.u32 %v4351_v45, 16  ;;  %v4392_v34 = vld [vmem:[%s6684_s0 + $0xb4] sm:$0xf] }
  0x35   :  { %v421_v49 = vsel %vm4070_vm2, %v416_v56, %v420_v36  ;;  %v382_v53 = vrot.slane %v381_v31, 4  ;;  %v391_v13 = vor.u32 %v390_v39, %v386_v61  ;;  %v458_v55 = vrot.slane %v456_v3, 5  ;;  %v4403_v31 = vld [vmem:[%s6684_s0 + $0xb8] sm:$0xf] }
  0x36   :  { %v4380_v30 = vcombine.low %v411_v20, %v421_v49  ;;  %v453_v36 = vor.u32 %v452_v19, %v449_v63  ;;  %v462_v43 = vrot.slane %v460_v18, 4  ;;  %v466_v56 = vshll.u32 %v4358_v6, 16  ;;  %6777 = vst [vmem:[#allocation22_spill] sm:$0xff] %v4403_v31 }
  0x37   :  { %v423_v25 = vshrl.u32 %v4369_v35, 16  ;;  %v387_v3 = vsel %vm4070_vm2, %v382_v53, %v386_v61  ;;  %v392_v49 = vrot.slane %v391_v13, 4  ;;  %v426_v20 = vshll.u32 %v4369_v35, 16 }
  0x38   :  { %6776 = vst [vmem:[#allocation21_spill] sm:$0xff] %v4380_v30  ;;  %867 = vrot.lane.b32.xlu1 %v4380_v30, %s3989_s13  ;;  %v432_v63 = vshll.u32 %v4378_v7, 16  ;;  %v454_v39 = vrot.slane %v453_v36, 4  ;;  %v463_v19 = vor.u32 %v462_v43, %v458_v55  ;;  %v468_v18 = vrot.slane %v466_v56, 5 }
  0x39   :  { %v425_v58 = vrot.slane %v423_v25, 4  ;;  %v397_v30 = vsel %vm4070_vm2, %v392_v49, %v396_v48  ;;  %v428_v47 = vrot.slane %v426_v20, 5  ;;  %v436_v53 = vshrl.u32 %v4378_v7, 16 }
  0x3a   :  { %v434_v6 = vrot.slane %v432_v63, 5 }
  0x3b   :  { %11 = vsyncpa [#allocation6], 0  ;;  %v4408_v61 = vcombine.low %v387_v3, %v397_v30  ;;  %v459_v13 = vsel %vm4070_vm2, %v454_v39, %v458_v55  ;;  %v464_v35 = vrot.slane %v463_v19, 4  ;;  %v442_v45 = vshll.u32 %v4385_v33, 16  ;;  %v4416_v56 = vld [vmem:[%s6684_s0 + $0xbc] sm:$0x1] }
  0x3c   :  { %v429_v36 = vor.u32 %v428_v47, %v425_v58  ;;  %v438_v43 = vrot.slane %v436_v53, 4  ;;  %6779 = vst [vmem:[#allocation24_spill] sm:$0xff] %v4416_v56  ;;  %v495_v48 = vshrl.u32 %v4392_v34, 16  ;;  %v498_v25 = vshll.u32 %v4392_v34, 16  ;;  %v4429_v58 = vld [vmem:[%s6684_s0 + $0xa8] sm:$0xf] }
  0x3d   :  { %6778 = vst [vmem:[#allocation23_spill] sm:$0xff] %v4408_v61  ;;  %865 = vrot.lane.b32.xlu0 %v4408_v61, %s3989_s13  ;;  %v469_v30 = vsel %vm4070_vm2, %v464_v35, %v468_v18  ;;  %v444_v55 = vrot.slane %v442_v45, 5  ;;  %v504_v3 = vshll.u32 %v4403_v31, 16  ;;  %v508_v47 = vshrl.u32 %v4403_v31, 16  ;;  %6780 = vst [vmem:[#allocation25_spill] sm:$0xff] %v4429_v58  ;;  %s3990_s10 = smov 8  }
  0x3e   :  { %v4431_v49 = vcombine.low %v459_v13, %v469_v30  ;;  %v430_v20 = vrot.slane %v429_v36, 4  ;;  %v439_v63 = vor.u32 %v438_v43, %v434_v6  ;;  %v497_v39 = vrot.slane %v495_v48, 4  ;;  %v4436_v19 = vld [vmem:[%s6684_s0 + $0xac] sm:$0xf]  ;;  %s3991_s11 = smov 12   ;;  %s3992_s17 = smov 16  }
  0x3f   :  { %v500_v45 = vrot.slane %v498_v25, 5  ;;  %v506_v35 = vrot.slane %v504_v3, 5  ;;  %v510_v18 = vrot.slane %v508_v47, 4  ;;  %v514_v53 = vshll.u32 %v4416_v56, 16  ;;  %v4448_v25 = vld [vmem:[%s6684_s0 + $0xb0] sm:$0x1] }
  0x40   :  { %6781 = vst [vmem:[#allocation26_spill] sm:$0xff] %v4431_v49  ;;  %871 = vrot.lane.b32.xlu1 %v4431_v49, %s3989_s13  ;;  %v435_v13 = vsel %vm4070_vm2, %v430_v20, %v434_v6  ;;  %v440_v30 = vrot.slane %v439_v63, 4  ;;  %v471_v36 = vshrl.u32 %v4429_v58, 16  ;;  %v474_v43 = vshll.u32 %v4429_v58, 16  ;;  %s3993_s12 = smov 20   ;;  %s3994_s15 = smov 24  }
  0x41   :  { %v501_v48 = vor.u32 %v500_v45, %v497_v39  ;;  %v511_v61 = vor.u32 %v510_v18, %v506_v35  ;;  %v516_v31 = vrot.slane %v514_v53, 5  ;;  %v480_v3 = vshll.u32 %v4436_v19, 16  ;;  %s3996_s19 = smov 32   ;;  %s3998_s22 = smov [#allocation5]  }
  0x42   :  { %v445_v47 = vsel %vm4070_vm2, %v440_v30, %v444_v55  ;;  %v473_v49 = vrot.slane %v471_v36, 4  ;;  %v476_v6 = vrot.slane %v474_v43, 5  ;;  %v484_v20 = vshrl.u32 %v4436_v19, 16  ;;  %s3549_s23 = sshll.u32 %s3998_s22, 4  ;;  %s3550_s23 = int_to_ptr.vmem [resolvable:$true] %s3549_s23 }
  0x43   :  { %v4454_v63 = vcombine.low %v435_v13, %v445_v47  ;;  %v502_v58 = vrot.slane %v501_v48, 4  ;;  %v512_v39 = vrot.slane %v511_v61, 4  ;;  %v482_v45 = vrot.slane %v480_v3, 5 }
  0x44   :  { %v477_v18 = vor.u32 %v476_v6, %v473_v49  ;;  %v486_v53 = vrot.slane %v484_v20, 4  ;;  %v490_v56 = vshll.u32 %v4448_v25, 16  ;;  %vm566_vm3 = vcmask 1042432  }
  0x45   :  { %6782 = vst [vmem:[#allocation27_spill] sm:$0xff] %v4454_v63  ;;  %869 = vrot.lane.b32.xlu0 %v4454_v63, %s3989_s13  ;;  %v507_v55 = vsel %vm4070_vm2, %v502_v58, %v506_v35  ;;  %v517_v30 = vsel %vm4070_vm2, %v512_v39, %v516_v31  ;;  %vm567_vm4 = vcmask 1046532   ;;  %v3562_v13 = vrot.slane %v4093_v41, 9 }
  0x46   :  { %v4464_v36 = vcombine.low %v507_v55, %v517_v30  ;;  %v478_v61 = vrot.slane %v477_v18, 4  ;;  %v487_v49 = vor.u32 %v486_v53, %v482_v45  ;;  %v492_v43 = vrot.slane %v490_v56, 5  ;;  %vm4466_vm5 = vmor %vm566_vm3, %vm567_vm4 }
  0x47   :  { %v578_v3 = vrot.slane %v4102_v46, 5  ;;  %v581_v47 = vrot.slane %v4109_v54, 5  ;;  %v3561_v58 = vrot.slane %v4047_v8, 9  ;;  %v571_v31 = vrot.slane %v4052_v11, 5 }
  0x48   :  { %6783 = vst [vmem:[#allocation28_spill] sm:$0xff] %v4464_v36  ;;  %875 = vrot.lane.b32.xlu1 %v4464_v36, %s3989_s13  ;;  %v483_v35 = vsel %vm4070_vm2, %v478_v61, %v482_v45  ;;  %v488_v6 = vrot.slane %v487_v49, 4  ;;  %v574_v56 = vrot.slane %v4057_v12, 5  ;;  %v3564_v20 = vrot.slane %v4063_v17, 9 }
  0x49   :  { %v579_v39 = vsel %vm4466_vm5, %v3562_v13, %v578_v3  ;;  %v580_v18 = vrot.slane %v578_v3, 4  ;;  %v572_v8 = vsel %vm4466_vm5, %v3561_v58, %v571_v31  ;;  %v573_v54 = vrot.slane %v571_v31, 4 }
  0x4a   :  { %v493_v11 = vsel %vm4070_vm2, %v488_v6, %v492_v43  ;;  %v592_v53 = vrot.slane %v4078_v26, 5  ;;  %v595_v45 = vrot.slane %v4084_v32, 5  ;;  %v3563_v55 = vrot.slane %v4027_v0, 9 }
  0x4b   :  { %v4489_v12 = vcombine.low %v483_v35, %v493_v11  ;;  %v582_v30 = vsel %vm4466_vm5, %v580_v18, %v581_v47  ;;  %v575_v13 = vsel %vm4466_vm5, %v573_v54, %v574_v56  ;;  %v585_v61 = vrot.slane %v4032_v1, 5 }
  0x4c   :  { %v4496_v49 = vcombine.low %v579_v39, %v582_v30  ;;  %v3611_v3 = vcombine.low %v572_v8, %v575_v13  ;;  %v593_v43 = vsel %vm4466_vm5, %v3564_v20, %v592_v53  ;;  %v594_v58 = vrot.slane %v592_v53, 4 }
  0x4d   :  { %6786 = vst [vmem:[#allocation29_spill] sm:$0xff] %v4489_v12  ;;  %873 = vrot.lane.b32.xlu0 %v4489_v12, %s3989_s13  ;;  %v586_v32 = vsel %vm4466_vm5, %v3563_v55, %v585_v61  ;;  %v587_v31 = vrot.slane %v585_v61, 4  ;;  %v588_v47 = vrot.slane %v4037_v2, 5  ;;  %v3566_v35 = vrot.slane %v4123_v60, 9 }
  0x4e   :  { %927 = vrot.lane.b32.xlu1 %v4496_v49, %s3990_s10  ;;  %v596_v6 = vsel %vm4466_vm5, %v594_v58, %v595_v45  ;;  %v606_v56 = vrot.slane %v4128_v4, 5  ;;  %v609_v20 = vrot.slane %v4138_v14, 5  ;;  %v3565_v39 = vrot.slane %v4146_v23, 9 }
  0x4f   :  { %v4513_v18 = vcombine.low %v593_v43, %v596_v6  ;;  %v589_v2 = vsel %vm4466_vm5, %v587_v31, %v588_v47  ;;  %v599_v8 = vrot.slane %v4154_v29, 5  ;;  %v602_v54 = vrot.slane %v4167_v42, 5 }
  0x50   :  { %v4519_v11 = vcombine.low %v586_v32, %v589_v2  ;;  %v607_v53 = vsel %vm4466_vm5, %v3566_v35, %v606_v56  ;;  %v608_v45 = vrot.slane %v606_v56, 4  ;;  %v3568_v55 = vrot.slane %v4174_v51, 9 }
  0x51   :  { %925 = vrot.lane.b32.xlu0 %v3611_v3, %s3990_s10  ;;  %v600_v14 = vsel %vm4466_vm5, %v3565_v39, %v599_v8  ;;  %v601_v30 = vrot.slane %v599_v8, 4  ;;  %v620_v13 = vrot.slane %v4182_v57, 5  ;;  %v623_v61 = vrot.slane %v4192_v5, 5 }
  0x52   :  { %931 = vrot.lane.b32.xlu1 %v4513_v18, %s3990_s10  ;;  %v610_v42 = vsel %vm4466_vm5, %v608_v45, %v609_v20  ;;  %v3567_v43 = vrot.slane %v4205_v16, 9  ;;  %v613_v58 = vrot.slane %v4212_v24, 5  ;;  %v616_v3 = vrot.slane %v4224_v40, 5 }
  0x53   :  { %v4536_v32 = vcombine.low %v607_v53, %v610_v42  ;;  %v603_v31 = vsel %vm4466_vm5, %v601_v30, %v602_v54  ;;  %v621_v5 = vsel %vm4466_vm5, %v3568_v55, %v620_v13  ;;  %v622_v47 = vrot.slane %v620_v13, 4 }
  0x54   :  { %v4542_v35 = vcombine.low %v600_v14, %v603_v31  ;;  %v614_v6 = vsel %vm4466_vm5, %v3567_v43, %v613_v58  ;;  %v615_v56 = vrot.slane %v613_v58, 4  ;;  %v3570_v20 = vrot.slane %v4230_v44, 9 }
  0x55   :  { %929 = vrot.lane.b32.xlu0 %v4519_v11, %s3990_s10  ;;  %v624_v40 = vsel %vm4466_vm5, %v622_v47, %v623_v61  ;;  %v634_v39 = vrot.slane %v4238_v52, 5  ;;  %v637_v2 = vrot.slane %v4253_v9, 5  ;;  %v3569_v8 = vrot.slane %v4260_v15, 9 }
  0x56   :  { %935 = vrot.lane.b32.xlu1 %v4536_v32, %s3990_s10  ;;  %v4556_v54 = vcombine.low %v621_v5, %v624_v40  ;;  %v617_v53 = vsel %vm4466_vm5, %v615_v56, %v616_v3  ;;  %v627_v45 = vrot.slane %v4267_v27, 5  ;;  %v630_v55 = vrot.slane %v4278_v38, 5 }
  0x57   :  { %v4562_v14 = vcombine.low %v614_v6, %v617_v53  ;;  %v635_v30 = vsel %vm4466_vm5, %v3570_v20, %v634_v39  ;;  %v636_v9 = vrot.slane %v634_v39, 4  ;;  %v3572_v13 = vrot.slane %v4286_v50, 9  ;;  %v6790_v53 = vld [vmem:[#allocation19_spill] sm:$0xff] }
  0x58   :  { %6787 = vst [vmem:[#allocation30_spill] sm:$0xff] %v4556_v54  ;;  %v628_v61 = vsel %vm4466_vm5, %v3569_v8, %v627_v45  ;;  %v629_v42 = vrot.slane %v627_v45, 4  ;;  %v648_v43 = vrot.slane %v4294_v62, 5  ;;  %v651_v58 = vrot.slane %v4301_v10, 5 }
  0x59   :  { %933 = vrot.lane.b32.xlu0 %v4542_v35, %s3990_s10  ;;  %v638_v38 = vsel %vm4466_vm5, %v636_v9, %v637_v2  ;;  %v3571_v3 = vrot.slane %v4308_v28, 9  ;;  %v641_v31 = vrot.slane %v4318_v37, 5  ;;  %v644_v5 = vrot.slane %v4327_v59, 5  ;;  %v6789_v2 = vld [vmem:[#allocation18_spill] sm:$0xff] }
  0x5a   :  { %939 = vrot.lane.b32.xlu1 %v4556_v54, %s3990_s10  ;;  %v4580_v47 = vcombine.low %v635_v30, %v638_v38  ;;  %v631_v10 = vsel %vm4466_vm5, %v629_v42, %v630_v55  ;;  %v650_v6 = vrot.slane %v648_v43, 4  ;;  %v649_v20 = vsel %vm4466_vm5, %v3572_v13, %v648_v43  ;;  %v6791_v30 = vld [vmem:[#allocation20_spill] sm:$0xff] }
  0x5b   :  { %v4584_v56 = vcombine.low %v628_v61, %v631_v10  ;;  %v643_v40 = vrot.slane %v641_v31, 4  ;;  %v3574_v39 = vrot.slane %v4335_v21, 9  ;;  %v662_v8 = vrot.slane %v6789_v2, 5 }
  0x5c   :  { %6788 = vst [vmem:[#allocation31_spill] sm:$0xff] %v4580_v47  ;;  %v652_v59 = vsel %vm4466_vm5, %v650_v6, %v651_v58  ;;  %v665_v45 = vrot.slane %v6790_v53, 5  ;;  %v3573_v9 = vrot.slane %v6791_v30, 9  ;;  %v642_v55 = vsel %vm4466_vm5, %v3571_v3, %v641_v31  ;;  %v6793_v3 = vld [vmem:[#allocation22_spill] sm:$0xff]  ;;  %v6794_v53 = vld [vmem:[#allocation24_spill] sm:$0xff] }
  0x5d   :  { %937 = vrot.lane.b32.xlu0 %v4562_v14, %s3990_s10  ;;  %v645_v13 = vsel %vm4466_vm5, %v643_v40, %v644_v5  ;;  %v655_v61 = vrot.slane %v4378_v7, 5  ;;  %v658_v42 = vrot.slane %v4385_v33, 5  ;;  %v4604_v43 = vcombine.low %v649_v20, %v652_v59 }
  0x5e   :  { %943 = vrot.lane.b32.xlu1 %v4580_v47, %s3990_s10  ;;  %v664_v58 = vrot.slane %v662_v8, 4  ;;  %v3576_v38 = vrot.slane %v4392_v34, 9  ;;  %v663_v10 = vsel %vm4466_vm5, %v3574_v39, %v662_v8  ;;  %v676_v31 = vrot.slane %v6793_v3, 5  ;;  %v6796_v47 = vld [vmem:[#allocation25_spill] sm:$0xff] }
  0x5f   :  { %6792 = vst [vmem:[#allocation18_spill] sm:$0xff] %v4604_v43  ;;  %v657_v6 = vrot.slane %v655_v61, 4  ;;  %v679_v5 = vrot.slane %v6794_v53, 5  ;;  %v4611_v40 = vcombine.low %v642_v55, %v645_v13  ;;  %v656_v20 = vsel %vm4466_vm5, %v3573_v9, %v655_v61 }
  0x60   :  { %v666_v33 = vsel %vm4466_vm5, %v664_v58, %v665_v45  ;;  %v669_v59 = vrot.slane %v4436_v19, 5  ;;  %v678_v8 = vrot.slane %v676_v31, 4  ;;  %v3575_v54 = vrot.slane %v6796_v47, 9 }
  0x61   :  { %6795 = vst [vmem:[#allocation19_spill] sm:$0xff] %v4611_v40  ;;  %941 = vrot.lane.b32.xlu0 %v4584_v56, %s3990_s10  ;;  %v659_v39 = vsel %vm4466_vm5, %v657_v6, %v658_v42  ;;  %v672_v55 = vrot.slane %v4448_v25, 5  ;;  %v4626_v45 = vcombine.low %v663_v10, %v666_v33  ;;  %v677_v9 = vsel %vm4466_vm5, %v3576_v38, %v676_v31  ;;  %v6817_v33 = vld [vmem:[#allocation12_spill] sm:$0xff] }
  0x62   :  { %947 = vrot.lane.b32.xlu1 %v4604_v43, %s3990_s10  ;;  %v671_v13 = vrot.slane %v669_v59, 4  ;;  %v680_v61 = vsel %vm4466_vm5, %v678_v8, %v679_v5  ;;  %v4632_v58 = vcombine.low %v656_v20, %v659_v39  ;;  %v4636_v42 = vcombine.low %v4260_v15, %v4267_v27  ;;  %v73_v5 = vld [vmem:[%s6684_s0 + $0xc8] sm:$0x1]  ;;  %v6818_v20 = vld [vmem:[#allocation17_spill] sm:$0xff] }
  0x63   :  { %6797 = vst [vmem:[#allocation20_spill] sm:$0xff] %v4626_v45  ;;  %v4640_v25 = vcombine.low %v677_v9, %v680_v61  ;;  %v670_v10 = vsel %vm4466_vm5, %v3575_v54, %v669_v59  ;;  %v4648_v6 = vcombine.low %v4308_v28, %v4318_v37  ;;  %v4654_v15 = vcombine.low %v6791_v30, %v4378_v7  ;;  %v6815_v7 = vld [vmem:[#allocation10_spill] sm:$0xff]  ;;  %v4784_v61 = vld [vmem:[%s6684_s0 + $0xe4] sm:$0xf] }
  0x64   :  { %6798 = vst [vmem:[#allocation22_spill] sm:$0xff] %v4632_v58  ;;  %v673_v38 = vsel %vm4466_vm5, %v671_v13, %v672_v55  ;;  %v4658_v27 = vcombine.low %v4286_v50, %v4294_v62  ;;  %v4662_v54 = vcombine.low %v6796_v47, %v4436_v19  ;;  %v4666_v31 = vcombine.low %v4335_v21, %v6789_v2  ;;  %v6816_v19 = vld [vmem:[#allocation15_spill] sm:$0xff]  ;;  %v6820_v13 = vld [vmem:[#allocation14_spill] sm:$0xff] }
  0x65   :  { %945 = vrot.lane.b32.xlu0 %v4611_v40, %s3990_s10  ;;  %6799 = vst [vmem:[#allocation24_spill] sm:$0xff] %v4640_v25  ;;  %6800 = vst [vmem:[#allocation25_spill] sm:$0xff] %v4648_v6  ;;  %v4670_v28 = vcombine.low %v4392_v34, %v6793_v3  ;;  %v4674_v37 = vcombine.low %v670_v10, %v673_v38  ;;  %v4680_v50 = vcombine.low %v4027_v0, %v4032_v1  ;;  %v6821_v10 = vld [vmem:[#allocation23_spill] sm:$0xff]  ;;  %vm1167_vm6 = vcmask 31744  }
  0x66   :  { %951 = vrot.lane.b32.xlu1 %v4626_v45, %s3990_s10  ;;  %6801 = vst [vmem:[#allocation32_spill] sm:$0xff] %v4654_v15  ;;  %6802 = vst [vmem:[#allocation33_spill] sm:$0xff] %v4658_v27  ;;  %v4686_v62 = vcombine.low %v4093_v41, %v4102_v46  ;;  %v4692_v21 = vcombine.low %v4146_v23, %v4154_v29  ;;  %v4698_v0 = vcombine.low %v4063_v17, %v4078_v26  ;;  %v71_v46 = vld [vmem:[%s6684_s0 + $0xc0] sm:$0xf]  ;;  %v6812_v23 = vld [vmem:[#allocation9_spill] sm:$0xff]  ;;  %vm1216_vm7 = vcmask 64512  }
  0x67   :  { %6803 = vst [vmem:[#allocation34_spill] sm:$0xff] %v4662_v54  ;;  %6804 = vst [vmem:[#allocation35_spill] sm:$0xff] %v4666_v31  ;;  %v4704_v1 = vcombine.low %v4205_v16, %v4212_v24  ;;  %v4710_v41 = vcombine.low %v4123_v60, %v4128_v4  ;;  %v4718_v17 = vcombine.low %v4174_v51, %v4182_v57  ;;  %v72_v60 = vld [vmem:[%s6684_s0 + $0xc4] sm:$0xf]  ;;  %v6814_v57 = vld [vmem:[#allocation13_spill] sm:$0xff]  ;;  %v682_v16 = vshrl.u32 %v71_v46, 16 }
  0x68   :  { %6805 = vst [vmem:[#allocation36_spill] sm:$0xff] %v4670_v28  ;;  %6806 = vst [vmem:[#allocation37_spill] sm:$0xff] %v4674_v37  ;;  %v4726_v26 = vcombine.low %v4230_v44, %v4238_v52  ;;  %v4744_v4 = vcombine.low %v71_v46, %v72_v60  ;;  %v6813_v51 = vld [vmem:[#allocation11_spill] sm:$0xff]  ;;  %v685_v24 = vshll.u32 %v71_v46, 16  ;;  %v695_v44 = vshrl.u32 %v72_v60, 16 }
  0x69   :  { %949 = vrot.lane.b32.xlu0 %v4632_v58, %s3990_s10  ;;  %6807 = vst [vmem:[#allocation38_spill] sm:$0xff] %v4692_v21  ;;  %6808 = vst [vmem:[#allocation39_spill] sm:$0xff] %v4704_v1  ;;  %v691_v52 = vshll.u32 %v72_v60, 16  ;;  %v684_v2 = vrot.slane %v682_v16, 4  ;;  %v701_v55 = vshll.u32 %v73_v5, 16  ;;  %v1472_v16 = vshrl.u32 %v4784_v61, 16 }
  0x6a   :  { %955 = vrot.lane.b32.xlu1 %v4640_v25, %s3990_s10  ;;  %6809 = vst [vmem:[#allocation40_spill] sm:$0xff] %v4710_v41  ;;  %6810 = vst [vmem:[#allocation41_spill] sm:$0xff] %v4718_v17  ;;  %v687_v30 = vrot.slane %v685_v24, 5  ;;  %v697_v53 = vrot.slane %v695_v44, 4  ;;  %v4791_v38 = vld [vmem:[%s6684_s0 + $0xe8] sm:$0xf] }
  0x6b   :  { %6811 = vst [vmem:[#allocation42_spill] sm:$0xff] %v4744_v4  ;;  %v693_v3 = vrot.slane %v691_v52, 5  ;;  %v1475_v24 = vshll.u32 %v4784_v61, 16  ;;  %v6822_v44 = vld [vmem:[#allocation16_spill] sm:$0xff]  ;;  %v4808_v5 = vld [vmem:[%s6684_s0 + $0xd8] sm:$0xf] }
  0x6c   :  { %v688_v39 = vor.u32 %v687_v30, %v684_v2  ;;  %v1481_v2 = vshll.u32 %v4791_v38, 16  ;;  %v1485_v30 = vshrl.u32 %v4791_v38, 16  ;;  %vm1249_vm8 = vcmask 97280  }
  0x6d   :  { %953 = vrot.lane.b32.xlu0 %v4674_v37, %s3990_s10  ;;  %v698_v8 = vor.u32 %v697_v53, %v693_v3  ;;  %v1477_v25 = vrot.slane %v1475_v24, 5  ;;  %v4824_v37 = vld [vmem:[%s6684_s0 + $0xec] sm:$0x1]  ;;  %vm1282_vm9 = vcmask 130048   ;;  %vm1348_vm10 = vcmask 195584  }
  0x6e   :  { %962 = vrot.lane.b32.xlu1 %v4680_v50, %s3991_s11  ;;  %v689_v46 = vrot.slane %v688_v39, 4  ;;  %v1891_v43 = vrot.slane %v4824_v37, 5  ;;  %vm1315_vm11 = vcmask 162816   ;;  %vm1381_vm12 = vcmask 228352  }
  0x6f   :  { %v699_v60 = vrot.slane %v698_v8, 4  ;;  %vm1414_vm13 = vcmask 261120   ;;  %vm2749_vm14 = vcmask 293888   ;;  %vm3511_vm15 = vcmask 1041409  }
  0x70   :  { %v694_v39 = vsel %vm4070_vm2, %v689_v46, %v693_v3  ;;  %v1487_v3 = vrot.slane %v1485_v30, 4  ;;  %v1448_v46 = vshrl.u32 %v4808_v5, 16  ;;  %v6829_v30 = vld [vmem:[#allocation26_spill] sm:$0xff] }
  0x71   :  { %960 = vrot.lane.b32.xlu0 %v4686_v62, %s3991_s11 }
  0x72   :  { %966 = vrot.lane.b32.xlu1 %v4692_v21, %s3991_s11  ;;  %v1450_v58 = vrot.slane %v1448_v46, 4 }
  0x75   :  { %964 = vrot.lane.b32.xlu0 %v4698_v0, %s3991_s11 }
  0x76   :  { %970 = vrot.lane.b32.xlu1 %v4704_v1, %s3991_s11 }
  0x79   :  { %968 = vrot.lane.b32.xlu0 %v4710_v41, %s3991_s11 }
  0x7a   :  { %974 = vrot.lane.b32.xlu1 %v4636_v42, %s3991_s11 }
  0x7d   :  { %972 = vrot.lane.b32.xlu0 %v4718_v17, %s3991_s11 }
  0x7e   :  { %978 = vrot.lane.b32.xlu1 %v4648_v6, %s3991_s11 }
  0x7f   :  { %v4754_v29 = vpop.permute.xlu1 %849 }
  0x81   :  { %976 = vrot.lane.b32.xlu0 %v4726_v26, %s3991_s11 }
  0x82   :  { %982 = vrot.lane.b32.xlu1 %v4654_v15, %s3991_s11  ;;  %v4762_v34 = vpop.permute.xlu0 %845 }
  0x85   :  { %980 = vrot.lane.b32.xlu0 %v4658_v27, %s3991_s11 }
  0x86   :  { %986 = vrot.lane.b32.xlu1 %v4662_v54, %s3991_s11  ;;  %v1483_v54 = vrot.slane %v1481_v2, 5  ;;  %v1491_v2 = vshll.u32 %v4824_v37, 16 }
  0x87   :  { %v4766_v47 = vpop.permute.xlu1 %851 }
  0x89   :  { %984 = vrot.lane.b32.xlu0 %v4666_v31, %s3991_s11 }
  0x8a   :  { %990 = vrot.lane.b32.xlu1 %v4744_v4, %s3991_s11  ;;  %v1474_v4 = vrot.slane %v1472_v16, 4 }
  0x8c   :  { %v4775_v59 = vpop.permute.xlu0 %847  ;;  %v1478_v31 = vor.u32 %v1477_v25, %v1474_v4  ;;  %v1493_v25 = vrot.slane %v1491_v2, 5  ;;  %v4851_v4 = vld [vmem:[%s6684_s0 + $0xf0] sm:$0xf] }
  0x8d   :  { %988 = vrot.lane.b32.xlu0 %v4670_v28, %s3991_s11  ;;  %v6825_v28 = vld [vmem:[#allocation21_spill] sm:$0xff] }
  0x8e   :  { %997 = vrot.lane.b32.xlu1 %v6812_v23, %s3992_s17 }
  0x8f   :  { %v4777_v9 = vpop.permute.xlu1 %855 }
  0x90   :  { %6819 = vst [vmem:[#allocation9_spill] sm:$0xff] %v4777_v9 }
  0x91   :  { %995 = vrot.lane.b32.xlu0 %v6813_v51, %s3992_s17  ;;  %v703_v51 = vrot.slane %v701_v55, 5  ;;  %v4817_v55 = vld [vmem:[%s6684_s0 + $0xdc] sm:$0xf] }
  0x92   :  { %1001 = vrot.lane.b32.xlu1 %v6814_v57, %s3992_s17  ;;  %v1457_v16 = vshll.u32 %v4817_v55, 16  ;;  %v1461_v24 = vshrl.u32 %v4817_v55, 16 }
  0x93   :  { %v704_v8 = vsel %vm4070_vm2, %v699_v60, %v703_v51  ;;  %v1451_v60 = vshll.u32 %v4808_v5, 16 }
  0x94   :  { %v4797_v52 = vpop.permute.xlu0 %853  ;;  %v4830_v51 = vcombine.low %v694_v39, %v704_v8  ;;  %v4846_v39 = vld [vmem:[%s6684_s0 + $0xe0] sm:$0x1]  ;;  %v1459_v8 = vrot.slane %v1457_v16, 5 }
  0x95   :  { %999 = vrot.lane.b32.xlu0 %v6815_v7, %s3992_s17  ;;  %6823 = vst [vmem:[#allocation11_spill] sm:$0xff] %v4797_v52  ;;  %v1453_v15 = vrot.slane %v1451_v60, 5 }
  0x96   :  { %1005 = vrot.lane.b32.xlu1 %v6816_v19, %s3992_s17  ;;  %6826 = vst [vmem:[#allocation10_spill] sm:$0xff] %v4830_v51 }
  0x97   :  { %v1454_v16 = vor.u32 %v1453_v15, %v1450_v58 }
  0x98   :  { %v4803_v53 = vpop.permute.xlu1 %859 }
  0x99   :  { %1003 = vrot.lane.b32.xlu0 %v6817_v33, %s3992_s17  ;;  %6824 = vst [vmem:[#allocation13_spill] sm:$0xff] %v4803_v53 }
  0x9a   :  { %1009 = vrot.lane.b32.xlu1 %v6818_v20, %s3992_s17 }
  0x9c   :  { %v4834_v53 = vpop.permute.xlu0 %857 }
  0x9d   :  { %1007 = vrot.lane.b32.xlu0 %v6820_v13, %s3992_s17  ;;  %6827 = vst [vmem:[#allocation15_spill] sm:$0xff] %v4834_v53  ;;  %v1888_v53 = vrot.slane %v4791_v38, 5  ;;  %v6937_v22 = vld [vmem:[#allocation10_spill] sm:$0xff] }
  0x9e   :  { %1013 = vrot.lane.b32.xlu1 %v6821_v10, %s3992_s17 }
  0x9f   :  { %v1890_v52 = vrot.slane %v1888_v53, 4 }
  0xa1   :  { %1011 = vrot.lane.b32.xlu0 %v6822_v44, %s3992_s17 }
  0xa2   :  { %1017 = vrot.lane.b32.xlu1 %v4454_v63, %s3992_s17  ;;  %v4836_v45 = vpop.permute.xlu1 %863  ;;  %v1488_v63 = vor.u32 %v1487_v3, %v1483_v54  ;;  %v4856_v3 = vld [vmem:[%s6684_s0 + $0xf4] sm:$0xf] }
  0xa3   :  { %6828 = vst [vmem:[#allocation12_spill] sm:$0xff] %v4836_v45  ;;  %v1479_v45 = vrot.slane %v1478_v31, 4  ;;  %v1467_v31 = vshll.u32 %v4846_v39, 16  ;;  %v1505_v58 = vshll.u32 %v4856_v3, 16 }
  0xa4   :  { %v1489_v60 = vrot.slane %v1488_v63, 4  ;;  %v1509_v63 = vshrl.u32 %v4856_v3, 16 }
  0xa5   :  { %1015 = vrot.lane.b32.xlu0 %v6825_v28, %s3992_s17  ;;  %v4860_v46 = vpop.permute.xlu0 %861  ;;  %v1484_v15 = vsel %vm4070_vm2, %v1479_v45, %v1483_v54  ;;  %v1881_v28 = vrot.slane %v4817_v55, 5  ;;  %v4887_v27 = vrot.slane %v1505_v58, 5 }
  0xa6   :  { %1021 = vrot.lane.b32.xlu1 %v4489_v12, %s3992_s17  ;;  %v1463_v12 = vrot.slane %v1461_v24, 4  ;;  %6830 = vst [vmem:[#allocation17_spill] sm:$0xff] %v4860_v46  ;;  %v1499_v46 = vshll.u32 %v4851_v4, 16  ;;  %v1494_v24 = vsel %vm4070_vm2, %v1489_v60, %v1493_v25  ;;  %v1511_v25 = vrot.slane %v1509_v63, 4  ;;  %v3916_v60 = vld [vmem:[%s6685_s1] sm:$0xff]  }
  0xa7   :  { %v4901_v37 = vcombine.low %v1484_v15, %v1494_v24  ;;  %3865 = vmatprep.subr.bf16.mxu1 %v3916_v60  ;;  %v1883_v58 = vrot.slane %v1881_v28, 4  ;;  %v1892_v24 = vsel %vm4466_vm5, %v1890_v52, %v1891_v43  ;;  %3785 = vmatprep.subr.bf16.mxu0 %v3916_v60 }
  0xa8   :  { %3873 = vmatpush3.bf16.msra.mxu1 %v3916_v60  ;;  %3786 = vmatpush3.bf16.msra.mxu0 %v3916_v60  ;;  %v3918_v60 = vld [vmem:[%s6685_s1 + $0x10] sm:$0xff]  }
  0xa9   :  { %1019 = vrot.lane.b32.xlu0 %v6829_v30, %s3992_s17  ;;  %v3634_v30 = vrot.slane %v4784_v61, 9 }
  0xaa   :  { %1025 = vrot.lane.b32.xlu1 %v4830_v51, %s3992_s17  ;;  %v4867_v2 = vpop.permute.xlu1 %867  ;;  %v1464_v51 = vor.u32 %v1463_v12, %v1459_v8  ;;  %v1455_v12 = vrot.slane %v1454_v16, 4 }
  0xab   :  { %6831 = vst [vmem:[#allocation14_spill] sm:$0xff] %v4867_v2  ;;  %v1469_v2 = vrot.slane %v1467_v31, 5 }
  0xac   :  { %v1465_v9 = vrot.slane %v1464_v51, 4  ;;  %v4897_v51 = vld [vmem:[%s6684_s0 + $0xf8] sm:$0x1]  ;;  %v1460_v31 = vsel %vm4070_vm2, %v1455_v12, %v1459_v8 }
  0xad   :  { %1023 = vrot.lane.b32.xlu0 %v4464_v36, %s3992_s17  ;;  %v1496_v36 = vshrl.u32 %v4851_v4, 16  ;;  %v1515_v15 = vshll.u32 %v4897_v51, 16 }
  0xae   :  { %1032 = vrot.lane.b32.xlu1 %v4519_v11, %s3993_s12  ;;  %v1470_v63 = vsel %vm4070_vm2, %v1465_v9, %v1469_v2 }
  0xaf   :  { %v4885_v45 = vpop.permute.xlu0 %865  ;;  %v1498_v54 = vrot.slane %v1496_v36, 4  ;;  %v1889_v36 = vsel %vm4466_vm5, %v3634_v30, %v1888_v53  ;;  %v1512_v30 = vor.u32 %v1511_v25, %v4887_v27  ;;  %v1895_v25 = vrot.slane %v4856_v3, 5 }
  0xb0   :  { %6832 = vst [vmem:[#allocation16_spill] sm:$0xff] %v4885_v45  ;;  %v3917_v45 = vld [vmem:[%s6685_s1 + $0x8] sm:$0xff]   ;;  %v4928_v52 = vcombine.low %v1889_v36, %v1892_v24  ;;  %v3919_v24 = vld [vmem:[%s6685_s1 + $0x18] sm:$0xff]  }
  0xb1   :  { %1030 = vrot.lane.b32.xlu0 %v4496_v49, %s3993_s12  ;;  %v1501_v49 = vrot.slane %v1499_v46, 5  ;;  %v3633_v46 = vrot.slane %v4808_v5, 9  ;;  %3866 = vmatprep.subr.bf16.mxu1 %v3917_v45 }
  0xb2   :  { %1036 = vrot.lane.b32.xlu1 %v4542_v35, %s3993_s12  ;;  %v4892_v16 = vpop.permute.xlu1 %871  ;;  %3874 = vmatpush3.bf16.msra.mxu1 %v3917_v45 }
  0xb3   :  { %6833 = vst [vmem:[#allocation43_spill] sm:$0xff] %v4892_v16  ;;  %v1884_v16 = vrot.slane %v4846_v39, 5  ;;  %v1502_v53 = vor.u32 %v1501_v49, %v1498_v54  ;;  %v3667_v39 = vcombine.low %v1460_v31, %v1470_v63  ;;  %v1882_v8 = vsel %vm4466_vm5, %v3633_v46, %v1881_v28  ;;  %3787 = vmatprep.subr.bf16.mxu0 %v3917_v45  ;;  %v4949_v46 = vld [vmem:[%s6684_s0 + $0xfc] sm:$0xf] }
  0xb4   :  { %v1513_v54 = vrot.slane %v1512_v30, 4  ;;  %v1517_v49 = vrot.slane %v1515_v15, 5  ;;  %3788 = vmatpush3.bf16.msra.mxu0 %v3917_v45  ;;  %3867 = vmatprep.subr.bf16.mxu1 %v3918_v60  ;;  %v4943_v28 = vcombine.low %v4851_v4, %v4856_v3  ;;  %v1898_v3 = vrot.slane %v4897_v51, 5 }
  0xb5   :  { %1034 = vrot.lane.b32.xlu0 %v4513_v18, %s3993_s12  ;;  %v1885_v2 = vsel %vm4466_vm5, %v1883_v58, %v1884_v16  ;;  %v1503_v12 = vrot.slane %v1502_v53, 4  ;;  %v3635_v16 = vrot.slane %v4851_v4, 9  ;;  %v1897_v58 = vrot.slane %v1895_v25, 4  ;;  %v4962_v4 = vld [vmem:[%s6684_s0 + $0x100] sm:$0xf]  ;;  %3789 = vmatprep.subr.bf16.mxu0 %v3918_v60 }
  0xb6   :  { %1040 = vrot.lane.b32.xlu1 %v4562_v14, %s3993_s12  ;;  %v3683_v36 = vcombine.low %v1882_v8, %v1885_v2  ;;  %3875 = vmatpush3.bf16.msra.mxu1 %v3918_v60  ;;  %v1518_v63 = vsel %vm4070_vm2, %v1513_v54, %v1517_v49  ;;  %v1520_v51 = vshrl.u32 %v4949_v46, 16  ;;  %v1523_v15 = vshll.u32 %v4949_v46, 16 }
  0xb7   :  { %v4922_v9 = vpop.permute.xlu0 %869  ;;  %v1508_v31 = vsel %vm4070_vm2, %v1503_v12, %v4887_v27  ;;  %v4972_v27 = vcombine.low %v4784_v61, %v4791_v38  ;;  %3868 = vmatprep.subr.bf16.mxu1 %v3919_v24  ;;  %v1529_v8 = vshll.u32 %v4962_v4, 16  ;;  %v1896_v61 = vsel %vm4466_vm5, %v3635_v16, %v1895_v25  ;;  %v3920_v12 = vld [vmem:[%s6685_s1 + $0x20] sm:$0xff]  }
  0xb8   :  { %6834 = vst [vmem:[#allocation44_spill] sm:$0xff] %v4922_v9  ;;  %3790 = vmatpush3.bf16.msra.mxu0 %v3918_v60  ;;  %v4977_v30 = vcombine.low %v1508_v31, %v1518_v63  ;;  %v1899_v38 = vsel %vm4466_vm5, %v1897_v58, %v1898_v3  ;;  %v1522_v49 = vrot.slane %v1520_v51, 4  ;;  %v1525_v60 = vrot.slane %v1523_v15, 5  ;;  %v88_v63 = vld [vmem:[%s6684_s0 + $0x104] sm:$0x1]  ;;  %v3921_v58 = vld [vmem:[%s6685_s1 + $0x28] sm:$0xff]  }
  0xb9   :  { %1038 = vrot.lane.b32.xlu0 %v4536_v32, %s3993_s12  ;;  %3791 = vmatprep.subr.bf16.mxu0 %v3919_v24  ;;  %v4997_v25 = vcombine.low %v1896_v61, %v1899_v38  ;;  %v3923_v61 = vld [vmem:[%s6685_s1 + $0x30] sm:$0xff]  }
  0xba   :  { %2157 = vrot.lane.b32.xlu1 %v4901_v37, %s3989_s13  ;;  %v4926_v43 = vpop.permute.xlu1 %875  ;;  %3876 = vmatpush3.bf16.msra.mxu1 %v3919_v24  ;;  %v1526_v51 = vor.u32 %v1525_v60, %v1522_v49 }
  0xbb   :  { %6835 = vst [vmem:[#allocation45_spill] sm:$0xff] %v4926_v43  ;;  %3869 = vmatprep.subr.bf16.mxu1 %v3920_v12 }
  0xbc   :  { %3792 = vmatpush3.bf16.msra.mxu0 %v3919_v24  ;;  %v5015_v24 = vcombine.low %v4949_v46, %v4962_v4  ;;  %v1527_v38 = vrot.slane %v1526_v51, 4 }
  0xbd   :  { %2155 = vrot.lane.b32.xlu0 %v3667_v39, %s3989_s13  ;;  %v1533_v39 = vshrl.u32 %v4962_v4, 16  ;;  %3793 = vmatprep.subr.bf16.mxu0 %v3920_v12 }
  0xbe   :  { %2237 = vrot.lane.b32.xlu1 %v4928_v52, %s3990_s10  ;;  %3877 = vmatpush3.bf16.msra.mxu1 %v3920_v12 }
  0xbf   :  { %v4951_v45 = vpop.permute.xlu0 %873  ;;  %v1535_v16 = vrot.slane %v1533_v39, 4  ;;  %3870 = vmatprep.subr.bf16.mxu1 %v3921_v58  ;;  %v1539_v39 = vshll.u32 %v88_v63, 16 }
  0xc0   :  { %6836 = vst [vmem:[#allocation46_spill] sm:$0xff] %v4951_v45  ;;  %v4967_v53 = vpop.permute.xlu1 %927  ;;  %3794 = vmatpush3.bf16.msra.mxu0 %v3920_v12 }
  0xc1   :  { %2235 = vrot.lane.b32.xlu0 %v3683_v36, %s3990_s10  ;;  %v1531_v36 = vrot.slane %v1529_v8, 5  ;;  %3795 = vmatprep.subr.bf16.mxu0 %v3921_v58  ;;  %v1541_v49 = vrot.slane %v1539_v39, 5 }
  0xc2   :  { %2272 = vrot.lane.b32.xlu1 %v4943_v28, %s3991_s11  ;;  %3878 = vmatpush3.bf16.msra.mxu1 %v3921_v58 }
  0xc3   :  { %v4982_v2 = vpop.permute.xlu0 %925  ;;  %v1536_v15 = vor.u32 %v1535_v16, %v1531_v36  ;;  %3871 = vmatprep.subr.bf16.mxu1 %v3923_v61  ;;  %v1902_v16 = vrot.slane %v4962_v4, 5 }
  0xc4   :  { %v4991_v54 = vpop.permute.xlu1 %931  ;;  %3796 = vmatpush3.bf16.msra.mxu0 %v3921_v58  ;;  %v3924_v58 = vld [vmem:[%s6685_s1 + $0x38] sm:$0xff]   ;;  %s3995_s1 = smov 28  }
  0xc5   :  { %2270 = vrot.lane.b32.xlu0 %v4972_v27, %s3991_s11  ;;  %v1537_v12 = vrot.slane %v1536_v15, 4  ;;  %3797 = vmatprep.subr.bf16.mxu0 %v3923_v61  ;;  %v3636_v15 = vrot.slane %v4949_v46, 9  ;;  %v1904_v39 = vrot.slane %v1902_v16, 4 }
  0xc6   :  { %2307 = vrot.lane.b32.xlu1 %v4977_v30, %s3992_s17  ;;  %3879 = vmatpush3.bf16.msra.mxu1 %v3923_v61 }
  0xc7   :  { %v4999_v31 = vpop.permute.xlu0 %929  ;;  %3872 = vmatprep.subr.bf16.mxu1 %v3924_v58  ;;  %v1542_v4 = vsel %vm4070_vm2, %v1537_v12, %v1541_v49  ;;  %v1903_v46 = vsel %vm4466_vm5, %v3636_v15, %v1902_v16  ;;  %v89_v12 = vld [vmem:[%s6684_s0 + $0x108] sm:$0xf]  ;;  %v90_v49 = vld [vmem:[%s6684_s0 + $0x10c] sm:$0xf] }
  0xc8   :  { %v5007_v3 = vpop.permute.xlu1 %935  ;;  %3798 = vmatpush3.bf16.msra.mxu0 %v3923_v61  ;;  %v1905_v61 = vrot.slane %v88_v63, 5  ;;  %v1553_v15 = vshll.u32 %v90_v49, 16 }
  0xc9   :  { %6837 = vst [vmem:[#allocation47_spill] sm:$0xff] %v5007_v3  ;;  %2305 = vrot.lane.b32.xlu0 %v4901_v37, %s3992_s17  ;;  %3799 = vmatprep.subr.bf16.mxu0 %v3924_v58 }
  0xca   :  { %2342 = vrot.lane.b32.xlu1 %v4997_v25, %s3993_s12  ;;  %3880 = vmatpush3.bf16.msra.mxu1 %v3924_v58  ;;  %v1906_v63 = vsel %vm4466_vm5, %v1904_v39, %v1905_v61  ;;  %v1557_v39 = vshrl.u32 %v90_v49, 16 }
  0xcb   :  { %v5017_v8 = vpop.permute.xlu0 %933  ;;  %v5073_v16 = vcombine.low %v1903_v46, %v1906_v63  ;;  %v1555_v46 = vrot.slane %v1553_v15, 5 }
  0xcc   :  { %6838 = vst [vmem:[#allocation48_spill] sm:$0xff] %v5017_v8  ;;  %v5022_v37 = vpop.permute.xlu1 %939  ;;  %3800 = vmatpush3.bf16.msra.mxu0 %v3924_v58  ;;  %v1559_v63 = vrot.slane %v1557_v39, 4  ;;  %v1909_v39 = vrot.slane %v90_v49, 5 }
  0xcd   :  { %6839 = vst [vmem:[#allocation49_spill] sm:$0xff] %v5022_v37  ;;  %2340 = vrot.lane.b32.xlu0 %v4928_v52, %s3993_s12  ;;  %v1532_v52 = vsel %vm4070_vm2, %v1527_v38, %v1531_v36 }
  0xce   :  { %2377 = vrot.lane.b32.xlu1 %v5015_v24, %s3994_s15  ;;  %v5051_v9 = vcombine.low %v1532_v52, %v1542_v4  ;;  %v1544_v52 = vshrl.u32 %v89_v12, 16  ;;  %v1547_v4 = vshll.u32 %v89_v12, 16 }
  0xcf   :  { %v5028_v60 = vpop.permute.xlu0 %937 }
  0xd0   :  { %6840 = vst [vmem:[#allocation50_spill] sm:$0xff] %v5028_v60  ;;  %v5034_v45 = vpop.permute.xlu1 %943  ;;  %v93_v60 = vld [vmem:[%s6684_s0 + $0x118] sm:$0xf] }
  0xd1   :  { %6841 = vst [vmem:[#allocation51_spill] sm:$0xff] %v5034_v45  ;;  %2375 = vrot.lane.b32.xlu0 %v4943_v28, %s3994_s15 }
  0xd2   :  { %1065 = vrot.lane.b32.xlu1 %v4680_v50, %s3994_s15 }
  0xd3   :  { %v5044_v51 = vpop.permute.xlu0 %941 }
  0xd4   :  { %6842 = vst [vmem:[#allocation52_spill] sm:$0xff] %v5044_v51  ;;  %v5047_v43 = vpop.permute.xlu1 %947 }
  0xd5   :  { %6843 = vst [vmem:[#allocation53_spill] sm:$0xff] %v5047_v43  ;;  %2410 = vrot.lane.b32.xlu0 %v4977_v30, %s3995_s1  ;;  %v1546_v43 = vrot.slane %v1544_v52, 4 }
  0xd6   :  { %2445 = vrot.lane.b32.xlu1 %v4997_v25, %s3996_s19 }
  0xd7   :  { %v5055_v36 = vpop.permute.xlu0 %945 }
  0xd8   :  { %6844 = vst [vmem:[#allocation54_spill] sm:$0xff] %v5055_v36  ;;  %v5061_v38 = vpop.permute.xlu1 %951 }
  0xd9   :  { %6845 = vst [vmem:[#allocation55_spill] sm:$0xff] %v5061_v38  ;;  %2412 = vrot.lane.b32.xlu0 %v5051_v9, %s3995_s1 }
  0xda   :  { %1100 = vrot.lane.b32.xlu1 %v6812_v23, %s3995_s1  ;;  %v1549_v23 = vrot.slane %v1547_v4, 5 }
  0xdb   :  { %v5075_v58 = vpop.permute.xlu0 %949 }
  0xdc   :  { %6846 = vst [vmem:[#allocation56_spill] sm:$0xff] %v5075_v58  ;;  %v5077_v61 = vpop.permute.xlu1 %955  ;;  %v91_v58 = vld [vmem:[%s6684_s0 + $0x110] sm:$0x1]  ;;  %v1550_v45 = vor.u32 %v1549_v23, %v1546_v43  ;;  %v3637_v43 = vrot.slane %v89_v12, 9  ;;  %v5110_v23 = vcombine.low %v89_v12, %v90_v49 }
  0xdd   :  { %6847 = vst [vmem:[#allocation57_spill] sm:$0xff] %v5077_v61  ;;  %1067 = vrot.lane.b32.xlu0 %v4698_v0, %s3994_s15  ;;  %v1563_v52 = vshll.u32 %v91_v58, 16 }
  0xde   :  { %2447 = vrot.lane.b32.xlu1 %v5073_v16, %s3996_s19  ;;  %6850 = vst [vmem:[#allocation60_spill] sm:$0xff] %v5110_v23 }
  0xdf   :  { %v5083_v38 = vpop.permute.xlu0 %953  ;;  %v1565_v37 = vrot.slane %v1563_v52, 5  ;;  %v1912_v52 = vrot.slane %v91_v58, 5  ;;  %v1910_v58 = vsel %vm4466_vm5, %v3637_v43, %v1909_v39 }
  0xe0   :  { %6848 = vst [vmem:[#allocation58_spill] sm:$0xff] %v5083_v38  ;;  %v5085_v36 = vpop.permute.xlu1 %962  ;;  %v1560_v38 = vor.u32 %v1559_v63, %v1555_v46  ;;  %v1911_v63 = vrot.slane %v1909_v39, 4  ;;  %v94_v39 = vld [vmem:[%s6684_s0 + $0x11c] sm:$0x1] }
  0xe1   :  { %2159 = vrot.lane.b32.xlu0 %v4977_v30, %s3989_s13  ;;  %v1551_v30 = vrot.slane %v1550_v45, 4 }
  0xe2   :  { %1135 = vrot.lane.b32.xlu1 %v4519_v11, %s3996_s19  ;;  %v1561_v51 = vrot.slane %v1560_v38, 4 }
  0xe3   :  { %v5094_v61 = vpop.permute.xlu0 %960  ;;  %v1556_v45 = vsel %vm4070_vm2, %v1551_v30, %v1555_v46  ;;  %v1581_v30 = vshrl.u32 %v93_v60, 16 }
  0xe4   :  { %v5096_v4 = vpop.permute.xlu1 %966  ;;  %v1566_v38 = vsel %vm4070_vm2, %v1561_v51, %v1565_v37  ;;  %v1577_v37 = vshll.u32 %v93_v60, 16 }
  0xe5   :  { %1102 = vrot.lane.b32.xlu0 %v6815_v7, %s3995_s1  ;;  %v92_v7 = vld [vmem:[%s6684_s0 + $0x114] sm:$0xf] }
  0xe6   :  { %2239 = vrot.lane.b32.xlu1 %v4997_v25, %s3990_s10  ;;  %v1568_v49 = vshrl.u32 %v92_v7, 16  ;;  %v1571_v46 = vshll.u32 %v92_v7, 16 }
  0xe7   :  { %v5102_v15 = vpop.permute.xlu0 %964 }
  0xe8   :  { %v5104_v11 = vpop.permute.xlu1 %970 }
  0xe9   :  { %6849 = vst [vmem:[#allocation59_spill] sm:$0xff] %v5104_v11  ;;  %2161 = vrot.lane.b32.xlu0 %v5051_v9, %s3989_s13  ;;  %v5130_v11 = vcombine.low %v1556_v45, %v1566_v38  ;;  %v1573_v38 = vrot.slane %v1571_v46, 5 }
  0xea   :  { %2241 = vrot.lane.b32.xlu1 %v5073_v16, %s3990_s10 }
  0xeb   :  { %v5115_v25 = vpop.permute.xlu0 %968 }
  0xec   :  { %6851 = vst [vmem:[#allocation61_spill] sm:$0xff] %v5115_v25  ;;  %v5124_v12 = vpop.permute.xlu1 %974  ;;  %v1579_v25 = vrot.slane %v1577_v37, 5 }
  0xed   :  { %6852 = vst [vmem:[#allocation62_spill] sm:$0xff] %v5124_v12  ;;  %1137 = vrot.lane.b32.xlu0 %v4513_v18, %s3996_s19  ;;  %v1913_v12 = vsel %vm4466_vm5, %v1911_v63, %v1912_v52  ;;  %v1570_v18 = vrot.slane %v1568_v49, 4  ;;  %v5157_v63 = vcombine.low %v92_v7, %v93_v60  ;;  %v1587_v49 = vshll.u32 %v94_v39, 16 }
  0xee   :  { %2276 = vrot.lane.b32.xlu1 %v5110_v23, %s3991_s11  ;;  %v5144_v45 = vcombine.low %v1910_v58, %v1913_v12 }
  0xef   :  { %v5132_v51 = vpop.permute.xlu0 %972  ;;  %6857 = vst [vmem:[#allocation67_spill] sm:$0xff] %v5157_v63  ;;  %v1574_v52 = vor.u32 %v1573_v38, %v1570_v18  ;;  %v1589_v58 = vrot.slane %v1587_v49, 5 }
  0xf0   :  { %6853 = vst [vmem:[#allocation63_spill] sm:$0xff] %v5132_v51  ;;  %v5138_v3 = vpop.permute.xlu1 %978  ;;  %v1583_v51 = vrot.slane %v1581_v30, 4 }
  0xf1   :  { %6854 = vst [vmem:[#allocation64_spill] sm:$0xff] %v5138_v3  ;;  %2274 = vrot.lane.b32.xlu0 %v5015_v24, %s3991_s11  ;;  %v1575_v37 = vrot.slane %v1574_v52, 4  ;;  %v1919_v52 = vrot.slane %v94_v39, 5  ;;  %v95_v39 = vld [vmem:[%s6684_s0 + $0x120] sm:$0xf] }
  0xf2   :  { %2311 = vrot.lane.b32.xlu1 %v5130_v11, %s3992_s17  ;;  %v1584_v12 = vor.u32 %v1583_v51, %v1579_v25  ;;  %v3638_v51 = vrot.slane %v92_v7, 9 }
  0xf3   :  { %v5146_v8 = vpop.permute.xlu0 %976 }
  0xf4   :  { %6855 = vst [vmem:[#allocation65_spill] sm:$0xff] %v5146_v8  ;;  %v5151_v43 = vpop.permute.xlu1 %982 }
  0xf5   :  { %6856 = vst [vmem:[#allocation66_spill] sm:$0xff] %v5151_v43  ;;  %2309 = vrot.lane.b32.xlu0 %v5051_v9, %s3992_s17  ;;  %v1585_v9 = vrot.slane %v1584_v12, 4  ;;  %v1916_v43 = vrot.slane %v93_v60, 5 }
  0xf6   :  { %2346 = vrot.lane.b32.xlu1 %v5144_v45, %s3993_s12 }
  0xf7   :  { %v5159_v46 = vpop.permute.xlu0 %980  ;;  %v1590_v18 = vsel %vm4070_vm2, %v1585_v9, %v1589_v58  ;;  %v1918_v38 = vrot.slane %v1916_v43, 4  ;;  %v1917_v7 = vsel %vm4466_vm5, %v3638_v51, %v1916_v43  ;;  %v96_v9 = vld [vmem:[%s6684_s0 + $0x124] sm:$0xf]  ;;  %v1592_v43 = vshrl.u32 %v95_v39, 16 }
  0xf8   :  { %6858 = vst [vmem:[#allocation68_spill] sm:$0xff] %v5159_v46  ;;  %v5161_v30 = vpop.permute.xlu1 %986  ;;  %v1595_v51 = vshll.u32 %v95_v39, 16 }
  0xf9   :  { %6859 = vst [vmem:[#allocation69_spill] sm:$0xff] %v5161_v30  ;;  %2344 = vrot.lane.b32.xlu0 %v5073_v16, %s3993_s12  ;;  %v1580_v16 = vsel %vm4070_vm2, %v1575_v37, %v1579_v25  ;;  %v1920_v25 = vsel %vm4466_vm5, %v1918_v38, %v1919_v52  ;;  %v1601_v38 = vshll.u32 %v96_v9, 16 }
  0xfa   :  { %2381 = vrot.lane.b32.xlu1 %v5157_v63, %s3994_s15  ;;  %v5185_v49 = vcombine.low %v1580_v16, %v1590_v18  ;;  %v5205_v16 = vcombine.low %v1917_v7, %v1920_v25  ;;  %v1605_v18 = vshrl.u32 %v96_v9, 16  ;;  %v1597_v7 = vrot.slane %v1595_v51, 5 }
  0xfb   :  { %v5167_v3 = vpop.permute.xlu0 %984  ;;  %v1603_v25 = vrot.slane %v1601_v38, 5  ;;  %v1923_v38 = vrot.slane %v96_v9, 5 }
  0xfc   :  { %6860 = vst [vmem:[#allocation70_spill] sm:$0xff] %v5167_v3  ;;  %v5169_v8 = vpop.permute.xlu1 %990  ;;  %v1607_v30 = vrot.slane %v1605_v18, 4 }
  0xfd   :  { %6861 = vst [vmem:[#allocation71_spill] sm:$0xff] %v5169_v8  ;;  %2379 = vrot.lane.b32.xlu0 %v5110_v23, %s3994_s15  ;;  %v1594_v8 = vrot.slane %v1592_v43, 4  ;;  %v103_v23 = vld [vmem:[%s6684_s0 + $0x140] sm:$0x1] }
  0xfe   :  { %1069 = vrot.lane.b32.xlu1 %v4692_v21, %s3994_s15  ;;  %v1659_v6 = vshll.u32 %v103_v23, 16 }
  0xff   :  { %v5179_v60 = vpop.permute.xlu0 %988 }
 0x100   :  { %6862 = vst [vmem:[#allocation72_spill] sm:$0xff] %v5179_v60  ;;  %v5181_v12 = vpop.permute.xlu1 %997 }
 0x101   :  { %2414 = vrot.lane.b32.xlu0 %v5130_v11, %s3995_s1 }
 0x102   :  { %2449 = vrot.lane.b32.xlu1 %v5144_v45, %s3996_s19 }
 0x103   :  { %v5193_v37 = vpop.permute.xlu0 %995 }
 0x104   :  { %v5201_v58 = vpop.permute.xlu1 %1001 }
 0x105   :  { %6863 = vst [vmem:[#allocation73_spill] sm:$0xff] %v5201_v58  ;;  %2416 = vrot.lane.b32.xlu0 %v5185_v49, %s3995_s1 }
 0x106   :  { %1104 = vrot.lane.b32.xlu1 %v6814_v57, %s3995_s1  ;;  %v97_v57 = vld [vmem:[%s6684_s0 + $0x128] sm:$0x1] }
 0x107   :  { %v5209_v52 = vpop.permute.xlu0 %999  ;;  %v1611_v43 = vshll.u32 %v97_v57, 16 }
 0x108   :  { %v5211_v60 = vpop.permute.xlu1 %1005 }
 0x109   :  { %6864 = vst [vmem:[#allocation74_spill] sm:$0xff] %v5211_v60  ;;  %1071 = vrot.lane.b32.xlu0 %v4710_v41, %s3994_s15  ;;  %v1598_v60 = vor.u32 %v1597_v7, %v1594_v8  ;;  %v1608_v41 = vor.u32 %v1607_v30, %v1603_v25  ;;  %v3639_v8 = vrot.slane %v95_v39, 9  ;;  %v1925_v30 = vrot.slane %v1923_v38, 4 }
 0x10a   :  { %2451 = vrot.lane.b32.xlu1 %v5205_v16, %s3996_s19  ;;  %v1926_v7 = vrot.slane %v97_v57, 5  ;;  %v99_v57 = vld [vmem:[%s6684_s0 + $0x130] sm:$0xf] }
 0x10b   :  { %v5217_v3 = vpop.permute.xlu0 %1003 }
 0x10c   :  { %6865 = vst [vmem:[#allocation75_spill] sm:$0xff] %v5217_v3  ;;  %v5222_v46 = vpop.permute.xlu1 %1009  ;;  %v1609_v3 = vrot.slane %v1608_v41, 4 }
 0x10d   :  { %6866 = vst [vmem:[#allocation76_spill] sm:$0xff] %v5222_v46  ;;  %2163 = vrot.lane.b32.xlu0 %v5130_v11, %s3989_s13  ;;  %v1599_v46 = vrot.slane %v1598_v60, 4  ;;  %v1613_v11 = vrot.slane %v1611_v43, 5  ;;  %v98_v43 = vld [vmem:[%s6684_s0 + $0x12c] sm:$0xf] }
 0x10e   :  { %1139 = vrot.lane.b32.xlu1 %v4542_v35, %s3996_s19 }
 0x10f   :  { %v5228_v51 = vpop.permute.xlu0 %1007  ;;  %v1614_v41 = vsel %vm4070_vm2, %v1609_v3, %v1613_v11  ;;  %v1924_v3 = vsel %vm4466_vm5, %v3639_v8, %v1923_v38  ;;  %v1629_v11 = vshrl.u32 %v99_v57, 16 }
 0x110   :  { %6867 = vst [vmem:[#allocation77_spill] sm:$0xff] %v5228_v51  ;;  %v5230_v18 = vpop.permute.xlu1 %1013  ;;  %v1930_v51 = vrot.slane %v99_v57, 5 }
 0x111   :  { %6868 = vst [vmem:[#allocation78_spill] sm:$0xff] %v5230_v18  ;;  %1106 = vrot.lane.b32.xlu0 %v6817_v33, %s3995_s1  ;;  %v5244_v33 = vcombine.low %v95_v39, %v96_v9  ;;  %v1616_v9 = vshrl.u32 %v98_v43, 16 }
 0x112   :  { %2243 = vrot.lane.b32.xlu1 %v5144_v45, %s3990_s10  ;;  %v1604_v45 = vsel %vm4070_vm2, %v1599_v46, %v1603_v25  ;;  %v1927_v46 = vsel %vm4466_vm5, %v1925_v30, %v1926_v7  ;;  %v1619_v25 = vshll.u32 %v98_v43, 16  ;;  %v1631_v7 = vrot.slane %v1629_v11, 4 }
 0x113   :  { %v5236_v21 = vpop.permute.xlu0 %1011  ;;  %6871 = vst [vmem:[#allocation81_spill] sm:$0xff] %v5244_v33  ;;  %v5262_v39 = vcombine.low %v1604_v45, %v1614_v41  ;;  %v1618_v38 = vrot.slane %v1616_v9, 4  ;;  %v100_v41 = vld [vmem:[%s6684_s0 + $0x134] sm:$0x1] }
 0x114   :  { %6869 = vst [vmem:[#allocation79_spill] sm:$0xff] %v5236_v21  ;;  %v5238_v35 = vpop.permute.xlu1 %1017  ;;  %v1621_v8 = vrot.slane %v1619_v25, 5 }
 0x115   :  { %6870 = vst [vmem:[#allocation80_spill] sm:$0xff] %v5238_v35  ;;  %2165 = vrot.lane.b32.xlu0 %v5185_v49, %s3989_s13 }
 0x116   :  { %2245 = vrot.lane.b32.xlu1 %v5205_v16, %s3990_s10 }
 0x117   :  { %v5250_v60 = vpop.permute.xlu0 %1015 }
 0x118   :  { %6872 = vst [vmem:[#allocation82_spill] sm:$0xff] %v5250_v60  ;;  %v5258_v35 = vpop.permute.xlu1 %1021  ;;  %v1625_v60 = vshll.u32 %v99_v57, 16 }
 0x119   :  { %6873 = vst [vmem:[#allocation83_spill] sm:$0xff] %v5258_v35  ;;  %1141 = vrot.lane.b32.xlu0 %v4536_v32, %s3996_s19  ;;  %v5276_v32 = vcombine.low %v1924_v3, %v1927_v46  ;;  %v5291_v3 = vcombine.low %v98_v43, %v99_v57  ;;  %v1622_v46 = vor.u32 %v1621_v8, %v1618_v38 }
 0x11a   :  { %2280 = vrot.lane.b32.xlu1 %v5244_v33, %s3991_s11  ;;  %v1627_v30 = vrot.slane %v1625_v60, 5  ;;  %v1635_v60 = vshll.u32 %v100_v41, 16 }
 0x11b   :  { %v5270_v18 = vpop.permute.xlu0 %1019 }
 0x11c   :  { %6874 = vst [vmem:[#allocation84_spill] sm:$0xff] %v5270_v18  ;;  %v5272_v35 = vpop.permute.xlu1 %1025  ;;  %v1632_v9 = vor.u32 %v1631_v7, %v1627_v30  ;;  %v3640_v7 = vrot.slane %v98_v43, 9 }
 0x11d   :  { %6875 = vst [vmem:[#allocation85_spill] sm:$0xff] %v5272_v35  ;;  %2278 = vrot.lane.b32.xlu0 %v5157_v63, %s3991_s11  ;;  %v1637_v35 = vrot.slane %v1635_v60, 5 }
 0x11e   :  { %2315 = vrot.lane.b32.xlu1 %v5262_v39, %s3992_s17 }
 0x11f   :  { %v5280_v45 = vpop.permute.xlu0 %1023 }
 0x120   :  { %6876 = vst [vmem:[#allocation86_spill] sm:$0xff] %v5280_v45  ;;  %v5285_v18 = vpop.permute.xlu1 %1032  ;;  %v1623_v45 = vrot.slane %v1622_v46, 4  ;;  %v1932_v46 = vrot.slane %v1930_v51, 4 }
 0x121   :  { %2313 = vrot.lane.b32.xlu0 %v5185_v49, %s3992_s17  ;;  %v1633_v49 = vrot.slane %v1632_v9, 4  ;;  %v1933_v9 = vrot.slane %v100_v41, 5  ;;  %v102_v41 = vld [vmem:[%s6684_s0 + $0x13c] sm:$0xf] }
 0x122   :  { %2350 = vrot.lane.b32.xlu1 %v5276_v32, %s3993_s12 }
 0x123   :  { %v5293_v25 = vpop.permute.xlu0 %1030  ;;  %v1638_v38 = vsel %vm4070_vm2, %v1633_v49, %v1637_v35  ;;  %v1934_v35 = vsel %vm4466_vm5, %v1932_v46, %v1933_v9  ;;  %v1649_v46 = vshll.u32 %v102_v41, 16 }
 0x124   :  { %v5295_v11 = vpop.permute.xlu1 %1036 }
 0x125   :  { %6877 = vst [vmem:[#allocation87_spill] sm:$0xff] %v5295_v11  ;;  %2348 = vrot.lane.b32.xlu0 %v5205_v16, %s3993_s12  ;;  %v1628_v16 = vsel %vm4070_vm2, %v1623_v45, %v1627_v30  ;;  %v1931_v30 = vsel %vm4466_vm5, %v3640_v7, %v1930_v51  ;;  %v5332_v45 = vld [vmem:[%s6684_s0 + $0x138] sm:$0xf]  ;;  %v1653_v7 = vshrl.u32 %v102_v41, 16 }
 0x126   :  { %2385 = vrot.lane.b32.xlu1 %v5291_v3, %s3994_s15  ;;  %v5319_v60 = vcombine.low %v1628_v16, %v1638_v38  ;;  %v5341_v51 = vcombine.low %v1931_v30, %v1934_v35  ;;  %v1640_v16 = vshrl.u32 %v5332_v45, 16  ;;  %v1643_v38 = vshll.u32 %v5332_v45, 16 }
 0x127   :  { %v5301_v21 = vpop.permute.xlu0 %1034  ;;  %v1651_v30 = vrot.slane %v1649_v46, 5  ;;  %v1655_v35 = vrot.slane %v1653_v7, 4 }
 0x128   :  { %v5303_v63 = vpop.permute.xlu1 %1040 }
 0x129   :  { %6878 = vst [vmem:[#allocation88_spill] sm:$0xff] %v5303_v63  ;;  %2383 = vrot.lane.b32.xlu0 %v5244_v33, %s3994_s15  ;;  %v1642_v63 = vrot.slane %v1640_v16, 4  ;;  %v1656_v40 = vor.u32 %v1655_v35, %v1651_v30 }
 0x12a   :  { %1073 = vrot.lane.b32.xlu1 %v4704_v1, %s3994_s15 }
 0x12b   :  { %v5313_v8 = vpop.permute.xlu0 %1038  ;;  %v1657_v11 = vrot.slane %v1656_v40, 4  ;;  %v3641_v40 = vrot.slane %v5332_v45, 9 }
 0x12c   :  { %6879 = vst [vmem:[#allocation89_spill] sm:$0xff] %v5313_v8  ;;  %v5315_v57 = vpop.permute.xlu1 %2157 }
 0x12d   :  { %2418 = vrot.lane.b32.xlu0 %v5262_v39, %s3995_s1 }
 0x12e   :  { %2453 = vrot.lane.b32.xlu1 %v5276_v32, %s3996_s19 }
 0x12f   :  { %v2156_v1 = vpop.permute.xlu0 %2155 }
 0x130   :  { %v5327_v43 = vpop.permute.xlu1 %2237 }
 0x131   :  { %2420 = vrot.lane.b32.xlu0 %v5319_v60, %s3995_s1 }
 0x132   :  { %1108 = vrot.lane.b32.xlu1 %v6816_v19, %s3995_s1  ;;  %v1645_v19 = vrot.slane %v1643_v38, 5  ;;  %v1937_v38 = vrot.slane %v102_v41, 5 }
 0x133   :  { %v2236_v49 = vpop.permute.xlu0 %2235 }
 0x134   :  { %v5345_v9 = vpop.permute.xlu1 %2272  ;;  %v1646_v10 = vor.u32 %v1645_v19, %v1642_v63 }
 0x135   :  { %1075 = vrot.lane.b32.xlu0 %v4718_v17, %s3994_s15 }
 0x136   :  { %2455 = vrot.lane.b32.xlu1 %v5341_v51, %s3996_s19  ;;  %v1647_v46 = vrot.slane %v1646_v10, 4  ;;  %v1940_v10 = vrot.slane %v103_v23, 5  ;;  %v6881_v23 = vld [vmem:[#allocation30_spill] sm:$0xff] }
 0x137   :  { %v2271_v33 = vpop.permute.xlu0 %2270 }
 0x138   :  { %v5351_v8 = vpop.permute.xlu1 %2307 }
 0x139   :  { %2167 = vrot.lane.b32.xlu0 %v5262_v39, %s3989_s13  ;;  %v1661_v39 = vrot.slane %v1659_v6, 5  ;;  %v1939_v6 = vrot.slane %v1937_v38, 4 }
 0x13a   :  { %1143 = vrot.lane.b32.xlu1 %v4562_v14, %s3996_s19  ;;  %v5371_v14 = vcombine.low %v5332_v45, %v102_v41  ;;  %v1652_v41 = vsel %vm4070_vm2, %v1647_v46, %v1651_v30 }
 0x13b   :  { %v2306_v17 = vpop.permute.xlu0 %2305  ;;  %v1662_v35 = vsel %vm4070_vm2, %v1657_v11, %v1661_v39  ;;  %v1941_v11 = vsel %vm4466_vm5, %v1939_v6, %v1940_v10 }
 0x13c   :  { %v5360_v16 = vpop.permute.xlu1 %2342 }
 0x13d   :  { %1110 = vrot.lane.b32.xlu0 %v6820_v13, %s3995_s1  ;;  %v6880_v13 = vcombine.low %v4808_v5, %v4817_v55 }
 0x13e   :  { %2247 = vrot.lane.b32.xlu1 %v5276_v32, %s3990_s10 }
 0x13f   :  { %v2341_v7 = vpop.permute.xlu0 %2340  ;;  %v2479_v63 = vsel %vm1167_vm6, %v6880_v13, %v2156_v1  ;;  %v3935_v13 = vld [vmem:[%s6684_s0] sm:$0xf] }
 0x140   :  { %v5366_v58 = vpop.permute.xlu1 %2377  ;;  %v2526_v32 = vsel %vm1216_vm7, %v2479_v63, %v2236_v49  ;;  %v5392_v49 = vcombine.low %v1652_v41, %v1662_v35  ;;  %v3936_v63 = vld [vmem:[%s6684_s0 + $0x4] sm:$0xf] }
 0x141   :  { %2169 = vrot.lane.b32.xlu0 %v5319_v60, %s3989_s13  ;;  %v2558_v1 = vsel %vm1249_vm8, %v2526_v32, %v2271_v33  ;;  %v1938_v33 = vsel %vm4466_vm5, %v3641_v40, %v1937_v38  ;;  %v3579_v40 = vcombine.low %v3935_v13, %v3936_v63 }
 0x142   :  { %2249 = vrot.lane.b32.xlu1 %v5341_v51, %s3990_s10  ;;  %v2590_v55 = vsel %vm1282_vm9, %v2558_v1, %v2306_v17  ;;  %v5401_v17 = vld [vmem:[%s6684_s0 + $0x144] sm:$0xf]  ;;  %v5419_v10 = vcombine.low %v1938_v33, %v1941_v11 }
 0x143   :  { %v2376_v19 = vpop.permute.xlu0 %2375  ;;  %v2622_v45 = vsel %vm1315_vm11, %v2590_v55, %v2341_v7  ;;  %v5407_v7 = vld [vmem:[%s6684_s0 + $0x148] sm:$0xf]  ;;  %v1664_v32 = vshrl.u32 %v5401_v17, 16  ;;  %v1667_v41 = vshll.u32 %v5401_v17, 16 }
 0x144   :  { %v1066_v5 = vpop.permute.xlu1 %1065  ;;  %v2654_v30 = vsel %vm1348_vm10, %v2622_v45, %v2376_v19  ;;  %v2482_v19 = vsel %vm1167_vm6, %v4972_v27, %v5315_v57  ;;  %v1677_v35 = vshrl.u32 %v5407_v7, 16  ;;  %v1673_v1 = vshll.u32 %v5407_v7, 16 }
 0x145   :  { %1145 = vrot.lane.b32.xlu0 %v6881_v23, %s3996_s19  ;;  %v2528_v55 = vsel %vm1216_vm7, %v2482_v19, %v5327_v43  ;;  %v1170_v27 = vsel %vm1167_vm6, %v3579_v40, %v4762_v34  ;;  %v1669_v43 = vrot.slane %v1667_v41, 5 }
 0x146   :  { %2284 = vrot.lane.b32.xlu1 %v5371_v14, %s3991_s11  ;;  %v2560_v33 = vsel %vm1249_vm8, %v2528_v55, %v5345_v9  ;;  %v1679_v9 = vrot.slane %v1677_v35, 4 }
 0x147   :  { %v2411_v46 = vpop.permute.xlu0 %2410  ;;  %v2592_v57 = vsel %vm1282_vm9, %v2560_v33, %v5351_v8 }
 0x148   :  { %v2686_v39 = vsel %vm1381_vm12, %v2654_v30, %v2411_v46  ;;  %v2446_v38 = vpop.permute.xlu1 %2445  ;;  %v1666_v30 = vrot.slane %v1664_v32, 4  ;;  %v2624_v46 = vsel %vm1315_vm11, %v2592_v57, %v5360_v16 }
 0x149   :  { %2282 = vrot.lane.b32.xlu0 %v5291_v3, %s3991_s11  ;;  %v2718_v6 = vsel %vm1414_vm13, %v2686_v39, %v2446_v38  ;;  %v1675_v39 = vrot.slane %v1673_v1, 5  ;;  %v1218_v38 = vsel %vm1216_vm7, %v1170_v27, %v4982_v2  ;;  %v2656_v34 = vsel %vm1348_vm10, %v2624_v46, %v5366_v58 }
 0x14a   :  { %2319 = vrot.lane.b32.xlu1 %v5392_v49, %s3992_s17  ;;  %3833 = vmatprep.mubr.msk.bf16.mxu1 %vm2749_vm14, %v2718_v6  ;;  %v1251_v16 = vsel %vm1249_vm8, %v1218_v38, %v5094_v61  ;;  %v1670_v61 = vor.u32 %v1669_v43, %v1666_v30 }
 0x14b   :  { %v2413_v45 = vpop.permute.xlu0 %2412  ;;  %v1284_v40 = vsel %vm1282_vm9, %v1251_v16, %v5193_v37  ;;  %v1680_v6 = vor.u32 %v1679_v9, %v1675_v39 }
 0x14c   :  { %v1101_v11 = vpop.permute.xlu1 %1100  ;;  %v2688_v13 = vsel %vm1381_vm12, %v2656_v34, %v2413_v45  ;;  %v1317_v58 = vsel %vm1315_vm11, %v1284_v40, %v5293_v25  ;;  %v5473_v25 = vcombine.low %v5401_v17, %v5407_v7  ;;  %v1944_v45 = vrot.slane %v5407_v7, 5 }
 0x14d   :  { %2317 = vrot.lane.b32.xlu0 %v5319_v60, %s3992_s17  ;;  %v106_v60 = vld [vmem:[%s6684_s0 + $0x14c] sm:$0x1]  ;;  %v1350_v19 = vsel %vm1348_vm10, %v1317_v58, %v1066_v5  ;;  %v1671_v5 = vrot.slane %v1670_v61, 4  ;;  %v1681_v35 = vrot.slane %v1680_v6, 4 }
 0x14e   :  { %2354 = vrot.lane.b32.xlu1 %v5419_v10, %s3993_s12  ;;  %v1683_v32 = vshll.u32 %v106_v60, 16  ;;  %v1383_v37 = vsel %vm1381_vm12, %v1350_v19, %v1101_v11  ;;  %v1173_v11 = vsel %vm1167_vm6, %v4686_v62, %v4775_v59  ;;  %v3642_v62 = vrot.slane %v5401_v17, 9  ;;  %v5514_v17 = vld [vmem:[%s6684_s0 + $0x150] sm:$0xf] }
 0x14f   :  { %v1068_v8 = vpop.permute.xlu0 %1067  ;;  %v1220_v27 = vsel %vm1216_vm7, %v1173_v11, %v4967_v53  ;;  %v1676_v57 = vsel %vm4070_vm2, %v1671_v5, %v1675_v39  ;;  %v1946_v59 = vrot.slane %v1944_v45, 4  ;;  %v1947_v43 = vrot.slane %v106_v60, 5  ;;  %v109_v5 = vld [vmem:[%s6684_s0 + $0x158] sm:$0x1] }
 0x150   :  { %v2448_v63 = vpop.permute.xlu1 %2447  ;;  %v1685_v1 = vrot.slane %v1683_v32, 5  ;;  %v1253_v30 = vsel %vm1249_vm8, %v1220_v27, %v5085_v36  ;;  %v1945_v60 = vsel %vm4466_vm5, %v3642_v62, %v1944_v45  ;;  %v1691_v40 = vshll.u32 %v5514_v17, 16 }
 0x151   :  { %2352 = vrot.lane.b32.xlu0 %v5341_v51, %s3993_s12  ;;  %v2720_v2 = vsel %vm1414_vm13, %v2688_v13, %v2448_v63  ;;  %v1286_v53 = vsel %vm1282_vm9, %v1253_v30, %v5181_v12  ;;  %v5519_v12 = vld [vmem:[%s6684_s0 + $0x154] sm:$0xf]  ;;  %v1688_v63 = vshrl.u32 %v5514_v17, 16  ;;  %v1707_v45 = vshll.u32 %v109_v5, 16 }
 0x152   :  { %1042 = vrot.lane.b32.xlu1 %v6881_v23, %s3993_s12  ;;  %3834 = vmatmul.mubr.msk.bf16.vlgmr.msra.gmra.mrb[0].mxu1 %vm2749_vm14, %v2720_v2  ;;  %v1686_v7 = vsel %vm4070_vm2, %v1681_v35, %v1685_v1  ;;  %v1319_v39 = vsel %vm1315_vm11, %v1286_v53, %v5285_v18  ;;  %v1701_v2 = vshrl.u32 %v5519_v12, 16  ;;  %v1697_v58 = vshll.u32 %v5519_v12, 16 }
 0x153   :  { %v5466_v41 = vpop.permute.xlu0 %2159  ;;  %v5506_v38 = vcombine.low %v1676_v57, %v1686_v7  ;;  %v1352_v36 = vsel %vm1348_vm10, %v1319_v39, %v1068_v8  ;;  %v1948_v8 = vsel %vm4466_vm5, %v1946_v59, %v1947_v43  ;;  %v1690_v19 = vrot.slane %v1688_v63, 4 }
 0x154   :  { %v1136_v51 = vpop.permute.xlu1 %1135  ;;  %v5538_v61 = vcombine.low %v1945_v60, %v1948_v8  ;;  %v1709_v30 = vrot.slane %v1707_v45, 5  ;;  %v2485_v62 = vsel %vm1167_vm6, %v4943_v28, %v5466_v41  ;;  %v5566_v39 = vcombine.low %v5514_v17, %v5519_v12 }
 0x155   :  { %2387 = vrot.lane.b32.xlu0 %v5371_v14, %s3994_s15  ;;  %v1416_v23 = vsel %vm1414_vm13, %v1383_v37, %v1136_v51  ;;  %v1693_v37 = vrot.slane %v1691_v40, 5  ;;  %v1699_v51 = vrot.slane %v1697_v58, 5 }
 0x156   :  { %2422 = vrot.lane.b32.xlu1 %v5392_v49, %s3995_s1  ;;  %3801 = vmatprep.mubr.msk.bf16.mxu0 %vm2749_vm14, %v1416_v23  ;;  %v1703_v23 = vrot.slane %v1701_v2, 4 }
 0x157   :  { %v1103_v55 = vpop.permute.xlu0 %1102  ;;  %v1694_v1 = vor.u32 %v1693_v37, %v1690_v19 }
 0x158   :  { %v2240_v33 = vpop.permute.xlu1 %2239  ;;  %v1385_v18 = vsel %vm1381_vm12, %v1352_v36, %v1103_v55  ;;  %v1704_v55 = vor.u32 %v1703_v23, %v1699_v51  ;;  %v1176_v23 = vsel %vm1167_vm6, %v4680_v50, %v4754_v29 }
 0x159   :  { %2389 = vrot.lane.b32.xlu0 %v5473_v25, %s3994_s15  ;;  %v1695_v57 = vrot.slane %v1694_v1, 4  ;;  %v2530_v59 = vsel %vm1216_vm7, %v2485_v62, %v2240_v33  ;;  %v3643_v33 = vrot.slane %v5514_v17, 9  ;;  %v1222_v29 = vsel %vm1216_vm7, %v1176_v23, %v4999_v31 }
 0x15a   :  { %1077 = vrot.lane.b32.xlu1 %v4636_v42, %s3994_s15  ;;  %v1705_v7 = vrot.slane %v1704_v55, 4 }
 0x15b   :  { %v5495_v46 = vpop.permute.xlu0 %2161  ;;  %v1700_v28 = vsel %vm4070_vm2, %v1695_v57, %v1699_v51 }
 0x15c   :  { %v5500_v9 = vpop.permute.xlu1 %2241  ;;  %v2488_v2 = vsel %vm1167_vm6, %v5015_v24, %v5495_v46  ;;  %v5603_v46 = vld [vmem:[%s6684_s0 + $0x160] sm:$0xf] }
 0x15d   :  { %1044 = vrot.lane.b32.xlu0 %v4584_v56, %s3993_s12  ;;  %v2532_v19 = vsel %vm1216_vm7, %v2488_v2, %v5500_v9  ;;  %v1725_v55 = vshrl.u32 %v5603_v46, 16  ;;  %v1721_v50 = vshll.u32 %v5603_v46, 16  ;;  %v6884_v2 = vld [vmem:[#allocation87_spill] sm:$0xff] }
 0x15e   :  { %2457 = vrot.lane.b32.xlu1 %v5419_v10, %s3996_s19 }
 0x15f   :  { %v1138_v34 = vpop.permute.xlu0 %1137 }
 0x160   :  { %v1418_v16 = vsel %vm1414_vm13, %v1385_v18, %v1138_v34  ;;  %v5527_v13 = vpop.permute.xlu1 %2276  ;;  %v1954_v18 = vrot.slane %v109_v5, 5 }
 0x161   :  { %2424 = vrot.lane.b32.xlu0 %v5506_v38, %s3995_s1  ;;  %3802 = vmatmul.mubr.msk.bf16.vlgmr.msra.gmra.mrb[0].mxu0 %vm2749_vm14, %v1418_v16  ;;  %v6882_v16 = vld [vmem:[#allocation31_spill] sm:$0xff]  ;;  %v2564_v37 = vsel %vm1249_vm8, %v2532_v19, %v5527_v13 }
 0x162   :  { %1112 = vrot.lane.b32.xlu1 %v6818_v20, %s3995_s1 }
 0x163   :  { %v2275_v6 = vpop.permute.xlu0 %2274 }
 0x164   :  { %v2312_v32 = vpop.permute.xlu1 %2311  ;;  %v2562_v43 = vsel %vm1249_vm8, %v2530_v59, %v2275_v6  ;;  %v5596_v6 = vld [vmem:[%s6684_s0 + $0x15c] sm:$0xf] }
 0x165   :  { %1079 = vrot.lane.b32.xlu0 %v4726_v26, %s3994_s15  ;;  %v2596_v5 = vsel %vm1282_vm9, %v2564_v37, %v2312_v32  ;;  %v1715_v13 = vshll.u32 %v5596_v6, 16  ;;  %v3644_v37 = vrot.slane %v5596_v6, 9 }
 0x166   :  { %2459 = vrot.lane.b32.xlu1 %v5538_v61, %s3996_s19 }
 0x167   :  { %v2310_v35 = vpop.permute.xlu0 %2309 }
 0x168   :  { %v2347_v20 = vpop.permute.xlu1 %2346 }
 0x169   :  { %2171 = vrot.lane.b32.xlu0 %v5392_v49, %s3989_s13  ;;  %v1951_v49 = vrot.slane %v5519_v12, 5  ;;  %v2628_v1 = vsel %vm1315_vm11, %v2596_v5, %v2347_v20 }
 0x16a   :  { %1147 = vrot.lane.b32.xlu1 %v4584_v56, %s3996_s19 }
 0x16b   :  { %v2345_v11 = vpop.permute.xlu0 %2344  ;;  %v1953_v36 = vrot.slane %v1951_v49, 4  ;;  %v1952_v17 = vsel %vm4466_vm5, %v3643_v33, %v1951_v49  ;;  %v1727_v49 = vrot.slane %v1725_v55, 4  ;;  %v1179_v33 = vsel %vm1167_vm6, %v4698_v0, %v4766_v47 }
 0x16c   :  { %v2382_v27 = vpop.permute.xlu1 %2381  ;;  %v1958_v47 = vrot.slane %v5603_v46, 5 }
 0x16d   :  { %1114 = vrot.lane.b32.xlu0 %v6822_v44, %s3995_s1  ;;  %v2594_v44 = vsel %vm1282_vm9, %v2562_v43, %v2310_v35  ;;  %v1955_v58 = vsel %vm4466_vm5, %v1953_v36, %v1954_v18  ;;  %v1712_v35 = vshrl.u32 %v5596_v6, 16  ;;  %v2660_v32 = vsel %vm1348_vm10, %v2628_v1, %v2382_v27  ;;  %v6886_v1 = vld [vmem:[#allocation19_spill] sm:$0xff] }
 0x16e   :  { %2251 = vrot.lane.b32.xlu1 %v5419_v10, %s3990_s10  ;;  %v1710_v10 = vsel %vm4070_vm2, %v1705_v7, %v1709_v30  ;;  %v2626_v41 = vsel %vm1315_vm11, %v2594_v44, %v2345_v11  ;;  %v5613_v9 = vcombine.low %v1952_v17, %v1955_v58  ;;  %v1255_v11 = vsel %vm1249_vm8, %v1222_v29, %v5102_v15  ;;  %v6885_v58 = vld [vmem:[#allocation25_spill] sm:$0xff] }
 0x16f   :  { %v2380_v56 = vpop.permute.xlu0 %2379  ;;  %v5581_v40 = vcombine.low %v1700_v28, %v1710_v10  ;;  %v1288_v7 = vsel %vm1282_vm9, %v1255_v11, %v5209_v52  ;;  %v1714_v62 = vrot.slane %v1712_v35, 4  ;;  %v1717_v15 = vrot.slane %v1715_v13, 5 }
 0x170   :  { %v1070_v53 = vpop.permute.xlu1 %1069  ;;  %v2658_v34 = vsel %vm1348_vm10, %v2626_v41, %v2380_v56  ;;  %v1321_v31 = vsel %vm1315_vm11, %v1288_v7, %v5301_v21  ;;  %v1723_v27 = vrot.slane %v1721_v50, 5  ;;  %v1224_v36 = vsel %vm1216_vm7, %v1179_v33, %v4991_v54 }
 0x171   :  { %2173 = vrot.lane.b32.xlu0 %v5506_v38, %s3989_s13  ;;  %v1354_v59 = vsel %vm1348_vm10, %v1321_v31, %v1070_v53  ;;  %v1718_v53 = vor.u32 %v1717_v15, %v1714_v62  ;;  %v1959_v50 = vsel %vm4466_vm5, %v3644_v37, %v1958_v47  ;;  %v3937_v15 = vld [vmem:[%s6684_s0 + $0xc4] sm:$0xf] }
 0x172   :  { %2253 = vrot.lane.b32.xlu1 %v5538_v61, %s3990_s10  ;;  %v1728_v44 = vor.u32 %v1727_v49, %v1723_v27 }
 0x173   :  { %v2415_v60 = vpop.permute.xlu0 %2414  ;;  %v1719_v18 = vrot.slane %v1718_v53, 4  ;;  %v3939_v53 = vld [vmem:[%s6684_s0 + $0xc8] sm:$0x1] }
 0x174   :  { %v2690_v12 = vsel %vm1381_vm12, %v2658_v34, %v2415_v60  ;;  %v2450_v8 = vpop.permute.xlu1 %2449  ;;  %v1729_v34 = vrot.slane %v1728_v44, 4  ;;  %v713_v44 = vrot.slane %v3939_v53, 5  ;;  %v6893_v53 = vld [vmem:[#allocation11_spill] sm:$0xff] }
 0x175   :  { %1149 = vrot.lane.b32.xlu0 %v6882_v16, %s3996_s19  ;;  %v2722_v63 = vsel %vm1414_vm13, %v2690_v12, %v2450_v8  ;;  %v1257_v12 = vsel %vm1249_vm8, %v1224_v36, %v5096_v4  ;;  %v6883_v8 = vld [vmem:[#allocation73_spill] sm:$0xff]  ;;  %v1724_v4 = vsel %vm4070_vm2, %v1719_v18, %v1723_v27  ;;  %v710_v27 = vrot.slane %v3937_v15, 5 }
 0x176   :  { %2288 = vrot.lane.b32.xlu1 %v5566_v39, %s3991_s11  ;;  %3837 = vmatprep.mubr.msk.bf16.mxu1 %vm2749_vm14, %v2722_v63 }
 0x177   :  { %v2417_v24 = vpop.permute.xlu0 %2416 }
 0x178   :  { %v1105_v51 = vpop.permute.xlu1 %1104  ;;  %v2692_v20 = vsel %vm1381_vm12, %v2660_v32, %v2417_v24  ;;  %v5710_v32 = vld [vmem:[%s6684_s0 + $0x16c] sm:$0xf] }
 0x179   :  { %2286 = vrot.lane.b32.xlu0 %v5473_v25, %s3991_s11  ;;  %v1387_v56 = vsel %vm1381_vm12, %v1354_v59, %v1105_v51  ;;  %v1960_v51 = vrot.slane %v1958_v47, 4  ;;  %v1745_v62 = vshll.u32 %v5710_v32, 16  ;;  %v6888_v59 = vld [vmem:[#allocation33_spill] sm:$0xff]  ;;  %v6889_v47 = vld [vmem:[#allocation60_spill] sm:$0xff] }
 0x17a   :  { %2323 = vrot.lane.b32.xlu1 %v5581_v40, %s3992_s17 }
 0x17b   :  { %v1072_v45 = vpop.permute.xlu0 %1071 }
 0x17c   :  { %v2452_v57 = vpop.permute.xlu1 %2451 }
 0x17d   :  { %2321 = vrot.lane.b32.xlu0 %v5506_v38, %s3992_s17  ;;  %v2724_v30 = vsel %vm1414_vm13, %v2692_v20, %v2452_v57  ;;  %v112_v38 = vld [vmem:[%s6684_s0 + $0x164] sm:$0x1] }
 0x17e   :  { %2358 = vrot.lane.b32.xlu1 %v5613_v9, %s3993_s12  ;;  %3838 = vmatmul.mubr.msk.bf16.gmra.mrb[4].mxu1 %vm2749_vm14, %v2724_v30  ;;  %v1731_v28 = vshll.u32 %v112_v38, 16  ;;  %v1961_v23 = vrot.slane %v112_v38, 5  ;;  %v6887_v57 = vld [vmem:[#allocation23_spill] sm:$0xff]  ;;  %v1749_v30 = vshrl.u32 %v5710_v32, 16 }
 0x17f   :  { %v5639_v52 = vpop.permute.xlu0 %2163 }
 0x180   :  { %v1140_v43 = vpop.permute.xlu1 %1139  ;;  %v1733_v60 = vrot.slane %v1731_v28, 5  ;;  %v1962_v29 = vsel %vm4466_vm5, %v1960_v51, %v1961_v23  ;;  %v115_v28 = vld [vmem:[%s6684_s0 + $0x170] sm:$0x1]  ;;  %v1751_v33 = vrot.slane %v1749_v30, 4 }
 0x181   :  { %2356 = vrot.lane.b32.xlu0 %v5538_v61, %s3993_s12  ;;  %v1420_v21 = vsel %vm1414_vm13, %v1387_v56, %v1140_v43  ;;  %v5660_v61 = vcombine.low %v5596_v6, %v5603_v46  ;;  %v5701_v6 = vld [vmem:[%s6684_s0 + $0x168] sm:$0xf]  ;;  %v5720_v7 = vcombine.low %v1959_v50, %v1962_v29  ;;  %v3938_v43 = vld [vmem:[%s6684_s0 + $0xc0] sm:$0xf]  ;;  %v1965_v50 = vrot.slane %v5710_v32, 5 }
 0x182   :  { %1046 = vrot.lane.b32.xlu1 %v6882_v16, %s3993_s12  ;;  %3805 = vmatprep.mubr.msk.bf16.mxu0 %vm2749_vm14, %v1420_v21  ;;  %v1290_v16 = vsel %vm1282_vm9, %v1257_v12, %v6883_v8  ;;  %v1734_v19 = vsel %vm4070_vm2, %v1729_v34, %v1733_v60  ;;  %v1736_v11 = vshrl.u32 %v5701_v6, 16  ;;  %v1739_v20 = vshll.u32 %v5701_v6, 16 }
 0x183   :  { %v1107_v10 = vpop.permute.xlu0 %1106  ;;  %v1323_v54 = vsel %vm1315_vm11, %v1290_v16, %v6884_v2  ;;  %v5694_v13 = vcombine.low %v1724_v4, %v1734_v19  ;;  %v3577_v21 = vrot.slane %v3938_v43, 9  ;;  %v712_v34 = vrot.slane %v710_v27, 4 }
 0x184   :  { %v5651_v41 = vpop.permute.xlu1 %2243  ;;  %v1356_v17 = vsel %vm1348_vm10, %v1323_v54, %v1072_v45  ;;  %v1738_v38 = vrot.slane %v1736_v11, 4  ;;  %v1741_v56 = vrot.slane %v1739_v20, 5  ;;  %v1755_v12 = vshll.u32 %v115_v28, 16 }
 0x185   :  { %2391 = vrot.lane.b32.xlu0 %v5566_v39, %s3994_s15  ;;  %v1389_v24 = vsel %vm1381_vm12, %v1356_v17, %v1107_v10  ;;  %v1747_v10 = vrot.slane %v1745_v62, 5  ;;  %v2491_v8 = vsel %vm1167_vm6, %v6889_v47, %v5639_v52  ;;  %v711_v2 = vsel %vm4466_vm5, %v3577_v21, %v710_v27  ;;  %v6892_v21 = vld [vmem:[#allocation18_spill] sm:$0xff] }
 0x186   :  { %2426 = vrot.lane.b32.xlu1 %v5581_v40, %s3995_s1  ;;  %v1742_v60 = vor.u32 %v1741_v56, %v1738_v38  ;;  %v714_v54 = vsel %vm4466_vm5, %v712_v34, %v713_v44  ;;  %v2534_v17 = vsel %vm1216_vm7, %v2491_v8, %v5651_v41  ;;  %v5770_v20 = vcombine.low %v5701_v6, %v5710_v32  ;;  %v6894_v44 = vld [vmem:[#allocation38_spill] sm:$0xff] }
 0x187   :  { %v5668_v0 = vpop.permute.xlu0 %2165  ;;  %v1752_v16 = vor.u32 %v1751_v33, %v1747_v10  ;;  %v5753_v4 = vcombine.low %v711_v2, %v714_v54  ;;  %v3645_v15 = vrot.slane %v5701_v6, 9  ;;  %v1967_v27 = vrot.slane %v1965_v50, 4  ;;  %v6897_v2 = vld [vmem:[#allocation75_spill] sm:$0xff] }
 0x188   :  { %v5673_v63 = vpop.permute.xlu1 %2245  ;;  %v1743_v51 = vrot.slane %v1742_v60, 4  ;;  %v1968_v38 = vrot.slane %v115_v28, 5  ;;  %v5814_v60 = vld [vmem:[%s6684_s0 + $0x178] sm:$0xf] }
 0x189   :  { %2393 = vrot.lane.b32.xlu0 %v5660_v61, %s3994_s15  ;;  %v1753_v23 = vrot.slane %v1752_v16, 4  ;;  %v1966_v34 = vsel %vm4466_vm5, %v3645_v15, %v1965_v50  ;;  %v6901_v15 = vld [vmem:[#allocation47_spill] sm:$0xff] }
 0x18a   :  { %1081 = vrot.lane.b32.xlu1 %v6885_v58, %s3994_s15  ;;  %v1748_v30 = vsel %vm4070_vm2, %v1743_v51, %v1747_v10  ;;  %v1182_v10 = vsel %vm1167_vm6, %v6894_v44, %v6893_v53  ;;  %v1769_v51 = vshll.u32 %v5814_v60, 16  ;;  %v6903_v44 = vld [vmem:[#allocation74_spill] sm:$0xff] }
 0x18b   :  { %v1142_v46 = vpop.permute.xlu0 %1141 }
 0x18c   :  { %v1422_v5 = vsel %vm1414_vm13, %v1389_v24, %v1142_v46  ;;  %v5689_v35 = vpop.permute.xlu1 %2280  ;;  %v6890_v46 = vld [vmem:[#allocation21_spill] sm:$0xff] }
 0x18d   :  { %1048 = vrot.lane.b32.xlu0 %v6886_v1, %s3993_s12  ;;  %3806 = vmatmul.mubr.msk.bf16.gmra.mrb[4].mxu0 %vm2749_vm14, %v1422_v5  ;;  %v1757_v5 = vrot.slane %v1755_v12, 5  ;;  %v6896_v12 = vld [vmem:[#allocation61_spill] sm:$0xff] }
 0x18e   :  { %2461 = vrot.lane.b32.xlu1 %v5613_v9, %s3996_s19 }
 0x18f   :  { %v2279_v55 = vpop.permute.xlu0 %2278  ;;  %v1758_v62 = vsel %vm4070_vm2, %v1753_v23, %v1757_v5 }
 0x190   :  { %v5712_v45 = vpop.permute.xlu1 %2315  ;;  %v2566_v19 = vsel %vm1249_vm8, %v2534_v17, %v2279_v55  ;;  %v5797_v6 = vcombine.low %v1748_v30, %v1758_v62  ;;  %v6899_v62 = vld [vmem:[#allocation9_spill] sm:$0xff] }
 0x191   :  { %2428 = vrot.lane.b32.xlu0 %v5694_v13, %s3995_s1 }
 0x192   :  { %1116 = vrot.lane.b32.xlu1 %v6887_v57, %s3995_s1 }
 0x193   :  { %v2314_v31 = vpop.permute.xlu0 %2313 }
 0x194   :  { %v2351_v49 = vpop.permute.xlu1 %2350  ;;  %v2598_v52 = vsel %vm1282_vm9, %v2566_v19, %v2314_v31  ;;  %v6898_v19 = vld [vmem:[#allocation89_spill] sm:$0xff] }
 0x195   :  { %1083 = vrot.lane.b32.xlu0 %v6888_v59, %s3994_s15 }
 0x196   :  { %2463 = vrot.lane.b32.xlu1 %v5720_v7, %s3996_s19 }
 0x197   :  { %v2349_v36 = vpop.permute.xlu0 %2348 }
 0x198   :  { %v2386_v18 = vpop.permute.xlu1 %2385  ;;  %v2630_v37 = vsel %vm1315_vm11, %v2598_v52, %v2349_v36 }
 0x199   :  { %2175 = vrot.lane.b32.xlu0 %v5581_v40, %s3989_s13 }
 0x19a   :  { %1151 = vrot.lane.b32.xlu1 %v6886_v1, %s3996_s19 }
 0x19b   :  { %v2384_v40 = vpop.permute.xlu0 %2383 }
 0x19c   :  { %v1074_v24 = vpop.permute.xlu1 %1073  ;;  %v2662_v41 = vsel %vm1348_vm10, %v2630_v37, %v2384_v40  ;;  %v1773_v37 = vshrl.u32 %v5814_v60, 16 }
 0x19d   :  { %1118 = vrot.lane.b32.xlu0 %v6890_v46, %s3995_s1 }
 0x19e   :  { %2255 = vrot.lane.b32.xlu1 %v5613_v9, %s3990_s10  ;;  %v6891_v9 = vld [vmem:[#allocation67_spill] sm:$0xff] }
 0x19f   :  { %v2419_v1 = vpop.permute.xlu0 %2418  ;;  %v2494_v57 = vsel %vm1167_vm6, %v6891_v9, %v5668_v0  ;;  %v1775_v9 = vrot.slane %v1773_v37, 4  ;;  %v6906_v37 = vld [vmem:[#allocation22_spill] sm:$0xff] }
 0x1a0   :  { %v2694_v55 = vsel %vm1381_vm12, %v2662_v41, %v2419_v1  ;;  %v2454_v29 = vpop.permute.xlu1 %2453  ;;  %v2536_v31 = vsel %vm1216_vm7, %v2494_v57, %v5673_v63  ;;  %v118_v57 = vld [vmem:[%s6684_s0 + $0x17c] sm:$0x1] }
 0x1a1   :  { %2177 = vrot.lane.b32.xlu0 %v5694_v13, %s3989_s13  ;;  %v2726_v11 = vsel %vm1414_vm13, %v2694_v55, %v2454_v29  ;;  %v2568_v0 = vsel %vm1249_vm8, %v2536_v31, %v5689_v35  ;;  %v5802_v35 = vld [vmem:[%s6684_s0 + $0x174] sm:$0xf] }
 0x1a2   :  { %2257 = vrot.lane.b32.xlu1 %v5720_v7, %s3990_s10  ;;  %3841 = vmatprep.mubr.msk.bf16.mxu1 %vm2749_vm14, %v2726_v11  ;;  %v2600_v43 = vsel %vm1282_vm9, %v2568_v0, %v5712_v45  ;;  %v6895_v45 = vld [vmem:[#allocation48_spill] sm:$0xff]  ;;  %v1760_v17 = vshrl.u32 %v5802_v35, 16  ;;  %v1763_v40 = vshll.u32 %v5802_v35, 16  ;;  %v1771_v11 = vrot.slane %v1769_v51, 5 }
 0x1a3   :  { %v2421_v32 = vpop.permute.xlu0 %2420  ;;  %v2632_v63 = vsel %vm1315_vm11, %v2600_v43, %v2351_v49  ;;  %v1226_v28 = vsel %vm1216_vm7, %v1182_v10, %v6895_v45  ;;  %v1969_v49 = vsel %vm4466_vm5, %v1967_v27, %v1968_v38  ;;  %v1779_v0 = vshll.u32 %v118_v57, 16 }
 0x1a4   :  { %v1109_v56 = vpop.permute.xlu1 %1108  ;;  %v2664_v33 = vsel %vm1348_vm10, %v2632_v63, %v2386_v18  ;;  %v1259_v47 = vsel %vm1249_vm8, %v1226_v28, %v6896_v12  ;;  %v5831_v46 = vcombine.low %v1966_v34, %v1969_v49  ;;  %v1762_v55 = vrot.slane %v1760_v17, 4 }
 0x1a5   :  { %1153 = vrot.lane.b32.xlu0 %v6892_v21, %s3996_s19  ;;  %v2696_v8 = vsel %vm1381_vm12, %v2664_v33, %v2421_v32  ;;  %v1292_v18 = vsel %vm1282_vm9, %v1259_v47, %v6897_v2  ;;  %v1765_v29 = vrot.slane %v1763_v40, 5  ;;  %v1776_v38 = vor.u32 %v1775_v9, %v1771_v11 }
 0x1a6   :  { %2292 = vrot.lane.b32.xlu1 %v5770_v20, %s3991_s11  ;;  %v1325_v52 = vsel %vm1315_vm11, %v1292_v18, %v6898_v19  ;;  %v1781_v49 = vrot.slane %v1779_v0, 5  ;;  %v1972_v12 = vrot.slane %v5814_v60, 5  ;;  %v6905_v18 = vld [vmem:[#allocation32_spill] sm:$0xff]  ;;  %v1975_v40 = vrot.slane %v118_v57, 5 }
 0x1a7   :  { %v1076_v36 = vpop.permute.xlu0 %1075  ;;  %v1358_v23 = vsel %vm1348_vm10, %v1325_v52, %v1074_v24  ;;  %v1766_v32 = vor.u32 %v1765_v29, %v1762_v55  ;;  %v1777_v34 = vrot.slane %v1776_v38, 4 }
 0x1a8   :  { %v2456_v16 = vpop.permute.xlu1 %2455  ;;  %v1391_v41 = vsel %vm1381_vm12, %v1358_v23, %v1109_v56  ;;  %v6902_v56 = vld [vmem:[#allocation59_spill] sm:$0xff]  ;;  %v1974_v17 = vrot.slane %v1972_v12, 4 }
 0x1a9   :  { %2290 = vrot.lane.b32.xlu0 %v5660_v61, %s3991_s11  ;;  %v2728_v54 = vsel %vm1414_vm13, %v2696_v8, %v2456_v16  ;;  %v1767_v28 = vrot.slane %v1766_v32, 4  ;;  %v6908_v32 = vld [vmem:[#allocation35_spill] sm:$0xff] }
 0x1aa   :  { %2327 = vrot.lane.b32.xlu1 %v5797_v6, %s3992_s17  ;;  %3842 = vmatmul.mubr.msk.bf16.gmra.mrb[8].mxu1 %vm2749_vm14, %v2728_v54  ;;  %v3646_v54 = vrot.slane %v5802_v35, 9 }
 0x1ab   :  { %v5836_v5 = vpop.permute.xlu0 %2167 }
 0x1ac   :  { %v1144_v1 = vpop.permute.xlu1 %1143  ;;  %v1973_v23 = vsel %vm4466_vm5, %v3646_v54, %v1972_v12 }
 0x1ad   :  { %2325 = vrot.lane.b32.xlu0 %v5694_v13, %s3992_s17  ;;  %v1424_v50 = vsel %vm1414_vm13, %v1391_v41, %v1144_v1  ;;  %v6900_v13 = vld [vmem:[#allocation40_spill] sm:$0xff]  ;;  %v1976_v41 = vsel %vm4466_vm5, %v1974_v17, %v1975_v40  ;;  %v5908_v1 = vld [vmem:[%s6684_s0 + $0x180] sm:$0xf] }
 0x1ae   :  { %2362 = vrot.lane.b32.xlu1 %v5831_v46, %s3993_s12  ;;  %3809 = vmatprep.mubr.msk.bf16.mxu0 %vm2749_vm14, %v1424_v50  ;;  %v1185_v31 = vsel %vm1167_vm6, %v6900_v13, %v6899_v62  ;;  %v5913_v50 = vld [vmem:[%s6684_s0 + $0x184] sm:$0xf]  ;;  %v5917_v29 = vcombine.low %v1973_v23, %v1976_v41  ;;  %v1784_v9 = vshrl.u32 %v5908_v1, 16 }
 0x1af   :  { %v1111_v24 = vpop.permute.xlu0 %1110  ;;  %v1228_v27 = vsel %vm1216_vm7, %v1185_v31, %v6901_v15  ;;  %v1797_v57 = vshrl.u32 %v5913_v50, 16  ;;  %v1793_v62 = vshll.u32 %v5913_v50, 16  ;;  %v1979_v17 = vrot.slane %v5913_v50, 5 }
 0x1b0   :  { %v5848_v30 = vpop.permute.xlu1 %2247  ;;  %v1261_v43 = vsel %vm1249_vm8, %v1228_v27, %v6902_v56  ;;  %v1786_v15 = vrot.slane %v1784_v9, 4  ;;  %v3647_v9 = vrot.slane %v5908_v1, 9 }
 0x1b1   :  { %2360 = vrot.lane.b32.xlu0 %v5720_v7, %s3993_s12  ;;  %v1294_v10 = vsel %vm1282_vm9, %v1261_v43, %v6903_v44  ;;  %v6904_v7 = vld [vmem:[#allocation88_spill] sm:$0xff]  ;;  %v1795_v38 = vrot.slane %v1793_v62, 5  ;;  %v1799_v0 = vrot.slane %v1797_v57, 4  ;;  %v121_v43 = vld [vmem:[%s6684_s0 + $0x188] sm:$0x1] }
 0x1b2   :  { %1050 = vrot.lane.b32.xlu1 %v6892_v21, %s3993_s12  ;;  %v1327_v45 = vsel %vm1315_vm11, %v1294_v10, %v6904_v7  ;;  %v5873_v21 = vcombine.low %v5802_v35, %v5814_v60  ;;  %v1782_v60 = vsel %vm4070_vm2, %v1777_v34, %v1781_v49  ;;  %v6909_v10 = vld [vmem:[#allocation81_spill] sm:$0xff]  ;;  %v1982_v57 = vrot.slane %v121_v43, 5 }
 0x1b3   :  { %v5861_v53 = vpop.permute.xlu0 %2169  ;;  %v1360_v33 = vsel %vm1348_vm10, %v1327_v45, %v1076_v36  ;;  %v1772_v36 = vsel %vm4070_vm2, %v1767_v28, %v1771_v11  ;;  %v6907_v11 = vld [vmem:[#allocation27_spill] sm:$0xff]  ;;  %v2497_v7 = vsel %vm1167_vm6, %v6909_v10, %v5836_v5  ;;  %v1800_v28 = vor.u32 %v1799_v0, %v1795_v38  ;;  %v6004_v10 = vld [vmem:[%s6684_s0 + $0x190] sm:$0xf] }
 0x1b4   :  { %v5865_v63 = vpop.permute.xlu1 %2249  ;;  %v1393_v47 = vsel %vm1381_vm12, %v1360_v33, %v1111_v24  ;;  %v5897_v51 = vcombine.low %v1772_v36, %v1782_v60  ;;  %v1787_v24 = vshll.u32 %v5908_v1, 16  ;;  %v1803_v33 = vshll.u32 %v121_v43, 16 }
 0x1b5   :  { %2395 = vrot.lane.b32.xlu0 %v5770_v20, %s3994_s15  ;;  %v2538_v34 = vsel %vm1216_vm7, %v2497_v7, %v5848_v30  ;;  %v1801_v36 = vrot.slane %v1800_v28, 4  ;;  %v2500_v23 = vsel %vm1167_vm6, %v5291_v3, %v5861_v53  ;;  %v6915_v7 = vld [vmem:[#allocation63_spill] sm:$0xff] }
 0x1b6   :  { %2430 = vrot.lane.b32.xlu1 %v5797_v6, %s3995_s1  ;;  %v1789_v27 = vrot.slane %v1787_v24, 5  ;;  %v1805_v60 = vrot.slane %v1803_v33, 5  ;;  %v1981_v24 = vrot.slane %v1979_v17, 4 }
 0x1b7   :  { %v1146_v8 = vpop.permute.xlu0 %1145 }
 0x1b8   :  { %v1426_v16 = vsel %vm1414_vm13, %v1393_v47, %v1146_v8  ;;  %v5881_v2 = vpop.permute.xlu1 %2284  ;;  %v1790_v45 = vor.u32 %v1789_v27, %v1786_v15  ;;  %v6912_v15 = vld [vmem:[#allocation15_spill] sm:$0xff] }
 0x1b9   :  { %2397 = vrot.lane.b32.xlu0 %v5873_v21, %s3994_s15  ;;  %3810 = vmatmul.mubr.msk.bf16.gmra.mrb[8].mxu0 %vm2749_vm14, %v1426_v16  ;;  %v6913_v27 = vld [vmem:[#allocation39_spill] sm:$0xff] }
 0x1ba   :  { %1085 = vrot.lane.b32.xlu1 %v6905_v18, %s3994_s15  ;;  %v1791_v16 = vrot.slane %v1790_v45, 4 }
 0x1bb   :  { %v2283_v19 = vpop.permute.xlu0 %2282 }
 0x1bc   :  { %v5893_v52 = vpop.permute.xlu1 %2319  ;;  %v2570_v12 = vsel %vm1249_vm8, %v2538_v34, %v2283_v19  ;;  %v1796_v41 = vsel %vm4070_vm2, %v1791_v16, %v1795_v38  ;;  %v1188_v38 = vsel %vm1167_vm6, %v6913_v27, %v6912_v15  ;;  %v6916_v34 = vld [vmem:[#allocation77_spill] sm:$0xff]  ;;  %v6920_v27 = vld [vmem:[#allocation62_spill] sm:$0xff] }
 0x1bd   :  { %1052 = vrot.lane.b32.xlu0 %v6906_v37, %s3993_s12 }
 0x1be   :  { %2465 = vrot.lane.b32.xlu1 %v5831_v46, %s3996_s19 }
 0x1bf   :  { %v2318_v35 = vpop.permute.xlu0 %2317 }
 0x1c0   :  { %v2355_v55 = vpop.permute.xlu1 %2354  ;;  %v2602_v8 = vsel %vm1282_vm9, %v2570_v12, %v2318_v35  ;;  %v1806_v35 = vsel %vm4070_vm2, %v1801_v36, %v1805_v60  ;;  %v1821_v36 = vshrl.u32 %v6004_v10, 16  ;;  %v1817_v60 = vshll.u32 %v6004_v10, 16 }
 0x1c1   :  { %2432 = vrot.lane.b32.xlu0 %v5897_v51, %s3995_s1 }
 0x1c2   :  { %1120 = vrot.lane.b32.xlu1 %v6907_v11, %s3995_s1  ;;  %v2540_v11 = vsel %vm1216_vm7, %v2500_v23, %v5865_v63 }
 0x1c3   :  { %v2353_v13 = vpop.permute.xlu0 %2352  ;;  %v2572_v3 = vsel %vm1249_vm8, %v2540_v11, %v5881_v2  ;;  %v5992_v2 = vld [vmem:[%s6684_s0 + $0x18c] sm:$0xf]  ;;  %v124_v11 = vld [vmem:[%s6684_s0 + $0x194] sm:$0x1] }
 0x1c4   :  { %v5925_v31 = vpop.permute.xlu1 %1042  ;;  %v2634_v5 = vsel %vm1315_vm11, %v2602_v8, %v2353_v13  ;;  %v2604_v62 = vsel %vm1282_vm9, %v2572_v3, %v5893_v52  ;;  %v6911_v13 = vld [vmem:[#allocation20_spill] sm:$0xff]  ;;  %v6914_v52 = vld [vmem:[#allocation50_spill] sm:$0xff]  ;;  %v1808_v8 = vshrl.u32 %v5992_v2, 16  ;;  %v6919_v3 = vld [vmem:[#allocation49_spill] sm:$0xff]  ;;  %v1827_v15 = vshll.u32 %v124_v11, 16 }
 0x1c5   :  { %1087 = vrot.lane.b32.xlu0 %v6908_v32, %s3994_s15  ;;  %v2636_v63 = vsel %vm1315_vm11, %v2604_v62, %v2355_v55  ;;  %v1230_v0 = vsel %vm1216_vm7, %v1188_v38, %v6914_v52  ;;  %v1983_v55 = vsel %vm4466_vm5, %v1981_v24, %v1982_v57  ;;  %v6921_v52 = vld [vmem:[#allocation76_spill] sm:$0xff] }
 0x1c6   :  { %2467 = vrot.lane.b32.xlu1 %v5917_v29, %s3996_s19  ;;  %v1263_v45 = vsel %vm1249_vm8, %v1230_v0, %v6915_v7 }
 0x1c7   :  { %v2388_v56 = vpop.permute.xlu0 %2387 }
 0x1c8   :  { %v2423_v44 = vpop.permute.xlu1 %2422  ;;  %v2666_v54 = vsel %vm1348_vm10, %v2634_v5, %v2388_v56 }
 0x1c9   :  { %2179 = vrot.lane.b32.xlu0 %v5797_v6, %s3989_s13  ;;  %v6910_v6 = vld [vmem:[#allocation26_spill] sm:$0xff]  ;;  %v2698_v40 = vsel %vm1381_vm12, %v2666_v54, %v2423_v44  ;;  %v1980_v44 = vsel %vm4466_vm5, %v3647_v9, %v1979_v17  ;;  %v6917_v9 = vld [vmem:[#allocation13_spill] sm:$0xff] }
 0x1ca   :  { %1155 = vrot.lane.b32.xlu1 %v6906_v37, %s3996_s19  ;;  %v6021_v16 = vcombine.low %v1980_v44, %v1983_v55 }
 0x1cb   :  { %v2390_v49 = vpop.permute.xlu0 %2389 }
 0x1cc   :  { %v1078_v47 = vpop.permute.xlu1 %1077  ;;  %v2668_v56 = vsel %vm1348_vm10, %v2636_v63, %v2390_v49  ;;  %v1296_v49 = vsel %vm1282_vm9, %v1263_v45, %v6916_v34  ;;  %v1829_v45 = vrot.slane %v1827_v15, 5 }
 0x1cd   :  { %1122 = vrot.lane.b32.xlu0 %v6910_v6, %s3995_s1  ;;  %v1811_v6 = vshll.u32 %v5992_v2, 16  ;;  %v1329_v5 = vsel %vm1315_vm11, %v1296_v49, %v5925_v31 }
 0x1ce   :  { %2259 = vrot.lane.b32.xlu1 %v5831_v46, %s3990_s10  ;;  %v5960_v46 = vcombine.low %v5908_v1, %v5913_v50  ;;  %v5987_v1 = vcombine.low %v1796_v41, %v1806_v35  ;;  %v1362_v54 = vsel %vm1348_vm10, %v1329_v5, %v1078_v47  ;;  %v1819_v41 = vrot.slane %v1817_v60, 5 }
 0x1cf   :  { %v5951_v30 = vpop.permute.xlu0 %1044  ;;  %v1813_v23 = vrot.slane %v1811_v6, 5  ;;  %v1823_v35 = vrot.slane %v1821_v36, 4  ;;  %v1989_v5 = vrot.slane %v124_v11, 5 }
 0x1d0   :  { %v2458_v19 = vpop.permute.xlu1 %2457 }
 0x1d1   :  { %2181 = vrot.lane.b32.xlu0 %v5897_v51, %s3989_s13  ;;  %v2730_v37 = vsel %vm1414_vm13, %v2698_v40, %v2458_v19  ;;  %v1824_v62 = vor.u32 %v1823_v35, %v1819_v41 }
 0x1d2   :  { %2261 = vrot.lane.b32.xlu1 %v5917_v29, %s3990_s10  ;;  %3845 = vmatprep.mubr.msk.bf16.mxu1 %vm2749_vm14, %v2730_v37  ;;  %v1810_v37 = vrot.slane %v1808_v8, 4  ;;  %v3648_v8 = vrot.slane %v5992_v2, 9 }
 0x1d3   :  { %v2425_v50 = vpop.permute.xlu0 %2424  ;;  %v1825_v7 = vrot.slane %v1824_v62, 4 }
 0x1d4   :  { %v1113_v53 = vpop.permute.xlu1 %1112  ;;  %v2700_v28 = vsel %vm1381_vm12, %v2668_v56, %v2425_v50  ;;  %v1814_v57 = vor.u32 %v1813_v23, %v1810_v37  ;;  %v6098_v37 = vld [vmem:[%s6684_s0 + $0x198] sm:$0xf]  ;;  %v6103_v23 = vld [vmem:[%s6684_s0 + $0x19c] sm:$0xf] }
 0x1d5   :  { %1157 = vrot.lane.b32.xlu0 %v6911_v13, %s3996_s19  ;;  %v1395_v40 = vsel %vm1381_vm12, %v1362_v54, %v1113_v53  ;;  %v6923_v54 = vld [vmem:[#allocation37_spill] sm:$0xff]  ;;  %v1992_v11 = vshrl.u32 %v6098_v37, 16 }
 0x1d6   :  { %2296 = vrot.lane.b32.xlu1 %v5960_v46, %s3991_s11  ;;  %v1815_v44 = vrot.slane %v1814_v57, 4 }
 0x1d7   :  { %v1080_v43 = vpop.permute.xlu0 %1079  ;;  %v1994_v62 = vrot.slane %v1992_v11, 4 }
 0x1d8   :  { %v2460_v33 = vpop.permute.xlu1 %2459 }
 0x1d9   :  { %2294 = vrot.lane.b32.xlu0 %v5873_v21, %s3991_s11  ;;  %v2732_v12 = vsel %vm1414_vm13, %v2700_v28, %v2460_v33  ;;  %v1986_v28 = vrot.slane %v6004_v10, 5 }
 0x1da   :  { %2331 = vrot.lane.b32.xlu1 %v5987_v1, %s3992_s17  ;;  %3846 = vmatmul.mubr.msk.bf16.gmra.mrb[12].mxu1 %vm2749_vm14, %v2732_v12  ;;  %v6922_v12 = vld [vmem:[#allocation34_spill] sm:$0xff] }
 0x1db   :  { %v6026_v17 = vpop.permute.xlu0 %2171  ;;  %v1988_v6 = vrot.slane %v1986_v28, 4 }
 0x1dc   :  { %v1148_v19 = vpop.permute.xlu1 %1147 }
 0x1dd   :  { %2329 = vrot.lane.b32.xlu0 %v5897_v51, %s3992_s17  ;;  %v1428_v31 = vsel %vm1414_vm13, %v1395_v40, %v1148_v19  ;;  %v6918_v51 = vld [vmem:[#allocation41_spill] sm:$0xff]  ;;  %v1987_v19 = vsel %vm4466_vm5, %v3648_v8, %v1986_v28 }
 0x1de   :  { %2366 = vrot.lane.b32.xlu1 %v6021_v16, %s3993_s12  ;;  %3813 = vmatprep.mubr.msk.bf16.mxu0 %vm2749_vm14, %v1428_v31  ;;  %v1191_v24 = vsel %vm1167_vm6, %v6918_v51, %v6917_v9  ;;  %v1990_v31 = vsel %vm4466_vm5, %v1988_v6, %v1989_v5  ;;  %v1995_v9 = vshll.u32 %v6098_v37, 16  ;;  %v2005_v51 = vshrl.u32 %v6103_v23, 16 }
 0x1df   :  { %v1115_v47 = vpop.permute.xlu0 %1114  ;;  %v1232_v53 = vsel %vm1216_vm7, %v1191_v24, %v6919_v3  ;;  %v6107_v35 = vcombine.low %v1987_v19, %v1990_v31  ;;  %v2001_v24 = vshll.u32 %v6103_v23, 16  ;;  %v2020_v5 = vrot.slane %v6103_v23, 5 }
 0x1e0   :  { %v6038_v50 = vpop.permute.xlu1 %2251  ;;  %v1265_v38 = vsel %vm1249_vm8, %v1232_v53, %v6920_v27  ;;  %v6925_v53 = vld [vmem:[#allocation36_spill] sm:$0xff]  ;;  %v1997_v15 = vrot.slane %v1995_v9, 5  ;;  %v3649_v9 = vrot.slane %v6098_v37, 9 }
 0x1e1   :  { %2364 = vrot.lane.b32.xlu0 %v5917_v29, %s3993_s12  ;;  %v1298_v0 = vsel %vm1282_vm9, %v1265_v38, %v6921_v52  ;;  %v2003_v27 = vrot.slane %v2001_v24, 5  ;;  %v2007_v38 = vrot.slane %v2005_v51, 4  ;;  %v2022_v51 = vrot.slane %v2020_v5, 4 }
 0x1e2   :  { %1054 = vrot.lane.b32.xlu1 %v6911_v13, %s3993_s12  ;;  %v1331_v29 = vsel %vm1315_vm11, %v1298_v0, %v5951_v30  ;;  %v6063_v13 = vcombine.low %v5992_v2, %v6004_v10  ;;  %v1830_v10 = vsel %vm4070_vm2, %v1825_v7, %v1829_v45  ;;  %v127_v0 = vld [vmem:[%s6684_s0 + $0x1a0] sm:$0x1] }
 0x1e3   :  { %v6051_v63 = vpop.permute.xlu0 %2173  ;;  %v1364_v55 = vsel %vm1348_vm10, %v1331_v29, %v1080_v43  ;;  %v1820_v43 = vsel %vm4070_vm2, %v1815_v44, %v1819_v41  ;;  %v2503_v44 = vsel %vm1167_vm6, %v5371_v14, %v6026_v17  ;;  %v2008_v7 = vor.u32 %v2007_v38, %v2003_v27 }
 0x1e4   :  { %v6055_v56 = vpop.permute.xlu1 %2253  ;;  %v1397_v33 = vsel %vm1381_vm12, %v1364_v55, %v1115_v47  ;;  %v6087_v40 = vcombine.low %v1820_v43, %v1830_v10  ;;  %v6924_v47 = vld [vmem:[#allocation29_spill] sm:$0xff]  ;;  %v1998_v55 = vor.u32 %v1997_v15, %v1994_v62  ;;  %v2011_v45 = vshll.u32 %v127_v0, 16  ;;  %v6927_v62 = vld [vmem:[#allocation24_spill] sm:$0xff] }
 0x1e5   :  { %2399 = vrot.lane.b32.xlu0 %v5960_v46, %s3994_s15  ;;  %v2542_v28 = vsel %vm1216_vm7, %v2503_v44, %v6038_v50  ;;  %v2009_v10 = vrot.slane %v2008_v7, 4  ;;  %v2506_v31 = vsel %vm1167_vm6, %v5473_v25, %v6051_v63  ;;  %v2023_v24 = vrot.slane %v127_v0, 5  ;;  %v6928_v15 = vld [vmem:[#allocation17_spill] sm:$0xff] }
 0x1e6   :  { %2434 = vrot.lane.b32.xlu1 %v5987_v1, %s3995_s1  ;;  %v1999_v17 = vrot.slane %v1998_v55, 4  ;;  %v2013_v8 = vrot.slane %v2011_v45, 5  ;;  %v2544_v11 = vsel %vm1216_vm7, %v2506_v31, %v6055_v56  ;;  %v6930_v44 = vld [vmem:[#allocation65_spill] sm:$0xff] }
 0x1e7   :  { %v1150_v30 = vpop.permute.xlu0 %1149 }
 0x1e8   :  { %v1430_v34 = vsel %vm1414_vm13, %v1397_v33, %v1150_v30  ;;  %v6071_v49 = vpop.permute.xlu1 %2288 }
 0x1e9   :  { %2401 = vrot.lane.b32.xlu0 %v6063_v13, %s3994_s15  ;;  %3814 = vmatmul.mubr.msk.bf16.gmra.mrb[12].mxu0 %vm2749_vm14, %v1430_v34  ;;  %v2576_v25 = vsel %vm1249_vm8, %v2544_v11, %v6071_v49  ;;  %v6182_v49 = vld [vmem:[%s6684_s0 + $0x1a4] sm:$0xf] }
 0x1ea   :  { %1089 = vrot.lane.b32.xlu1 %v6922_v12, %s3994_s15 }
 0x1eb   :  { %v2287_v36 = vpop.permute.xlu0 %2286 }
 0x1ec   :  { %v6083_v60 = vpop.permute.xlu1 %2323  ;;  %v2574_v30 = vsel %vm1249_vm8, %v2542_v28, %v2287_v36  ;;  %v6931_v28 = vld [vmem:[#allocation79_spill] sm:$0xff] }
 0x1ed   :  { %1056 = vrot.lane.b32.xlu0 %v6923_v54, %s3993_s12 }
 0x1ee   :  { %2469 = vrot.lane.b32.xlu1 %v6021_v16, %s3996_s19 }
 0x1ef   :  { %v2322_v2 = vpop.permute.xlu0 %2321 }
 0x1f0   :  { %v2359_v41 = vpop.permute.xlu1 %2358  ;;  %v2606_v43 = vsel %vm1282_vm9, %v2574_v30, %v2322_v2  ;;  %v2004_v2 = vsel %vm4070_vm2, %v1999_v17, %v2003_v27  ;;  %v1194_v27 = vsel %vm1167_vm6, %v4636_v42, %v6928_v15  ;;  %v2021_v42 = vsel %vm4466_vm5, %v3649_v9, %v2020_v5 }
 0x1f1   :  { %2436 = vrot.lane.b32.xlu0 %v6087_v40, %s3995_s1 }
 0x1f2   :  { %1124 = vrot.lane.b32.xlu1 %v6924_v47, %s3995_s1  ;;  %v2014_v47 = vsel %vm4070_vm2, %v2009_v10, %v2013_v8 }
 0x1f3   :  { %v2357_v57 = vpop.permute.xlu0 %2356 }
 0x1f4   :  { %v6115_v3 = vpop.permute.xlu1 %1046  ;;  %v2638_v14 = vsel %vm1315_vm11, %v2606_v43, %v2357_v57  ;;  %v2608_v57 = vsel %vm1282_vm9, %v2576_v25, %v6083_v60  ;;  %v6929_v60 = vld [vmem:[#allocation52_spill] sm:$0xff]  ;;  %v2026_v43 = vshrl.u32 %v6182_v49, 16 }
 0x1f5   :  { %1091 = vrot.lane.b32.xlu0 %v6925_v53, %s3994_s15  ;;  %v2640_v56 = vsel %vm1315_vm11, %v2608_v57, %v2359_v41  ;;  %v1234_v38 = vsel %vm1216_vm7, %v1194_v27, %v6929_v60  ;;  %v2024_v41 = vsel %vm4466_vm5, %v2022_v51, %v2023_v24  ;;  %v6932_v57 = vld [vmem:[#allocation12_spill] sm:$0xff]  ;;  %v6933_v60 = vld [vmem:[#allocation51_spill] sm:$0xff] }
 0x1f6   :  { %2471 = vrot.lane.b32.xlu1 %v6107_v35, %s3996_s19  ;;  %v1267_v55 = vsel %vm1249_vm8, %v1234_v38, %v6930_v44  ;;  %v6211_v17 = vcombine.low %v2021_v42, %v2024_v41  ;;  %v2028_v31 = vrot.slane %v2026_v43, 4  ;;  %v1197_v15 = vsel %vm1167_vm6, %v4726_v26, %v6932_v57  ;;  %v6934_v44 = vld [vmem:[#allocation64_spill] sm:$0xff] }
 0x1f7   :  { %v2392_v52 = vpop.permute.xlu0 %2391  ;;  %v1236_v38 = vsel %vm1216_vm7, %v1197_v15, %v6933_v60 }
 0x1f8   :  { %v2427_v29 = vpop.permute.xlu1 %2426  ;;  %v2670_v6 = vsel %vm1348_vm10, %v2638_v14, %v2392_v52 }
 0x1f9   :  { %2183 = vrot.lane.b32.xlu0 %v5987_v1, %s3989_s13  ;;  %v6926_v1 = vld [vmem:[#allocation28_spill] sm:$0xff]  ;;  %v2702_v36 = vsel %vm1381_vm12, %v2670_v6, %v2427_v29  ;;  %v6194_v29 = vld [vmem:[%s6684_s0 + $0x1a8] sm:$0xf] }
 0x1fa   :  { %1159 = vrot.lane.b32.xlu1 %v6923_v54, %s3996_s19  ;;  %v2039_v10 = vshrl.u32 %v6194_v29, 16  ;;  %v2035_v8 = vshll.u32 %v6194_v29, 16  ;;  %v3702_v43 = vcombine.low %v6182_v49, %v6194_v29 }
 0x1fb   :  { %v2394_v33 = vpop.permute.xlu0 %2393 }
 0x1fc   :  { %v1082_v34 = vpop.permute.xlu1 %1081  ;;  %v2672_v52 = vsel %vm1348_vm10, %v2640_v56, %v2394_v33  ;;  %v1300_v33 = vsel %vm1282_vm9, %v1267_v55, %v6931_v28  ;;  %v2037_v11 = vrot.slane %v2035_v8, 5  ;;  %v1269_v55 = vsel %vm1249_vm8, %v1236_v38, %v6934_v44 }
 0x1fd   :  { %1126 = vrot.lane.b32.xlu0 %v6926_v1, %s3995_s1  ;;  %v2029_v1 = vshll.u32 %v6182_v49, 16  ;;  %v1333_v14 = vsel %vm1315_vm11, %v1300_v33, %v6115_v3 }
 0x1fe   :  { %2263 = vrot.lane.b32.xlu1 %v6021_v16, %s3990_s10  ;;  %v6150_v16 = vcombine.low %v6098_v37, %v6103_v23  ;;  %v6177_v37 = vcombine.low %v2004_v2, %v2014_v47  ;;  %v1366_v6 = vsel %vm1348_vm10, %v1333_v14, %v1082_v34  ;;  %v6238_v47 = vld [vmem:[%s6684_s0 + $0x1ac] sm:$0x1] }
 0x1ff   :  { %v6141_v50 = vpop.permute.xlu0 %1048  ;;  %v2031_v2 = vrot.slane %v2029_v1, 5  ;;  %v2045_v56 = vshll.u32 %v6238_v47, 16 }
 0x200   :  { %v2462_v54 = vpop.permute.xlu1 %2461 }
 0x201   :  { %2185 = vrot.lane.b32.xlu0 %v6087_v40, %s3989_s13  ;;  %v2734_v19 = vsel %vm1414_vm13, %v2702_v36, %v2462_v54  ;;  %v6221_v36 = vld [vmem:[%s6684_s0 + $0xcc] sm:$0xf]  ;;  %v2032_v27 = vor.u32 %v2031_v2, %v2028_v31  ;;  %v2047_v14 = vrot.slane %v2045_v56, 5  ;;  %v3650_v56 = vrot.slane %v6182_v49, 9 }
 0x202   :  { %2265 = vrot.lane.b32.xlu1 %v6107_v35, %s3990_s10  ;;  %3849 = vmatprep.mubr.msk.bf16.mxu1 %vm2749_vm14, %v2734_v19  ;;  %v6227_v19 = vld [vmem:[%s6684_s0 + $0xd0] sm:$0xf]  ;;  %v716_v9 = vshrl.u32 %v6221_v36, 16  ;;  %v3578_v44 = vrot.slane %v6221_v36, 9 }
 0x203   :  { %v2429_v23 = vpop.permute.xlu0 %2428  ;;  %v729_v24 = vshrl.u32 %v6227_v19, 16  ;;  %v725_v25 = vshll.u32 %v6227_v19, 16  ;;  %v2033_v1 = vrot.slane %v2032_v27, 4  ;;  %v744_v15 = vrot.slane %v6227_v19, 5 }
 0x204   :  { %v1117_v63 = vpop.permute.xlu1 %1116  ;;  %v2704_v7 = vsel %vm1381_vm12, %v2672_v52, %v2429_v23  ;;  %v2041_v23 = vrot.slane %v2039_v10, 4  ;;  %v718_v42 = vrot.slane %v716_v9, 4 }
 0x205   :  { %1161 = vrot.lane.b32.xlu0 %v6927_v62, %s3996_s19  ;;  %v1399_v3 = vsel %vm1381_vm12, %v1366_v6, %v1117_v63  ;;  %v727_v26 = vrot.slane %v725_v25, 5  ;;  %v3233_v6 = vlaneseq }
 0x206   :  { %2300 = vrot.lane.b32.xlu1 %v6150_v16, %s3991_s11  ;;  %v2042_v52 = vor.u32 %v2041_v23, %v2037_v11 }
 0x207   :  { %v1084_v0 = vpop.permute.xlu0 %1083  ;;  %v6288_v9 = vshrl.u32 %v3233_v6, 7 }
 0x208   :  { %v2464_v45 = vpop.permute.xlu1 %2463  ;;  %v2043_v8 = vrot.slane %v2042_v52, 4  ;;  %v2057_v52 = vrot.slane %v6238_v47, 5 }
 0x209   :  { %2298 = vrot.lane.b32.xlu0 %v6063_v13, %s3991_s11  ;;  %v2736_v30 = vsel %vm1414_vm13, %v2704_v7, %v2464_v45  ;;  %v731_v45 = vrot.slane %v729_v24, 4  ;;  %v3235_v60 = vsub.s32 0, %v6288_v9  ;;  %v3303_v47 = vsub.s32 1, %v6288_v9 }
 0x20a   :  { %2335 = vrot.lane.b32.xlu1 %v6177_v37, %s3992_s17  ;;  %3850 = vmatmul.mubr.msk.bf16.gmra.mrb[16].mxu1 %vm2749_vm14, %v2736_v30  ;;  %v76_v30 = vld [vmem:[%s6684_s0 + $0xd4] sm:$0x1]  ;;  %v2048_v23 = vsel %vm4070_vm2, %v2043_v8, %v2047_v14 }
 0x20b   :  { %v6216_v5 = vpop.permute.xlu0 %2175  ;;  %v735_v31 = vshll.u32 %v76_v30, 16 }
 0x20c   :  { %v1152_v54 = vpop.permute.xlu1 %1151 }
 0x20d   :  { %2333 = vrot.lane.b32.xlu0 %v6087_v40, %s3992_s17  ;;  %v1432_v34 = vsel %vm1414_vm13, %v1399_v3, %v1152_v54  ;;  %v719_v40 = vshll.u32 %v6221_v36, 16  ;;  %v737_v57 = vrot.slane %v735_v31, 5 }
 0x20e   :  { %2370 = vrot.lane.b32.xlu1 %v6211_v17, %s3993_s12  ;;  %3817 = vmatprep.mubr.msk.bf16.mxu0 %vm2749_vm14, %v1432_v34 }
 0x20f   :  { %v1119_v51 = vpop.permute.xlu0 %1118  ;;  %v721_v41 = vrot.slane %v719_v40, 5 }
 0x210   :  { %v6244_v63 = vpop.permute.xlu1 %2255 }
 0x211   :  { %2368 = vrot.lane.b32.xlu0 %v6107_v35, %s3993_s12  ;;  %v6935_v35 = vld [vmem:[#allocation78_spill] sm:$0xff]  ;;  %v722_v3 = vor.u32 %v721_v41, %v718_v42 }
 0x212   :  { %1058 = vrot.lane.b32.xlu1 %v6927_v62, %s3993_s12  ;;  %v1302_v28 = vsel %vm1282_vm9, %v1269_v55, %v6935_v35  ;;  %v746_v55 = vrot.slane %v744_v15, 4 }
 0x213   :  { %v6258_v7 = vpop.permute.xlu0 %2177  ;;  %v1335_v62 = vsel %vm1315_vm11, %v1302_v28, %v6141_v50  ;;  %v732_v50 = vor.u32 %v731_v45, %v727_v26  ;;  %v723_v40 = vrot.slane %v722_v3, 4  ;;  %v747_v45 = vrot.slane %v76_v30, 5 }
 0x214   :  { %v6262_v33 = vpop.permute.xlu1 %2257  ;;  %v1368_v10 = vsel %vm1348_vm10, %v1335_v62, %v1084_v0  ;;  %v2038_v0 = vsel %vm4070_vm2, %v2033_v1, %v2037_v11  ;;  %v745_v1 = vsel %vm4466_vm5, %v3578_v44, %v744_v15 }
 0x215   :  { %2403 = vrot.lane.b32.xlu0 %v6150_v16, %s3994_s15  ;;  %v1401_v54 = vsel %vm1381_vm12, %v1368_v10, %v1119_v51  ;;  %v2054_v51 = vrot.slane %v6194_v29, 5  ;;  %v733_v25 = vrot.slane %v732_v50, 4  ;;  %v3703_v11 = vcombine.low %v2038_v0, %v2048_v23 }
 0x216   :  { %2438 = vrot.lane.b32.xlu1 %v6177_v37, %s3995_s1  ;;  %v6936_v37 = vld [vmem:[#allocation42_spill] sm:$0xff]  ;;  %v728_v29 = vsel %vm4070_vm2, %v723_v40, %v727_v26  ;;  %v3630_v26 = vcombine.low %v6221_v36, %v6227_v19  ;;  %v748_v36 = vsel %vm4466_vm5, %v746_v55, %v747_v45  ;;  %v2509_v40 = vsel %vm1167_vm6, %v5566_v39, %v6216_v5 }
 0x217   :  { %v1154_v34 = vpop.permute.xlu0 %1153  ;;  %v2056_v38 = vrot.slane %v2054_v51, 4  ;;  %v738_v41 = vsel %vm4070_vm2, %v733_v25, %v737_v57  ;;  %v2055_v28 = vsel %vm4466_vm5, %v3650_v56, %v2054_v51  ;;  %v3632_v3 = vcombine.low %v745_v1, %v748_v36  ;;  %v6939_v36 = vld [vmem:[#allocation54_spill] sm:$0xff] }
 0x218   :  { %v1434_v16 = vsel %vm1414_vm13, %v1401_v54, %v1154_v34  ;;  %v6278_v2 = vpop.permute.xlu1 %2292  ;;  %v3631_v35 = vcombine.low %v728_v29, %v738_v41  ;;  %v2546_v51 = vsel %vm1216_vm7, %v2509_v40, %v6244_v63 }
 0x219   :  { %2405 = vrot.lane.b32.xlu0 %v3702_v43, %s3994_s15  ;;  %3818 = vmatmul.mubr.msk.bf16.gmra.mrb[16].mxu0 %vm2749_vm14, %v1434_v16  ;;  %v2058_v30 = vsel %vm4466_vm5, %v2056_v38, %v2057_v52 }
 0x21a   :  { %1093 = vrot.lane.b32.xlu1 %v6936_v37, %s3994_s15  ;;  %v3704_v8 = vcombine.low %v2055_v28, %v2058_v30 }
 0x21b   :  { %v2291_v24 = vpop.permute.xlu0 %2290 }
 0x21c   :  { %v6292_v27 = vpop.permute.xlu1 %2327 }
 0x21d   :  { %1060 = vrot.lane.b32.xlu0 %v5753_v4, %s3993_s12 }
 0x21e   :  { %2473 = vrot.lane.b32.xlu1 %v6211_v17, %s3996_s19  ;;  %v3232_v17 = vld [vmem:[%s6686_s2] sm:$0xf] }
 0x21f   :  { %v2326_v42 = vpop.permute.xlu0 %2325  ;;  %v6321_v43 = vrot.slane %v3232_v17, %v3235_v60  ;;  %v6330_v10 = vrot.slane %v3232_v17, %v3303_v47 }
 0x220   :  { %v6306_v49 = vpop.permute.xlu1 %2362 }
 0x221   :  { %2440 = vrot.lane.b32.xlu0 %v3703_v11, %s3995_s1  ;;  %v2578_v11 = vsel %vm1249_vm8, %v2546_v51, %v2291_v24 }
 0x222   :  { %1128 = vrot.lane.b32.xlu1 %v6937_v22, %s3995_s1  ;;  %v2610_v60 = vsel %vm1282_vm9, %v2578_v11, %v2326_v42 }
 0x223   :  { %v2361_v62 = vpop.permute.xlu0 %2360 }
 0x224   :  { %v6327_v19 = vpop.permute.xlu1 %1050  ;;  %v2642_v39 = vsel %vm1315_vm11, %v2610_v60, %v2361_v62  ;;  %v6938_v62 = vld [vmem:[#allocation16_spill] sm:$0xff] }
 0x225   :  { %1095 = vrot.lane.b32.xlu0 %v3630_v26, %s3994_s15  ;;  %v3835_v14 = vpop.f32.mrb[0].mxu1  ;;  %v2512_v26 = vsel %vm1167_vm6, %v5660_v61, %v6258_v7  ;;  %v1200_v1 = vsel %vm1167_vm6, %v6885_v58, %v6938_v62 }
 0x226   :  { %1130 = vrot.lane.b32.xlu1 %v3631_v35, %s3995_s1  ;;  %v3105_v6 = vpop.f32.mrb[1].mxu1  ;;  %v3271_v34 = vmul.f32 %v3835_v14, %v6321_v43  ;;  %v1238_v14 = vsel %vm1216_vm7, %v1200_v1, %v6939_v36 }
 0x227   :  { %v2396_v54 = vpop.permute.xlu0 %2395  ;;  %v3269_v50 = vmul.f32 %v6321_v43, %v3105_v6  ;;  %v3836_v31 = vpop.f32.mrb[2].mxu1 }
 0x228   :  { %v2431_v48 = vpop.permute.xlu1 %2430  ;;  %v3108_v16 = vpop.f32.mrb[3].mxu1  ;;  %v3272_v37 = vmul.f32 %v3836_v31, %v6321_v43  ;;  %v3339_v25 = vadd.f32 %v6330_v10, %v3271_v34  ;;  %v2674_v5 = vsel %vm1348_vm10, %v2642_v39, %v2396_v54 }
 0x229   :  { %v3337_v0 = vadd.f32 %v6330_v10, %v3269_v50  ;;  %2475 = vrot.lane.b32.xlu0 %v3704_v8, %s3996_s19  ;;  %v3270_v23 = vmul.f32 %v6321_v43, %v3108_v16  ;;  %v2706_v55 = vsel %vm1381_vm12, %v2674_v5, %v2431_v48 }
 0x22a   :  { %1165 = vrot.lane.b32.xlu1 %v3632_v3, %s3996_s19  ;;  %v3340_v38 = vadd.f32 %v6330_v10, %v3272_v37  ;;  %v3403_v63 = vmax.f32 %v3339_v25, 0.0  ;;  %v6940_v3 = vld [vmem:[#allocation68_spill] sm:$0xff] }
 0x22b   :  { %v3338_v57 = vadd.f32 %v6330_v10, %v3270_v23  ;;  %v2398_v15 = vpop.permute.xlu0 %2397  ;;  %v3401_v29 = vmax.f32 %v3337_v0, 0.0  ;;  %v1271_v54 = vsel %vm1249_vm8, %v1238_v14, %v6940_v3  ;;  %v6941_v0 = vld [vmem:[#allocation82_spill] sm:$0xff] }
 0x22c   :  { %v1086_v56 = vpop.permute.xlu1 %1085  ;;  %v3404_v45 = vmax.f32 %v3340_v38, 0.0  ;;  %v1304_v37 = vsel %vm1282_vm9, %v1271_v54, %v6941_v0 }
 0x22d   :  { %v3402_v52 = vmax.f32 %v3338_v57, 0.0  ;;  %1163 = vrot.lane.b32.xlu0 %v5753_v4, %s3996_s19  ;;  %v2548_v4 = vsel %vm1216_vm7, %v2512_v26, %v6262_v33  ;;  %v1337_v40 = vsel %vm1315_vm11, %v1304_v37, %v6327_v19  ;;  %s3997_s19 = smov [#allocation3]  }
 0x22e   :  { %v2580_v35 = vsel %vm1249_vm8, %v2548_v4, %v6278_v2  ;;  %v1370_v57 = vsel %vm1348_vm10, %v1337_v40, %v1086_v56  ;;  %v6944_v4 = vld [vmem:[#allocation66_spill] sm:$0xff]  ;;  %s3539_s21 = sshll.u32 %s3997_s19, 4  ;;  %s3540_s21 = int_to_ptr.vmem [resolvable:$true] %s3539_s21 }
 0x22f   :  { %v3470_v41 = vadd.f32 %v3402_v52, %v3401_v29  ;;  %v1053_v44 = vpop.permute.xlu0 %1052  ;;  %v2612_v61 = vsel %vm1282_vm9, %v2580_v35, %v6292_v27  ;;  %p3946_p1 = scmp.lt.s32.totalorder %s3540_s21, %s3540_s21 }
 0x230   :  { %v2466_v24 = vpop.permute.xlu1 %2465  ;;  %v2644_v33 = vsel %vm1315_vm11, %v2612_v61, %v6306_v49 }
 0x231   :  { %v3471_v17 = vadd.f32 %v3470_v41, %v3403_v63  ;;  %v2738_v42 = vsel %vm1414_vm13, %v2706_v55, %v2466_v24  ;;  %v2676_v58 = vsel %vm1348_vm10, %v2644_v33, %v2398_v15 }
 0x232   :  { %3853 = vmatprep.mubr.msk.bf16.mxu1 %vm2749_vm14, %v2738_v42 }
 0x233   :  { %v2433_v47 = vpop.permute.xlu0 %2432  ;;  %v6362_v22 = vadd.f32 %v3471_v17, %v3404_v45  ;;  %v6942_v45 = vld [vmem:[#allocation14_spill] sm:$0xff]  ;;  %v6943_v17 = vld [vmem:[#allocation53_spill] sm:$0xff] }
 0x234   :  { %v3803_v28 = vpop.f32.mrb[0].mxu0  ;;  %v1121_v30 = vpop.permute.xlu1 %1120  ;;  %v2708_v27 = vsel %vm1381_vm12, %v2676_v58, %v2433_v47  ;;  %v1203_v56 = vsel %vm1167_vm6, %v6888_v59, %v6942_v45 }
 0x235   :  { %v2977_v7 = vpop.f32.mrb[1].mxu0  ;;  %v3239_v8 = vmul.f32 %v3803_v28, %v6321_v43  ;;  %v1403_v29 = vsel %vm1381_vm12, %v1370_v57, %v1121_v30  ;;  %v1240_v42 = vsel %vm1216_vm7, %v1203_v56, %v6943_v17  ;;  %v6945_v28 = vld [vmem:[#allocation80_spill] sm:$0xff] }
 0x236   :  { %v3237_v2 = vmul.f32 %v6321_v43, %v2977_v7  ;;  %v3804_v6 = vpop.f32.mrb[2].mxu0  ;;  %v1273_v47 = vsel %vm1249_vm8, %v1240_v42, %v6944_v4 }
 0x237   :  { %v2980_v34 = vpop.f32.mrb[3].mxu0  ;;  %v1088_v50 = vpop.permute.xlu0 %1087  ;;  %v3240_v48 = vmul.f32 %v3804_v6, %v6321_v43  ;;  %v3307_v51 = vadd.f32 %v6330_v10, %v3239_v8  ;;  %v1306_v30 = vsel %vm1282_vm9, %v1273_v47, %v6945_v28 }
 0x238   :  { %v3305_v31 = vadd.f32 %v6330_v10, %v3237_v2  ;;  %v3238_v49 = vmul.f32 %v6321_v43, %v2980_v34  ;;  %v2468_v16 = vpop.permute.xlu1 %2467  ;;  %v1339_v1 = vsel %vm1315_vm11, %v1306_v30, %v1053_v44 }
 0x239   :  { %v2740_v23 = vsel %vm1414_vm13, %v2708_v27, %v2468_v16  ;;  %v3308_v60 = vadd.f32 %v6330_v10, %v3240_v48  ;;  %v3371_v5 = vmax.f32 %v3307_v51, 0.0  ;;  %v1372_v61 = vsel %vm1348_vm10, %v1339_v1, %v1088_v50 }
 0x23a   :  { %v3306_v25 = vadd.f32 %v6330_v10, %v3238_v49  ;;  %3854 = vmatmul.mubr.msk.bf16.gmra.mrb[20].mxu1 %vm2749_vm14, %v2740_v23  ;;  %v3369_v11 = vmax.f32 %v3305_v31, 0.0 }
 0x23b   :  { %v2180_v15 = vpop.permute.xlu0 %2179  ;;  %v3372_v41 = vmax.f32 %v3308_v60, 0.0 }
 0x23c   :  { %v3370_v38 = vmax.f32 %v3306_v25, 0.0  ;;  %v1156_v52 = vpop.permute.xlu1 %1155  ;;  %v2515_v60 = vsel %vm1167_vm6, %v5770_v20, %v2180_v15 }
 0x23d   :  { %v1436_v39 = vsel %vm1414_vm13, %v1403_v29, %v1156_v52 }
 0x23e   :  { %v3433_v19 = vadd.f32 %v3370_v38, %v3369_v11  ;;  %3821 = vmatprep.mubr.msk.bf16.mxu0 %vm2749_vm14, %v1436_v39 }
 0x23f   :  { %v1123_v63 = vpop.permute.xlu0 %1122 }
 0x240   :  { %v3434_v55 = vadd.f32 %v3433_v19, %v3371_v5  ;;  %v2260_v24 = vpop.permute.xlu1 %2259  ;;  %v1405_v7 = vsel %vm1381_vm12, %v1372_v61, %v1123_v63  ;;  %v6946_v61 = vld [vmem:[#allocation44_spill] sm:$0xff] }
 0x241   :  { %v2550_v29 = vsel %vm1216_vm7, %v2515_v60, %v2260_v24 }
 0x242   :  { %v6402_v26 = vadd.f32 %v3434_v55, %v3372_v41 }
 0x243   :  { %v2182_v35 = vpop.permute.xlu0 %2181 }
 0x244   :  { %v2262_v62 = vpop.permute.xlu1 %2261  ;;  %v2518_v47 = vsel %vm1167_vm6, %v5873_v21, %v2182_v35 }
 0x247   :  { %v1158_v59 = vpop.permute.xlu0 %1157 }
 0x248   :  { %v1438_v36 = vsel %vm1414_vm13, %v1405_v7, %v1158_v59  ;;  %v2297_v14 = vpop.permute.xlu1 %2296  ;;  %v1206_v7 = vsel %vm1167_vm6, %v6905_v18, %v6946_v61  ;;  %v2552_v59 = vsel %vm1216_vm7, %v2518_v47, %v2262_v62 }
 0x249   :  { %3822 = vmatmul.mubr.msk.bf16.gmra.mrb[20].mxu0 %vm2749_vm14, %v1438_v36 }
 0x24b   :  { %v2295_v33 = vpop.permute.xlu0 %2294 }
 0x24c   :  { %v2332_v8 = vpop.permute.xlu1 %2331  ;;  %v2582_v5 = vsel %vm1249_vm8, %v2550_v29, %v2295_v33 }
 0x24f   :  { %v2330_v2 = vpop.permute.xlu0 %2329 }
 0x250   :  { %v2367_v6 = vpop.permute.xlu1 %2366  ;;  %v2614_v63 = vsel %vm1282_vm9, %v2582_v5, %v2330_v2  ;;  %v2584_v2 = vsel %vm1249_vm8, %v2552_v59, %v2297_v14  ;;  %v6948_v14 = vld [vmem:[#allocation70_spill] sm:$0xff] }
 0x251   :  { %v3839_v3 = vpop.f32.mrb[4].mxu1 }
 0x252   :  { %v3121_v54 = vpop.f32.mrb[5].mxu1  ;;  %v3275_v34 = vmul.f32 %v3839_v3, %v6321_v43 }
 0x253   :  { %v2365_v58 = vpop.permute.xlu0 %2364  ;;  %v3273_v44 = vmul.f32 %v6321_v43, %v3121_v54  ;;  %v3840_v50 = vpop.f32.mrb[6].mxu1 }
 0x254   :  { %v6415_v27 = vpop.permute.xlu1 %1054  ;;  %v3124_v31 = vpop.f32.mrb[7].mxu1  ;;  %v3276_v49 = vmul.f32 %v3840_v50, %v6321_v43  ;;  %v3343_v0 = vadd.f32 %v6330_v10, %v3275_v34 }
 0x255   :  { %v3341_v48 = vadd.f32 %v6330_v10, %v3273_v44  ;;  %v3274_v16 = vmul.f32 %v6321_v43, %v3124_v31  ;;  %v2616_v44 = vsel %vm1282_vm9, %v2584_v2, %v2332_v8 }
 0x256   :  { %v3344_v57 = vadd.f32 %v6330_v10, %v3276_v49  ;;  %v3407_v38 = vmax.f32 %v3343_v0, 0.0  ;;  %v2648_v18 = vsel %vm1315_vm11, %v2616_v44, %v2367_v6  ;;  %v6949_v6 = vld [vmem:[#allocation84_spill] sm:$0xff] }
 0x257   :  { %v3405_v37 = vmax.f32 %v3341_v48, 0.0  ;;  %v3342_v23 = vadd.f32 %v6330_v10, %v3274_v16  ;;  %v2400_v40 = vpop.permute.xlu0 %2399 }
 0x258   :  { %v2435_v51 = vpop.permute.xlu1 %2434  ;;  %v3408_v41 = vmax.f32 %v3344_v57, 0.0 }
 0x259   :  { %v3473_v25 = vadd.f32 %v6362_v22, %v3405_v37  ;;  %v3406_v11 = vmax.f32 %v3342_v23, 0.0  ;;  %v2646_v22 = vsel %vm1315_vm11, %v2614_v63, %v2365_v58  ;;  %v6947_v58 = vld [vmem:[#allocation56_spill] sm:$0xff] }
 0x25a   :  { %v2678_v45 = vsel %vm1348_vm10, %v2646_v22, %v2400_v40  ;;  %v1242_v34 = vsel %vm1216_vm7, %v1206_v7, %v6947_v58  ;;  %v6950_v22 = vld [vmem:[#allocation43_spill] sm:$0xff] }
 0x25b   :  { %v3474_v52 = vadd.f32 %v3473_v25, %v3406_v11  ;;  %v2402_v39 = vpop.permute.xlu0 %2401  ;;  %v2710_v20 = vsel %vm1381_vm12, %v2678_v45, %v2435_v51  ;;  %v1275_v48 = vsel %vm1249_vm8, %v1242_v34, %v6948_v14  ;;  %v1209_v45 = vsel %vm1167_vm6, %v6908_v32, %v6950_v22 }
 0x25c   :  { %v1090_v19 = vpop.permute.xlu1 %1089  ;;  %v2680_v49 = vsel %vm1348_vm10, %v2648_v18, %v2402_v39  ;;  %v1308_v51 = vsel %vm1282_vm9, %v1275_v48, %v6949_v6 }
 0x25d   :  { %v3475_v55 = vadd.f32 %v3474_v52, %v3407_v38  ;;  %v1341_v57 = vsel %vm1315_vm11, %v1308_v51, %v6415_v27 }
 0x25f   :  { %v1057_v56 = vpop.permute.xlu0 %1056  ;;  %v6431_v17 = vadd.f32 %v3475_v55, %v3408_v41 }
 0x260   :  { %v3807_v15 = vpop.f32.mrb[4].mxu0  ;;  %v2470_v24 = vpop.permute.xlu1 %2469 }
 0x261   :  { %v2993_v42 = vpop.f32.mrb[5].mxu0  ;;  %v2742_v4 = vsel %vm1414_vm13, %v2710_v20, %v2470_v24  ;;  %v3243_v28 = vmul.f32 %v3807_v15, %v6321_v43  ;;  %v6951_v20 = vld [vmem:[#allocation55_spill] sm:$0xff]  ;;  %v6952_v15 = vld [vmem:[#allocation69_spill] sm:$0xff] }
 0x262   :  { %v3241_v30 = vmul.f32 %v6321_v43, %v2993_v42  ;;  %v3808_v1 = vpop.f32.mrb[6].mxu0  ;;  %3857 = vmatprep.mubr.msk.bf16.mxu1 %vm2749_vm14, %v2742_v4  ;;  %v6953_v4 = vld [vmem:[#allocation83_spill] sm:$0xff] }
 0x263   :  { %v2996_v36 = vpop.f32.mrb[7].mxu0  ;;  %v2437_v33 = vpop.permute.xlu0 %2436  ;;  %v3244_v21 = vmul.f32 %v3808_v1, %v6321_v43  ;;  %v3311_v62 = vadd.f32 %v6330_v10, %v3243_v28 }
 0x264   :  { %v3309_v3 = vadd.f32 %v6330_v10, %v3241_v30  ;;  %v3242_v35 = vmul.f32 %v6321_v43, %v2996_v36  ;;  %v1125_v54 = vpop.permute.xlu1 %1124  ;;  %v2712_v8 = vsel %vm1381_vm12, %v2680_v49, %v2437_v33 }
 0x265   :  { %v3312_v37 = vadd.f32 %v6330_v10, %v3244_v21  ;;  %v3375_v11 = vmax.f32 %v3311_v62, 0.0 }
 0x266   :  { %v3373_v50 = vmax.f32 %v3309_v3, 0.0  ;;  %v3310_v31 = vadd.f32 %v6330_v10, %v3242_v35 }
 0x267   :  { %v1092_v16 = vpop.permute.xlu0 %1091  ;;  %v3376_v38 = vmax.f32 %v3312_v37, 0.0 }
 0x268   :  { %v3436_v0 = vadd.f32 %v6402_v26, %v3373_v50  ;;  %v3374_v23 = vmax.f32 %v3310_v31, 0.0  ;;  %v2472_v40 = vpop.permute.xlu1 %2471  ;;  %v1374_v26 = vsel %vm1348_vm10, %v1341_v57, %v1090_v19  ;;  %v1244_v19 = vsel %vm1216_vm7, %v1209_v45, %v6951_v20 }
 0x269   :  { %v2744_v25 = vsel %vm1414_vm13, %v2712_v8, %v2472_v40  ;;  %v1407_v39 = vsel %vm1381_vm12, %v1374_v26, %v1125_v54  ;;  %v1277_v24 = vsel %vm1249_vm8, %v1244_v19, %v6952_v15 }
 0x26a   :  { %v3437_v60 = vadd.f32 %v3436_v0, %v3374_v23  ;;  %3858 = vmatmul.mubr.msk.bf16.gmra.mrb[24].mxu1 %vm2749_vm14, %v2744_v25  ;;  %v1310_v47 = vsel %vm1282_vm9, %v1277_v24, %v6953_v4 }
 0x26b   :  { %v2184_v29 = vpop.permute.xlu0 %2183  ;;  %v1343_v30 = vsel %vm1315_vm11, %v1310_v47, %v1057_v56 }
 0x26c   :  { %v3438_v52 = vadd.f32 %v3437_v60, %v3375_v11  ;;  %v1160_v5 = vpop.permute.xlu1 %1159  ;;  %v1376_v1 = vsel %vm1348_vm10, %v1343_v30, %v1092_v16  ;;  %v2521_v57 = vsel %vm1167_vm6, %v5960_v46, %v2184_v29 }
 0x26d   :  { %v1440_v63 = vsel %vm1414_vm13, %v1407_v39, %v1160_v5 }
 0x26e   :  { %3825 = vmatprep.mubr.msk.bf16.mxu0 %vm2749_vm14, %v1440_v63  ;;  %v6470_v41 = vadd.f32 %v3438_v52, %v3376_v38 }
 0x26f   :  { %v1127_v55 = vpop.permute.xlu0 %1126 }
 0x270   :  { %v2264_v27 = vpop.permute.xlu1 %2263  ;;  %v1409_v61 = vsel %vm1381_vm12, %v1376_v1, %v1127_v55 }
 0x271   :  { %v2554_v11 = vsel %vm1216_vm7, %v2521_v57, %v2264_v27  ;;  %v6961_v57 = vld [vmem:[#allocation86_spill] sm:$0xff] }
 0x273   :  { %v6479_v42 = vpop.permute.xlu0 %2185 }
 0x274   :  { %v6483_v28 = vpop.permute.xlu1 %2265 }
 0x277   :  { %v1162_v32 = vpop.permute.xlu0 %1161 }
 0x278   :  { %v1442_v7 = vsel %vm1414_vm13, %v1409_v61, %v1162_v32  ;;  %v6489_v59 = vpop.permute.xlu1 %2300 }
 0x279   :  { %3826 = vmatmul.mubr.msk.bf16.gmra.mrb[24].mxu0 %vm2749_vm14, %v1442_v7 }
 0x27b   :  { %v2299_v36 = vpop.permute.xlu0 %2298 }
 0x27c   :  { %v6492_v33 = vpop.permute.xlu1 %2335  ;;  %v2586_v38 = vsel %vm1249_vm8, %v2554_v11, %v2299_v36 }
 0x27d   :  { %v3843_v2 = vpop.f32.mrb[8].mxu1 }
 0x27e   :  { %v3137_v3 = vpop.f32.mrb[9].mxu1  ;;  %v3279_v35 = vmul.f32 %v3843_v2, %v6321_v43 }
 0x27f   :  { %v2334_v21 = vpop.permute.xlu0 %2333  ;;  %v3277_v56 = vmul.f32 %v6321_v43, %v3137_v3  ;;  %v3844_v54 = vpop.f32.mrb[10].mxu1 }
 0x280   :  { %v6496_v58 = vpop.permute.xlu1 %2370  ;;  %v3140_v34 = vpop.f32.mrb[11].mxu1  ;;  %v3280_v18 = vmul.f32 %v3844_v54, %v6321_v43  ;;  %v3347_v50 = vadd.f32 %v6330_v10, %v3279_v35  ;;  %v2618_v39 = vsel %vm1282_vm9, %v2586_v38, %v2334_v21  ;;  %v2524_v21 = vsel %vm1167_vm6, %v6063_v13, %v6479_v42  ;;  %v6955_v13 = vld [vmem:[#allocation46_spill] sm:$0xff] }
 0x281   :  { %v3345_v44 = vadd.f32 %v6330_v10, %v3277_v56  ;;  %v3278_v62 = vmul.f32 %v6321_v43, %v3140_v34  ;;  %v2556_v35 = vsel %vm1216_vm7, %v2524_v21, %v6483_v28  ;;  %v1212_v42 = vsel %vm1167_vm6, %v6922_v12, %v6955_v13  ;;  %v6956_v28 = vld [vmem:[#allocation57_spill] sm:$0xff] }
 0x282   :  { %v3348_v0 = vadd.f32 %v6330_v10, %v3280_v18  ;;  %v3411_v23 = vmax.f32 %v3347_v50, 0.0  ;;  %v2588_v34 = vsel %vm1249_vm8, %v2556_v35, %v6489_v59  ;;  %v6954_v18 = vld [vmem:[#allocation45_spill] sm:$0xff] }
 0x283   :  { %v3409_v31 = vmax.f32 %v3345_v44, 0.0  ;;  %v3346_v14 = vadd.f32 %v6330_v10, %v3278_v62  ;;  %v2369_v48 = vpop.permute.xlu0 %2368  ;;  %v2620_v62 = vsel %vm1282_vm9, %v2588_v34, %v6492_v33 }
 0x284   :  { %v6503_v49 = vpop.permute.xlu1 %1058  ;;  %v3412_v51 = vmax.f32 %v3348_v0, 0.0  ;;  %v2650_v63 = vsel %vm1315_vm11, %v2618_v39, %v2369_v48  ;;  %v2652_v59 = vsel %vm1315_vm11, %v2620_v62, %v6496_v58 }
 0x285   :  { %v3477_v16 = vadd.f32 %v6431_v17, %v3409_v31  ;;  %v3410_v37 = vmax.f32 %v3346_v14, 0.0 }
 0x287   :  { %v3478_v8 = vadd.f32 %v3477_v16, %v3410_v37  ;;  %v2404_v40 = vpop.permute.xlu0 %2403  ;;  %v6957_v16 = vld [vmem:[#allocation58_spill] sm:$0xff] }
 0x288   :  { %v2439_v6 = vpop.permute.xlu1 %2438  ;;  %v2682_v46 = vsel %vm1348_vm10, %v2650_v63, %v2404_v40  ;;  %v1246_v0 = vsel %vm1216_vm7, %v1212_v42, %v6957_v16 }
 0x289   :  { %v3479_v25 = vadd.f32 %v3478_v8, %v3411_v23  ;;  %v2714_v20 = vsel %vm1381_vm12, %v2682_v46, %v2439_v6  ;;  %v6959_v8 = vld [vmem:[#allocation72_spill] sm:$0xff]  ;;  %v6960_v6 = vld [vmem:[#allocation85_spill] sm:$0xff] }
 0x28a   :  { %v1279_v40 = vsel %vm1249_vm8, %v1246_v0, %v6959_v8 }
 0x28b   :  { %v2406_v60 = vpop.permute.xlu0 %2405  ;;  %v6510_v26 = vadd.f32 %v3479_v25, %v3412_v51  ;;  %v1312_v58 = vsel %vm1282_vm9, %v1279_v40, %v6961_v57 }
 0x28c   :  { %v3811_v17 = vpop.f32.mrb[8].mxu0  ;;  %v1094_v52 = vpop.permute.xlu1 %1093  ;;  %v2684_v33 = vsel %vm1348_vm10, %v2652_v59, %v2406_v60  ;;  %v1345_v60 = vsel %vm1315_vm11, %v1312_v58, %v6503_v49 }
 0x28d   :  { %v3009_v5 = vpop.f32.mrb[9].mxu0  ;;  %v3247_v55 = vmul.f32 %v3811_v17, %v6321_v43 }
 0x28e   :  { %v3245_v22 = vmul.f32 %v6321_v43, %v3009_v5  ;;  %v3812_v45 = vpop.f32.mrb[10].mxu0  ;;  %v1378_v5 = vsel %vm1348_vm10, %v1345_v60, %v1094_v52 }
 0x28f   :  { %v3012_v29 = vpop.f32.mrb[11].mxu0  ;;  %v1061_v27 = vpop.permute.xlu0 %1060  ;;  %v3248_v15 = vmul.f32 %v3812_v45, %v6321_v43  ;;  %v3315_v30 = vadd.f32 %v6330_v10, %v3247_v55 }
 0x290   :  { %v3313_v19 = vadd.f32 %v6330_v10, %v3245_v22  ;;  %v3246_v24 = vmul.f32 %v6321_v43, %v3012_v29  ;;  %v2474_v4 = vpop.permute.xlu1 %2473 }
 0x291   :  { %v2746_v47 = vsel %vm1414_vm13, %v2714_v20, %v2474_v4  ;;  %v3316_v36 = vadd.f32 %v6330_v10, %v3248_v15  ;;  %v3379_v56 = vmax.f32 %v3315_v30, 0.0 }
 0x292   :  { %v3377_v1 = vmax.f32 %v3313_v19, 0.0  ;;  %v3314_v61 = vadd.f32 %v6330_v10, %v3246_v24  ;;  %3861 = vmatprep.mubr.msk.bf16.mxu1 %vm2749_vm14, %v2746_v47 }
 0x293   :  { %v2441_v32 = vpop.permute.xlu0 %2440  ;;  %v3380_v50 = vmax.f32 %v3316_v36, 0.0 }
 0x294   :  { %v3440_v7 = vadd.f32 %v6470_v41, %v3377_v1  ;;  %v3378_v2 = vmax.f32 %v3314_v61, 0.0  ;;  %v1129_v3 = vpop.permute.xlu1 %1128  ;;  %v1215_v41 = vsel %vm1167_vm6, %v6925_v53, %v6954_v18  ;;  %v6958_v53 = vld [vmem:[#allocation71_spill] sm:$0xff]  ;;  %v2716_v51 = vsel %vm1381_vm12, %v2684_v33, %v2441_v32 }
 0x295   :  { %v1248_v48 = vsel %vm1216_vm7, %v1215_v41, %v6956_v28  ;;  %v1411_v55 = vsel %vm1381_vm12, %v1378_v5, %v1129_v3 }
 0x296   :  { %v3441_v54 = vadd.f32 %v3440_v7, %v3378_v2  ;;  %v1281_v37 = vsel %vm1249_vm8, %v1248_v48, %v6958_v53 }
 0x297   :  { %v1096_v44 = vpop.permute.xlu0 %1095  ;;  %v1314_v12 = vsel %vm1282_vm9, %v1281_v37, %v6960_v6 }
 0x298   :  { %v3442_v31 = vadd.f32 %v3441_v54, %v3379_v56  ;;  %v1131_v14 = vpop.permute.xlu1 %1130  ;;  %v1347_v11 = vsel %vm1315_vm11, %v1314_v12, %v1061_v27 }
 0x299   :  { %v1380_v39 = vsel %vm1348_vm10, %v1347_v11, %v1096_v44 }
 0x29a   :  { %v3443_v23 = vadd.f32 %v3442_v31, %v3380_v50  ;;  %v1413_v63 = vsel %vm1381_vm12, %v1380_v39, %v1131_v14 }
 0x29b   :  { %v2476_v25 = vpop.permute.xlu0 %2475 }
 0x29c   :  { %v2748_v38 = vsel %vm1414_vm13, %v2716_v51, %v2476_v25  ;;  %v1166_v17 = vpop.permute.xlu1 %1165 }
 0x29d   :  { %3862 = vmatmul.mubr.msk.bf16.gmra.mrb[28].mxu1 %vm2749_vm14, %v2748_v38  ;;  %v1446_v22 = vsel %vm1414_vm13, %v1413_v63, %v1166_v17 }
 0x29f   :  { %v1164_v45 = vpop.permute.xlu0 %1163 }
 0x2a0   :  { %v1444_v46 = vsel %vm1414_vm13, %v1411_v55, %v1164_v45 }
 0x2a1   :  { %3829 = vmatprep.mubr.msk.bf16.mxu0 %vm2749_vm14, %v1444_v46 }
 0x2a2   :  { %3830 = vmatmul.mubr.msk.bf16.gmra.mrb[28].mxu0 %vm2749_vm14, %v1446_v22 }
 0x2ad   :  { %v3847_v49 = vpop.f32.mrb[12].mxu1 }
 0x2ae   :  { %v3153_v29 = vpop.f32.mrb[13].mxu1  ;;  %v3283_v27 = vmul.f32 %v3847_v49, %v6321_v43 }
 0x2af   :  { %v3281_v20 = vmul.f32 %v6321_v43, %v3153_v29  ;;  %v3848_v52 = vpop.f32.mrb[14].mxu1 }
 0x2b0   :  { %v3156_v19 = vpop.f32.mrb[15].mxu1  ;;  %v3284_v24 = vmul.f32 %v3848_v52, %v6321_v43  ;;  %v3351_v47 = vadd.f32 %v6330_v10, %v3283_v27 }
 0x2b1   :  { %v3349_v15 = vadd.f32 %v6330_v10, %v3281_v20  ;;  %v3282_v4 = vmul.f32 %v6321_v43, %v3156_v19 }
 0x2b2   :  { %v3352_v32 = vadd.f32 %v6330_v10, %v3284_v24  ;;  %v3415_v36 = vmax.f32 %v3351_v47, 0.0 }
 0x2b3   :  { %v3413_v30 = vmax.f32 %v3349_v15, 0.0  ;;  %v3350_v1 = vadd.f32 %v6330_v10, %v3282_v4 }
 0x2b4   :  { %v3416_v3 = vmax.f32 %v3352_v32, 0.0 }
 0x2b5   :  { %v3481_v61 = vadd.f32 %v6510_v26, %v3413_v30  ;;  %v3414_v7 = vmax.f32 %v3350_v1, 0.0 }
 0x2b7   :  { %v3482_v2 = vadd.f32 %v3481_v61, %v3414_v7 }
 0x2b9   :  { %v3483_v21 = vadd.f32 %v3482_v2, %v3415_v36 }
 0x2bb   :  { %v3484_v35 = vadd.f32 %v3483_v21, %v3416_v3 }
 0x2bc   :  { %v3815_v56 = vpop.f32.mrb[12].mxu0 }
 0x2bd   :  { %v3025_v54 = vpop.f32.mrb[13].mxu0  ;;  %v3251_v34 = vmul.f32 %v3815_v56, %v6321_v43 }
 0x2be   :  { %v3249_v44 = vmul.f32 %v6321_v43, %v3025_v54  ;;  %v3816_v18 = vpop.f32.mrb[14].mxu0 }
 0x2bf   :  { %v3028_v41 = vpop.f32.mrb[15].mxu0  ;;  %v3252_v26 = vmul.f32 %v3816_v18, %v6321_v43  ;;  %v3319_v31 = vadd.f32 %v6330_v10, %v3251_v34 }
 0x2c0   :  { %v3317_v62 = vadd.f32 %v6330_v10, %v3249_v44  ;;  %v3250_v50 = vmul.f32 %v6321_v43, %v3028_v41 }
 0x2c1   :  { %v3320_v28 = vadd.f32 %v6330_v10, %v3252_v26  ;;  %v3383_v59 = vmax.f32 %v3319_v31, 0.0 }
 0x2c2   :  { %v3381_v14 = vmax.f32 %v3317_v62, 0.0  ;;  %v3318_v13 = vadd.f32 %v6330_v10, %v3250_v50 }
 0x2c3   :  { %v3384_v0 = vmax.f32 %v3320_v28, 0.0 }
 0x2c4   :  { %v3444_v42 = vadd.f32 %v3443_v23, %v3381_v14  ;;  %v3382_v48 = vmax.f32 %v3318_v13, 0.0 }
 0x2c6   :  { %v3445_v16 = vadd.f32 %v3444_v42, %v3382_v48 }
 0x2c8   :  { %v3446_v53 = vadd.f32 %v3445_v16, %v3383_v59 }
 0x2ca   :  { %v3447_v37 = vadd.f32 %v3446_v53, %v3384_v0 }
 0x2dd   :  { %v3851_v33 = vpop.f32.mrb[16].mxu1 }
 0x2de   :  { %v3169_v8 = vpop.f32.mrb[17].mxu1  ;;  %v3287_v40 = vmul.f32 %v3851_v33, %v6321_v43 }
 0x2df   :  { %v3285_v6 = vmul.f32 %v6321_v43, %v3169_v8  ;;  %v3852_v12 = vpop.f32.mrb[18].mxu1 }
 0x2e0   :  { %v3172_v51 = vpop.f32.mrb[19].mxu1  ;;  %v3288_v23 = vmul.f32 %v3852_v12, %v6321_v43  ;;  %v3355_v58 = vadd.f32 %v6330_v10, %v3287_v40 }
 0x2e1   :  { %v3353_v25 = vadd.f32 %v6330_v10, %v3285_v6  ;;  %v3286_v57 = vmul.f32 %v6321_v43, %v3172_v51 }
 0x2e2   :  { %v3356_v60 = vadd.f32 %v6330_v10, %v3288_v23  ;;  %v3419_v5 = vmax.f32 %v3355_v58, 0.0 }
 0x2e3   :  { %v3417_v11 = vmax.f32 %v3353_v25, 0.0  ;;  %v3354_v38 = vadd.f32 %v6330_v10, %v3286_v57 }
 0x2e4   :  { %v3420_v55 = vmax.f32 %v3356_v60, 0.0 }
 0x2e5   :  { %v3485_v17 = vadd.f32 %v3484_v35, %v3417_v11  ;;  %v3418_v39 = vmax.f32 %v3354_v38, 0.0 }
 0x2e7   :  { %v3486_v63 = vadd.f32 %v3485_v17, %v3418_v39 }
 0x2e9   :  { %v3487_v22 = vadd.f32 %v3486_v63, %v3419_v5 }
 0x2eb   :  { %v3488_v45 = vadd.f32 %v3487_v22, %v3420_v55 }
 0x2ec   :  { %v3819_v46 = vpop.f32.mrb[16].mxu0 }
 0x2ed   :  { %v3041_v49 = vpop.f32.mrb[17].mxu0  ;;  %v3255_v29 = vmul.f32 %v3819_v46, %v6321_v43 }
 0x2ee   :  { %v3253_v27 = vmul.f32 %v6321_v43, %v3041_v49  ;;  %v3820_v20 = vpop.f32.mrb[18].mxu0 }
 0x2ef   :  { %v3044_v52 = vpop.f32.mrb[19].mxu0  ;;  %v3256_v15 = vmul.f32 %v3820_v20, %v6321_v43  ;;  %v3323_v4 = vadd.f32 %v6330_v10, %v3255_v29 }
 0x2f0   :  { %v3321_v19 = vadd.f32 %v6330_v10, %v3253_v27  ;;  %v3254_v24 = vmul.f32 %v6321_v43, %v3044_v52 }
 0x2f1   :  { %v3324_v61 = vadd.f32 %v6330_v10, %v3256_v15  ;;  %v3387_v7 = vmax.f32 %v3323_v4, 0.0 }
 0x2f2   :  { %v3385_v47 = vmax.f32 %v3321_v19, 0.0  ;;  %v3322_v30 = vadd.f32 %v6330_v10, %v3254_v24 }
 0x2f3   :  { %v3388_v2 = vmax.f32 %v3324_v61, 0.0 }
 0x2f4   :  { %v3448_v1 = vadd.f32 %v3447_v37, %v3385_v47  ;;  %v3386_v32 = vmax.f32 %v3322_v30, 0.0 }
 0x2f6   :  { %v3449_v36 = vadd.f32 %v3448_v1, %v3386_v32 }
 0x2f8   :  { %v3450_v3 = vadd.f32 %v3449_v36, %v3387_v7 }
 0x2fa   :  { %v3451_v21 = vadd.f32 %v3450_v3, %v3388_v2 }
 0x30d   :  { %v3855_v35 = vpop.f32.mrb[20].mxu1 }
 0x30e   :  { %v3185_v56 = vpop.f32.mrb[21].mxu1  ;;  %v3291_v54 = vmul.f32 %v3855_v35, %v6321_v43 }
 0x30f   :  { %v3289_v34 = vmul.f32 %v6321_v43, %v3185_v56  ;;  %v3856_v44 = vpop.f32.mrb[22].mxu1 }
 0x310   :  { %v3188_v18 = vpop.f32.mrb[23].mxu1  ;;  %v3292_v62 = vmul.f32 %v3856_v44, %v6321_v43  ;;  %v3359_v50 = vadd.f32 %v6330_v10, %v3291_v54 }
 0x311   :  { %v3357_v41 = vadd.f32 %v6330_v10, %v3289_v34  ;;  %v3290_v26 = vmul.f32 %v6321_v43, %v3188_v18 }
 0x312   :  { %v3360_v42 = vadd.f32 %v6330_v10, %v3292_v62  ;;  %v3423_v48 = vmax.f32 %v3359_v50, 0.0 }
 0x313   :  { %v3421_v31 = vmax.f32 %v3357_v41, 0.0  ;;  %v3358_v14 = vadd.f32 %v6330_v10, %v3290_v26 }
 0x314   :  { %v3424_v16 = vmax.f32 %v3360_v42, 0.0 }
 0x315   :  { %v3489_v13 = vadd.f32 %v3488_v45, %v3421_v31  ;;  %v3422_v28 = vmax.f32 %v3358_v14, 0.0 }
 0x317   :  { %v3490_v59 = vadd.f32 %v3489_v13, %v3422_v28 }
 0x319   :  { %v3491_v0 = vadd.f32 %v3490_v59, %v3423_v48 }
 0x31b   :  { %v3492_v53 = vadd.f32 %v3491_v0, %v3424_v16 }
 0x31c   :  { %v3823_v37 = vpop.f32.mrb[20].mxu0 }
 0x31d   :  { %v3057_v33 = vpop.f32.mrb[21].mxu0  ;;  %v3259_v8 = vmul.f32 %v3823_v37, %v6321_v43 }
 0x31e   :  { %v3257_v40 = vmul.f32 %v6321_v43, %v3057_v33  ;;  %v3824_v6 = vpop.f32.mrb[22].mxu0 }
 0x31f   :  { %v3060_v12 = vpop.f32.mrb[23].mxu0  ;;  %v3260_v25 = vmul.f32 %v3824_v6, %v6321_v43  ;;  %v3327_v57 = vadd.f32 %v6330_v10, %v3259_v8 }
 0x320   :  { %v3325_v51 = vadd.f32 %v6330_v10, %v3257_v40  ;;  %v3258_v23 = vmul.f32 %v6321_v43, %v3060_v12 }
 0x321   :  { %v3328_v17 = vadd.f32 %v6330_v10, %v3260_v25  ;;  %v3391_v39 = vmax.f32 %v3327_v57, 0.0 }
 0x322   :  { %v3389_v58 = vmax.f32 %v3325_v51, 0.0  ;;  %v3326_v11 = vadd.f32 %v6330_v10, %v3258_v23 }
 0x323   :  { %v3392_v63 = vmax.f32 %v3328_v17, 0.0 }
 0x324   :  { %v3452_v38 = vadd.f32 %v3451_v21, %v3389_v58  ;;  %v3390_v60 = vmax.f32 %v3326_v11, 0.0 }
 0x326   :  { %v3453_v5 = vadd.f32 %v3452_v38, %v3390_v60 }
 0x328   :  { %v3454_v55 = vadd.f32 %v3453_v5, %v3391_v39 }
 0x32a   :  { %v3455_v22 = vadd.f32 %v3454_v55, %v3392_v63 }
 0x33d   :  { %v3859_v45 = vpop.f32.mrb[24].mxu1 }
 0x33e   :  { %v3201_v46 = vpop.f32.mrb[25].mxu1  ;;  %v3295_v49 = vmul.f32 %v3859_v45, %v6321_v43 }
 0x33f   :  { %v3293_v29 = vmul.f32 %v6321_v43, %v3201_v46  ;;  %v3860_v27 = vpop.f32.mrb[26].mxu1 }
 0x340   :  { %v3204_v20 = vpop.f32.mrb[27].mxu1  ;;  %v3296_v19 = vmul.f32 %v3860_v27, %v6321_v43  ;;  %v3363_v24 = vadd.f32 %v6330_v10, %v3295_v49 }
 0x341   :  { %v3361_v52 = vadd.f32 %v6330_v10, %v3293_v29  ;;  %v3294_v15 = vmul.f32 %v6321_v43, %v3204_v20 }
 0x342   :  { %v3364_v1 = vadd.f32 %v6330_v10, %v3296_v19  ;;  %v3427_v32 = vmax.f32 %v3363_v24, 0.0 }
 0x343   :  { %v3425_v4 = vmax.f32 %v3361_v52, 0.0  ;;  %v3362_v47 = vadd.f32 %v6330_v10, %v3294_v15 }
 0x344   :  { %v3428_v36 = vmax.f32 %v3364_v1, 0.0 }
 0x345   :  { %v3493_v30 = vadd.f32 %v3492_v53, %v3425_v4  ;;  %v3426_v61 = vmax.f32 %v3362_v47, 0.0 }
 0x347   :  { %v3494_v7 = vadd.f32 %v3493_v30, %v3426_v61 }
 0x349   :  { %v3495_v2 = vadd.f32 %v3494_v7, %v3427_v32 }
 0x34b   :  { %v3496_v3 = vadd.f32 %v3495_v2, %v3428_v36 }
 0x34c   :  { %v3827_v21 = vpop.f32.mrb[24].mxu0 }
 0x34d   :  { %v3073_v35 = vpop.f32.mrb[25].mxu0  ;;  %v3263_v56 = vmul.f32 %v3827_v21, %v6321_v43 }
 0x34e   :  { %v3261_v54 = vmul.f32 %v6321_v43, %v3073_v35  ;;  %v3828_v34 = vpop.f32.mrb[26].mxu0 }
 0x34f   :  { %v3076_v44 = vpop.f32.mrb[27].mxu0  ;;  %v3264_v41 = vmul.f32 %v3828_v34, %v6321_v43  ;;  %v3331_v26 = vadd.f32 %v6330_v10, %v3263_v56 }
 0x350   :  { %v3329_v18 = vadd.f32 %v6330_v10, %v3261_v54  ;;  %v3262_v62 = vmul.f32 %v6321_v43, %v3076_v44  ;;  %v3517_v54 = vsub.s32 2, %v6288_v9 }
 0x351   :  { %v3332_v13 = vadd.f32 %v6330_v10, %v3264_v41  ;;  %v3395_v28 = vmax.f32 %v3331_v26, 0.0  ;;  %v3523_v41 = vsub.s32 3, %v6288_v9 }
 0x352   :  { %v3393_v50 = vmax.f32 %v3329_v18, 0.0  ;;  %v3330_v31 = vadd.f32 %v6330_v10, %v3262_v62  ;;  %v3940_v62 = vld [vmem:[%s6686_s2] sm:$0xf]  ;;  %s3941_s2 = scalar_lea.vmem %s3540_s21, 32 }
 0x353   :  { %v3396_v59 = vmax.f32 %v3332_v13, 0.0  ;;  %v3518_v26 = vrot.slane %v3940_v62, %v3517_v54  ;;  %v3524_v13 = vrot.slane %v3940_v62, %v3523_v41  ;;  %p3942_p0 = scmp.ne.s32.totalorder %s3540_s21, %s3941_s2  ;;  %p3947_p2 = scmp.lt.s32.totalorder %s3941_s2, %s3941_s2 }
 0x354   :  { %v3456_v14 = vadd.f32 %v3455_v22, %v3393_v50  ;;  %v3394_v42 = vmax.f32 %v3330_v31, 0.0 }
 0x355   :  { %p3948_p3 = por %p3947_p2, %p3946_p1 }
 0x356   :  { %v3457_v48 = vadd.f32 %v3456_v14, %v3394_v42 }
 0x357   :  { %p3949_p4 = pnand %p3948_p3, %p3942_p0 }
 0x358   :  { %v3458_v16 = vadd.f32 %v3457_v48, %v3395_v28 }
 0x35a   :  { %v3459_v0 = vadd.f32 %v3458_v16, %v3396_v59 }
 0x370   :  { %v3863_v53 = vpop.f32.mrb[28].mxu1 }
 0x371   :  { %v3217_v37 = vpop.f32.mrb[29].mxu1  ;;  %v3299_v33 = vmul.f32 %v3863_v53, %v6321_v43 }
 0x372   :  { %v3297_v8 = vmul.f32 %v6321_v43, %v3217_v37  ;;  %v3864_v40 = vpop.f32.mrb[30].mxu1 }
 0x373   :  { %v3220_v6 = vpop.f32.mrb[31].mxu1  ;;  %v3300_v51 = vmul.f32 %v3864_v40, %v6321_v43  ;;  %v3367_v57 = vadd.f32 %v6330_v10, %v3299_v33 }
 0x374   :  { %v3365_v12 = vadd.f32 %v6330_v10, %v3297_v8  ;;  %v3298_v25 = vmul.f32 %v6321_v43, %v3220_v6 }
 0x375   :  { %v3831_v23 = vpop.f32.mrb[28].mxu0  ;;  %v3368_v63 = vadd.f32 %v6330_v10, %v3300_v51  ;;  %v3431_v29 = vmax.f32 %v3367_v57, 0.0 }
 0x376   :  { %v3429_v58 = vmax.f32 %v3365_v12, 0.0  ;;  %v3366_v11 = vadd.f32 %v6330_v10, %v3298_v25  ;;  %v3089_v38 = vpop.f32.mrb[29].mxu0  ;;  %v3267_v17 = vmul.f32 %v3831_v23, %v6321_v43 }
 0x377   :  { %v3265_v60 = vmul.f32 %v6321_v43, %v3089_v38  ;;  %v3832_v39 = vpop.f32.mrb[30].mxu0  ;;  %v3432_v15 = vmax.f32 %v3368_v63, 0.0 }
 0x378   :  { %v3497_v5 = vadd.f32 %v3496_v3, %v3429_v58  ;;  %v3430_v55 = vmax.f32 %v3366_v11, 0.0  ;;  %v3092_v22 = vpop.f32.mrb[31].mxu0  ;;  %v3268_v46 = vmul.f32 %v3832_v39, %v6321_v43  ;;  %v3335_v20 = vadd.f32 %v6330_v10, %v3267_v17 }
 0x379   :  { %v3333_v45 = vadd.f32 %v6330_v10, %v3265_v60  ;;  %v3266_v49 = vmul.f32 %v6321_v43, %v3092_v22 }
 0x37a   :  { %v3498_v27 = vadd.f32 %v3497_v5, %v3430_v55  ;;  %v3336_v47 = vadd.f32 %v6330_v10, %v3268_v46  ;;  %v3399_v61 = vmax.f32 %v3335_v20, 0.0 }
 0x37b   :  { %v3397_v52 = vmax.f32 %v3333_v45, 0.0  ;;  %v3334_v19 = vadd.f32 %v6330_v10, %v3266_v49 }
 0x37c   :  { %v3499_v24 = vadd.f32 %v3498_v27, %v3431_v29  ;;  %v3400_v36 = vmax.f32 %v3336_v47, 0.0 }
 0x37d   :  { %v3460_v4 = vadd.f32 %v3459_v0, %v3397_v52  ;;  %v3398_v30 = vmax.f32 %v3334_v19, 0.0 }
 0x37e   :  { %v3500_v1 = vadd.f32 %v3499_v24, %v3432_v15 }
 0x37f   :  { %v3461_v32 = vadd.f32 %v3460_v4, %v3398_v30 }
 0x380   :  { %v3501_v7 = vrot.slane %v3500_v1, 4 }
 0x381   :  { %v3462_v2 = vadd.f32 %v3461_v32, %v3399_v61 }
 0x382   :  { %v3502_v43 = vadd.f32 %v3501_v7, %v3500_v1 }
 0x383   :  { %v3463_v3 = vadd.f32 %v3462_v2, %v3400_v36 }
 0x384   :  { %v3503_v21 = vrot.slane %v3502_v43, 2 }
 0x385   :  { %v3464_v35 = vrot.slane %v3463_v3, 4 }
 0x386   :  { %v3504_v56 = vadd.f32 %v3503_v21, %v3502_v43 }
 0x387   :  { %v3465_v34 = vadd.f32 %v3464_v35, %v3463_v3 }
 0x388   :  { %v3505_v44 = vrot.slane %v3504_v56, 1 }
 0x389   :  { %v3466_v18 = vrot.slane %v3465_v34, 2 }
 0x38a   :  { %v3506_v10 = vadd.f32 %v3505_v44, %v3504_v56 }
 0x38b   :  { %v3467_v50 = vadd.f32 %v3466_v18, %v3465_v34 }
 0x38c   :  { %v3508_v31 = vmul.f32 0.00390625, %v3506_v10 }
 0x38d   :  { %v3468_v14 = vrot.slane %v3467_v50, 1 }
 0x38e   :  { %v3520_v42 = vmul.f32 %v3518_v26, %v3508_v31 }
 0x38f   :  { %v3469_v28 = vadd.f32 %v3468_v14, %v3467_v50 }
 0x390   :  { %v3526_v59 = vadd.f32 %v3524_v13, %v3520_v42 }
 0x391   :  { %v3507_v48 = vmul.f32 0.00390625, %v3469_v28 }
 0x393   :  { %v3512_v9 = vsel %vm3511_vm15, %v3508_v31, %v3507_v48  ;;  %v3519_v16 = vmul.f32 %v3518_v26, %v3507_v48 }
 0x394   :  { %3514 = vst [vmem:[#allocation3] sm:$0x3] %v3512_v9 }
 0x395   :  { %3952 = shalt.err (!%p3949_p4)
}
 0x396   :  { %s3953_s26 = scalar_lea.hbm %s6687_s3, 32 }
 0x397   :  { %p3954_p5 = scmp.ne.s32.totalorder %s6687_s3, %s3953_s26  ;;  %p3957_p6 = scmp.lt.u32.totalorder %s3953_s26, %s6687_s3 }
 0x399   :  { %p3959_p7 = pnand %p3957_p6, %p3954_p5 }
 0x39b   :  { %3962 = shalt.err (!%p3959_p7)
}
 0x39c   :  { %3542 = dma.vmem_to_hbm [thread:$0]  %s3540_s21, 32, %s6687_s3, [#allocation4]   ;;  %v3525_v0 = vadd.f32 %v3524_v13, %v3519_v16  ;;  %v3529_v53 = vrot.slane %v3526_v59, 7 }
 0x39d   :  { %s3963_s10 = scalar_lea.vmem %s3550_s23, 32  ;;  %p3968_p9 = scmp.lt.s32.totalorder %s3550_s23, %s3550_s23 }
 0x39e   :  { %v3530_v37 = vsel %vm3511_vm15, %v3529_v53, %v3525_v0  ;;  %p3964_p8 = scmp.ne.s32.totalorder %s3550_s23, %s3963_s10  ;;  %p3969_p10 = scmp.lt.s32.totalorder %s3963_s10, %s3963_s10 }
 0x39f   :  { %3532 = vst [vmem:[#allocation5] sm:$0x3] %v3530_v37 }
 0x3a0   :  { %p3970_p11 = por %p3969_p10, %p3968_p9 }
 0x3a2   :  { %p3971_p12 = pnand %p3970_p11, %p3964_p8 }
 0x3a4   :  { %3974 = shalt.err (!%p3971_p12)
}
 0x3a5   :  { %s3975_s11 = scalar_lea.hbm %s6688_s4, 32 }
 0x3a6   :  { %p3976_p13 = scmp.ne.s32.totalorder %s6688_s4, %s3975_s11  ;;  %p3979_p0 = scmp.lt.u32.totalorder %s3975_s11, %s6688_s4 }
 0x3a8   :  { %p3981_p1 = pnand %p3979_p0, %p3976_p13 }
 0x3aa   :  { %3984 = shalt.err (!%p3981_p1)
}
 0x3ab   :  { %3552 = dma.vmem_to_hbm [thread:$0]  %s3550_s23, 32, %s6688_s4, [#allocation6]  }
 0x3ac   :  { %3985 = dma.done.wait [#allocation4], 32  }
 0x3ad   :  { %3986 = vsyncadd [#allocation4], 4294967264 }
 0x3ae   :  { %3987 = dma.done.wait [#allocation6], 32  }
 0x3af   :  { %3988 = vsyncadd [#allocation6], 4294967264 }
 0x3b0   :  { %3559 = vsyncpa [#allocation4], 1 }
 0x3b1   :  { %3560 = vsyncpa [#allocation6], 1 }

</bundles_post_ra>
